<compile_context>
chip_gen: v7x
topology: tpu7x:2x2x1
jax: 0.10.0
libtpu: 0.0.40
codegen_flags: <defaults>
</compile_context>

<pallas_src>
import jax
import jax.numpy as jnp
from jax.experimental import pallas as pl
from jax.experimental.pallas import tpu as pltpu

_BN_EPS = 1e-5     # PyTorch BatchNorm1d default
_B_TILE = 8        # batch rows per grid step == one sublane tile


# ---------------------------------------------------------------------------
# Kernel factory.  All activations are flat 2-D: row = position*B_TILE + batch,
# channels on lanes.  Every slice offset is a multiple of B_TILE=8, so all
# sublane accesses / row-regroup reshapes are tile-aligned.
# ---------------------------------------------------------------------------
def _make_cnnq_kernel(signal_length, b_tile):
    L, Bt = signal_length, b_tile

    def conv3_bn_relu(hflat, lin, w_ref, s_ref, t_ref):
        # hflat: (lin*Bt, Cin); w_ref: (3*Cin, Cout); s/t: (1, Cout) folded BN.
        lout = lin - 2
        cols = jnp.concatenate(                      # im2col on lanes: K = 3*Cin
            [hflat[k * Bt:(k + lout) * Bt] for k in range(3)], axis=-1)
        y = jnp.dot(cols, w_ref[...], preferred_element_type=jnp.float32)
        return jnp.maximum(y * s_ref[...] + t_ref[...], 0.0), lout

    def maxpool2(hflat, lin, c):
        # VPU-only pooling: regroup rows into (pairs, 2*Bt, C) and max halves.
        lp = lin // 2
        h = hflat[: 2 * lp * Bt].reshape(lp, 2 * Bt, c)
        pooled = jnp.maximum(h[:, :Bt, :], h[:, Bt:, :])
        return pooled.reshape(lp * Bt, c), lp

    def kernel(x_ref,
               w1_ref, s1_ref, t1_ref,
               w2_ref, s2_ref, t2_ref,
               w3_ref, s3_ref, t3_ref,
               w4_ref, s4_ref, t4_ref,
               wfc_ref, bfc_ref, wl_ref, bl_ref,
               out_ref):
        h = x_ref[0]                                             # (L*Bt, C)
        h, l1 = conv3_bn_relu(h, L, w1_ref, s1_ref, t1_ref)      # (., 32)
        h, l2 = conv3_bn_relu(h, l1, w2_ref, s2_ref, t2_ref)     # (., 32)
        h, p1 = maxpool2(h, l2, 32)
        h, l3 = conv3_bn_relu(h, p1, w3_ref, s3_ref, t3_ref)     # (., 64)
        h, l4 = conv3_bn_relu(h, l3, w4_ref, s4_ref, t4_ref)     # (., 64)
        h, lf = maxpool2(h, l4, 64)                              # (lf*Bt, 64)

        # Dense: single contraction (Bt, lf*64) x (lf*64, 512).  Feature index
        # is position-major (l*64 + c), matching the wrapper's w_fc layout.
        hcat = jnp.concatenate(
            [h[l * Bt:(l + 1) * Bt] for l in range(lf)], axis=-1)
        d = jnp.dot(hcat, wfc_ref[...], preferred_element_type=jnp.float32)
        d = jnp.maximum(d + bfc_ref[...], 0.0)
        # TODO(synk): nn.Dropout(p=0.2) is identity in eval mode; training-mode
        # stochastic dropout (and batch-statistics BatchNorm) is not implemented.

        q = jnp.dot(d, wl_ref[...], preferred_element_type=jnp.float32) + bl_ref[...]
        out_ref[...] = q.astype(out_ref.dtype)                   # (Bt, OPAD) dense store

    return kernel


# ---------------------------------------------------------------------------
# Parameters (shapes mirror nn.Conv1d / nn.BatchNorm1d / nn.Linear, but stored
# pre-transposed for right-multiplication inside the kernel):
#   conv w: (K, Cin, Cout)  == torch weight (Cout, Cin, K).transpose(2, 1, 0)
#   fc   w: (Lf, 64, 512)   == torch fc.weight.T with feature index permuted
#                              from channel-major (c*Lf+l) to position-major (l*64+c)
#   last w: (512, O)        == torch last_fc.weight.T
# ---------------------------------------------------------------------------
def init_cnnq_params(key, *, channel_size, signal_length, output_size, init_w=0.003):
    C, L = channel_size, signal_length
    P1 = (L - 4) // 2
    Lf = (P1 - 4) // 2
    assert Lf >= 1, "signal_length too small for the conv stack"
    feature = 64 * Lf

    keys = iter(jax.random.split(key, 32))

    def u(shape, lim):
        return jax.random.uniform(next(keys), shape, jnp.float32, -lim, lim)

    def conv_init(cin, cout, k=3):
        lim = (cin * k) ** -0.5
        return u((k, cin, cout), lim), u((cout,), lim)

    def bn_init(c):
        return {"gamma": 1.0 + u((c,), 0.2), "beta": u((c,), 0.1),
                "mean": u((c,), 0.1), "var": 1.0 + u((c,), 0.2)}

    w1, b1 = conv_init(C, 32)
    w2, b2 = conv_init(32, 32)
    w3, b3 = conv_init(32, 64)
    w4, b4 = conv_init(64, 64)
    lim_fc = feature ** -0.5
    return {
        "w1": w1, "b1": b1, "bn1": bn_init(32),
        "w2": w2, "b2": b2, "bn2": bn_init(32),
        "w3": w3, "b3": b3, "bn3": bn_init(64),
        "w4": w4, "b4": b4, "bn4": bn_init(64),
        "w_fc": u((Lf, 64, 512), lim_fc), "b_fc": u((512,), lim_fc),
        "w_last": u((512, output_size), init_w), "b_last": u((output_size,), init_w),
    }


# ---------------------------------------------------------------------------
# Wrapper glue (reshape / action concat / BN folding / batch tiling / padding)
# ---------------------------------------------------------------------------
def _preprocess(x, action_input, C, L):
    if action_input is not None:
        xi = x.reshape(-1, C - 1, L).astype(jnp.float32)
        a = jnp.broadcast_to(action_input.reshape(-1)[:, None, None],
                             (xi.shape[0], 1, L)).astype(jnp.float32)
        xi = jnp.concatenate([a, xi], axis=1)          # action becomes channel 0
    else:
        xi = x.reshape(-1, C, L).astype(jnp.float32)
    return xi                                          # (B, C, L)


def cnnq_forward(params, x, action_input=None, *, channel_size, signal_length,
                 b_tile=_B_TILE):
    C, L = channel_size, signal_length
    xi = _preprocess(x, action_input, C, L)            # (B, C, L)
    B = xi.shape[0]
    Bt = b_tile
    G = pl.cdiv(B, Bt)
    Bp = G * Bt

    P1 = (L - 4) // 2
    Lf = (P1 - 4) // 2
    assert Lf >= 1, "signal_length too small for the conv stack"

    # Pad batch to a multiple of B_TILE and re-layout to (G, L*Bt, C):
    # row (l*Bt + j) of tile g holds batch element g*Bt + j at position l,
    # so every conv-window slice inside the kernel is an 8-row aligned block.
    xp = jnp.zeros((Bp, C, L), jnp.float32).at[:B].set(xi)
    xw = (xp.transpose(0, 2, 1)                        # (Bp, L, C)
            .reshape(G, Bt, L, C)
            .transpose(0, 2, 1, 3)                     # (G, L, Bt, C)
            .reshape(G, L * Bt, C))

    def fold_bn(conv_b, bn):                           # eval-mode BN + conv bias fold
        scale = bn["gamma"] / jnp.sqrt(bn["var"] + _BN_EPS)
        shift = (conv_b - bn["mean"]) * scale + bn["beta"]
        return scale[None, :], shift[None, :]

    s1, t1 = fold_bn(params["b1"], params["bn1"])
    s2, t2 = fold_bn(params["b2"], params["bn2"])
    s3, t3 = fold_bn(params["b3"], params["bn3"])
    s4, t4 = fold_bn(params["b4"], params["bn4"])

    # Conv weights flattened tap-major: row = k*Cin + c (matches im2col lanes).
    w1 = params["w1"].reshape(-1, params["w1"].shape[-1])
    w2 = params["w2"].reshape(-1, params["w2"].shape[-1])
    w3 = params["w3"].reshape(-1, params["w3"].shape[-1])
    w4 = params["w4"].reshape(-1, params["w4"].shape[-1])
    wfc = params["w_fc"].reshape(Lf * 64, 512)         # row = l*64 + c
    bfc = params["b_fc"].reshape(1, 512)

    O = params["w_last"].shape[1]
    OPAD = 128 * max(1, (O + 127) // 128)              # lane-dense output width
    wl = jnp.zeros((512, OPAD), jnp.float32).at[:, :O].set(params["w_last"])
    bl = jnp.zeros((1, OPAD), jnp.float32).at[0, :O].set(params["b_last"])

    operands = [w1, s1, t1,
                w2, s2, t2,
                w3, s3, t3,
                w4, s4, t4,
                wfc, bfc, wl, bl]

    in_specs = [pl.BlockSpec((1, L * Bt, C), lambda g: (g, 0, 0))]
    for arr in operands:                               # full-array blocks, constant maps
        in_specs.append(pl.BlockSpec(arr.shape, lambda g, _n=arr.ndim: (0,) * _n))

    kernel = _make_cnnq_kernel(L, Bt)
    out = pl.pallas_call(
        kernel,
        out_shape=jax.ShapeDtypeStruct((Bp, OPAD), jnp.float32),
        grid_spec=pltpu.PrefetchScalarGridSpec(
            num_scalar_prefetch=0,
            grid=(G,),
            in_specs=in_specs,
            out_specs=pl.BlockSpec((Bt, OPAD), lambda g: (g, 0)),
        ),
        compiler_params=pltpu.CompilerParams(
            dimension_semantics=("parallel",)),        # batch tiles split across TCs on v7x
    )(xw, *operands)
    return out[:B, :O]


# ---------------------------------------------------------------------------
# Pure-JAX reference (unfolded BN, explicit pooling) for correctness checks.
# ---------------------------------------------------------------------------
def cnnq_reference(params, x, action_input=None, *, channel_size, signal_length):
    C, L = channel_size, signal_length
    h = jnp.transpose(_preprocess(x, action_input, C, L), (0, 2, 1))   # (B, L, C)

    def conv_bn_relu(h, w, b, bn):
        lout = h.shape[1] - 2
        y = b[None, None, :]
        for k in range(3):
            y = y + jnp.einsum('blc,cd->bld', h[:, k:k + lout, :], w[k])
        y = (y - bn["mean"]) / jnp.sqrt(bn["var"] + _BN_EPS) * bn["gamma"] + bn["beta"]
        return jnp.maximum(y, 0.0)

    def maxpool(h):
        lp = h.shape[1] // 2
        return h[:, :lp * 2, :].reshape(h.shape[0], lp, 2, h.shape[2]).max(axis=2)

    h = conv_bn_relu(h, params["w1"], params["b1"], params["bn1"])
    h = conv_bn_relu(h, params["w2"], params["b2"], params["bn2"])
    h = maxpool(h)
    h = conv_bn_relu(h, params["w3"], params["b3"], params["bn3"])
    h = conv_bn_relu(h, params["w4"], params["b4"], params["bn4"])
    h = maxpool(h)                                                    # (B, Lf, 64)
    flat = h.reshape(h.shape[0], -1)                                  # position-major
    d = jnp.maximum(flat @ params["w_fc"].reshape(-1, 512) + params["b_fc"], 0.0)
    return d @ params["w_last"] + params["b_last"]


if __name__ == "__main__":
    # CNNQ(input_size=(channel_size, signal_length), output_size)
    C, L, O = 4, 32, 4

    key = jax.random.PRNGKey(0)
    kp, kx, kx2, ka = jax.random.split(key, 4)
    params = init_cnnq_params(kp, channel_size=C, signal_length=L, output_size=O)

    # State-only path: B=16 -> two batch tiles -> grid=(2,) (megacore-splittable).
    B1 = 16
    x = jax.random.normal(kx, (B1, C, L), dtype=jnp.float32)
    out = jax.block_until_ready(
        cnnq_forward(params, x, channel_size=C, signal_length=L))
    ref = cnnq_reference(params, x, channel_size=C, signal_length=L)
    assert out.shape == (B1, O)
    assert jnp.allclose(out, ref, atol=1e-4, rtol=1e-4), (out, ref)

    # State + action path: input has C-1 channels, action is prepended as
    # channel 0.  B=6 also exercises the batch-tile padding path.
    B2 = 6
    xa = jax.random.normal(kx2, (B2, C - 1, L), dtype=jnp.float32)
    act = jax.random.uniform(ka, (B2,), jnp.float32, -1.0, 1.0)
    out_a = jax.block_until_ready(
        cnnq_forward(params, xa, act, channel_size=C, signal_length=L))
    ref_a = cnnq_reference(params, xa, act, channel_size=C, signal_length=L)
    assert out_a.shape == (B2, O)
    assert jnp.allclose(out_a, ref_a, atol=1e-4, rtol=1e-4), (out_a, ref_a)

    print("KERNEL_OK")
</pallas_src>

<mosaic_0001>
module attributes {stable_mosaic.version = 11 : i64} {
  func.func @kernel(%arg0: i32, %arg1: memref<1x256x4xf32, #tpu.memory_space<vmem>>, %arg2: memref<12x32xf32, #tpu.memory_space<vmem>>, %arg3: memref<1x32xf32, #tpu.memory_space<vmem>>, %arg4: memref<1x32xf32, #tpu.memory_space<vmem>>, %arg5: memref<96x32xf32, #tpu.memory_space<vmem>>, %arg6: memref<1x32xf32, #tpu.memory_space<vmem>>, %arg7: memref<1x32xf32, #tpu.memory_space<vmem>>, %arg8: memref<96x64xf32, #tpu.memory_space<vmem>>, %arg9: memref<1x64xf32, #tpu.memory_space<vmem>>, %arg10: memref<1x64xf32, #tpu.memory_space<vmem>>, %arg11: memref<192x64xf32, #tpu.memory_space<vmem>>, %arg12: memref<1x64xf32, #tpu.memory_space<vmem>>, %arg13: memref<1x64xf32, #tpu.memory_space<vmem>>, %arg14: memref<320x512xf32, #tpu.memory_space<vmem>>, %arg15: memref<1x512xf32, #tpu.memory_space<vmem>>, %arg16: memref<512x128xf32, #tpu.memory_space<vmem>>, %arg17: memref<1x128xf32, #tpu.memory_space<vmem>>, %arg18: memref<8x128xf32, #tpu.memory_space<vmem>>) attributes {dimension_semantics = [#tpu.dimension_semantics<parallel>], iteration_bounds = array<i64: 2>, scalar_prefetch = 0 : i64, scratch_operands = 0 : i64, tpu.core_type = #tpu.core_type<tc>, window_params = [{transform_indices = @transform_0, window_bounds = array<i64: 1, 256, 4>}, {pipeline_mode = #tpu.pipeline_mode<synchronous>, transform_indices = @transform_1, window_bounds = array<i64: 12, 32>}, {pipeline_mode = #tpu.pipeline_mode<synchronous>, transform_indices = @transform_2, window_bounds = array<i64: 1, 32>}, {pipeline_mode = #tpu.pipeline_mode<synchronous>, transform_indices = @transform_3, window_bounds = array<i64: 1, 32>}, {pipeline_mode = #tpu.pipeline_mode<synchronous>, transform_indices = @transform_4, window_bounds = array<i64: 96, 32>}, {pipeline_mode = #tpu.pipeline_mode<synchronous>, transform_indices = @transform_5, window_bounds = array<i64: 1, 32>}, {pipeline_mode = #tpu.pipeline_mode<synchronous>, transform_indices = @transform_6, window_bounds = array<i64: 1, 32>}, {pipeline_mode = #tpu.pipeline_mode<synchronous>, transform_indices = @transform_7, window_bounds = array<i64: 96, 64>}, {pipeline_mode = #tpu.pipeline_mode<synchronous>, transform_indices = @transform_8, window_bounds = array<i64: 1, 64>}, {pipeline_mode = #tpu.pipeline_mode<synchronous>, transform_indices = @transform_9, window_bounds = array<i64: 1, 64>}, {pipeline_mode = #tpu.pipeline_mode<synchronous>, transform_indices = @transform_10, window_bounds = array<i64: 192, 64>}, {pipeline_mode = #tpu.pipeline_mode<synchronous>, transform_indices = @transform_11, window_bounds = array<i64: 1, 64>}, {pipeline_mode = #tpu.pipeline_mode<synchronous>, transform_indices = @transform_12, window_bounds = array<i64: 1, 64>}, {pipeline_mode = #tpu.pipeline_mode<synchronous>, transform_indices = @transform_13, window_bounds = array<i64: 320, 512>}, {pipeline_mode = #tpu.pipeline_mode<synchronous>, transform_indices = @transform_14, window_bounds = array<i64: 1, 512>}, {pipeline_mode = #tpu.pipeline_mode<synchronous>, transform_indices = @transform_15, window_bounds = array<i64: 512, 128>}, {pipeline_mode = #tpu.pipeline_mode<synchronous>, transform_indices = @transform_16, window_bounds = array<i64: 1, 128>}, {transform_indices = @transform_17, window_bounds = array<i64: 8, 128>}]} {
    %c0 = arith.constant 0 : index
    %c0_0 = arith.constant 0 : index
    %c0_1 = arith.constant 0 : index
    %0 = vector.load %arg1[%c0, %c0_0, %c0_1] : memref<1x256x4xf32, #tpu.memory_space<vmem>>, vector<1x256x4xf32>
    %1 = vector.shape_cast %0 : vector<1x256x4xf32> to vector<256x4xf32>
    %2 = vector.extract_strided_slice %1 {offsets = [0, 0], sizes = [240, 4], strides = [1, 1]} : vector<256x4xf32> to vector<240x4xf32>
    %3 = vector.extract_strided_slice %1 {offsets = [8, 0], sizes = [240, 4], strides = [1, 1]} : vector<256x4xf32> to vector<240x4xf32>
    %4 = vector.extract_strided_slice %1 {offsets = [16, 0], sizes = [240, 4], strides = [1, 1]} : vector<256x4xf32> to vector<240x4xf32>
    %5 = tpu.concatenate %2, %3, %4 in 1 : vector<240x4xf32>, vector<240x4xf32>, vector<240x4xf32> -> vector<240x12xf32>
    %c0_2 = arith.constant 0 : index
    %c0_3 = arith.constant 0 : index
    %6 = vector.load %arg2[%c0_2, %c0_3] : memref<12x32xf32, #tpu.memory_space<vmem>>, vector<12x32xf32>
    %cst = arith.constant dense<0.000000e+00> : vector<240x32xf32>
    %7 = tpu.matmul %5, %6, %cst {dimension_numbers = #tpu.dot_dimension_numbers<[1], [0], [0], [1], [0, 0, 1, 1], [], []>} : vector<240x12xf32>, vector<12x32xf32>, vector<240x32xf32> -> vector<240x32xf32>
    %c0_4 = arith.constant 0 : index
    %c0_5 = arith.constant 0 : index
    %8 = vector.load %arg3[%c0_4, %c0_5] : memref<1x32xf32, #tpu.memory_space<vmem>>, vector<1x32xf32>
    %9 = vector.broadcast %8 : vector<1x32xf32> to vector<240x32xf32>
    %10 = arith.mulf %7, %9 : vector<240x32xf32>
    %c0_6 = arith.constant 0 : index
    %c0_7 = arith.constant 0 : index
    %11 = vector.load %arg4[%c0_6, %c0_7] : memref<1x32xf32, #tpu.memory_space<vmem>>, vector<1x32xf32>
    %12 = vector.broadcast %11 : vector<1x32xf32> to vector<240x32xf32>
    %13 = arith.addf %10, %12 : vector<240x32xf32>
    %cst_8 = arith.constant 0.000000e+00 : f32
    %14 = vector.broadcast %cst_8 : f32 to vector<240x32xf32>
    %15 = arith.maximumf %13, %14 : vector<240x32xf32>
    %16 = vector.extract_strided_slice %15 {offsets = [0, 0], sizes = [224, 32], strides = [1, 1]} : vector<240x32xf32> to vector<224x32xf32>
    %17 = vector.extract_strided_slice %15 {offsets = [8, 0], sizes = [224, 32], strides = [1, 1]} : vector<240x32xf32> to vector<224x32xf32>
    %18 = vector.extract_strided_slice %15 {offsets = [16, 0], sizes = [224, 32], strides = [1, 1]} : vector<240x32xf32> to vector<224x32xf32>
    %19 = tpu.concatenate %16, %17, %18 in 1 : vector<224x32xf32>, vector<224x32xf32>, vector<224x32xf32> -> vector<224x96xf32>
    %c0_9 = arith.constant 0 : index
    %c0_10 = arith.constant 0 : index
    %20 = vector.load %arg5[%c0_9, %c0_10] : memref<96x32xf32, #tpu.memory_space<vmem>>, vector<96x32xf32>
    %cst_11 = arith.constant dense<0.000000e+00> : vector<224x32xf32>
    %21 = tpu.matmul %19, %20, %cst_11 {dimension_numbers = #tpu.dot_dimension_numbers<[1], [0], [0], [1], [0, 0, 1, 1], [], []>} : vector<224x96xf32>, vector<96x32xf32>, vector<224x32xf32> -> vector<224x32xf32>
    %c0_12 = arith.constant 0 : index
    %c0_13 = arith.constant 0 : index
    %22 = vector.load %arg6[%c0_12, %c0_13] : memref<1x32xf32, #tpu.memory_space<vmem>>, vector<1x32xf32>
    %23 = vector.broadcast %22 : vector<1x32xf32> to vector<224x32xf32>
    %24 = arith.mulf %21, %23 : vector<224x32xf32>
    %c0_14 = arith.constant 0 : index
    %c0_15 = arith.constant 0 : index
    %25 = vector.load %arg7[%c0_14, %c0_15] : memref<1x32xf32, #tpu.memory_space<vmem>>, vector<1x32xf32>
    %26 = vector.broadcast %25 : vector<1x32xf32> to vector<224x32xf32>
    %27 = arith.addf %24, %26 : vector<224x32xf32>
    %cst_16 = arith.constant 0.000000e+00 : f32
    %28 = vector.broadcast %cst_16 : f32 to vector<224x32xf32>
    %29 = arith.maximumf %27, %28 : vector<224x32xf32>
    %30 = vector.shape_cast %29 : vector<224x32xf32> to vector<14x16x32xf32>
    %31 = vector.extract_strided_slice %30 {offsets = [0, 0, 0], sizes = [14, 8, 32], strides = [1, 1, 1]} : vector<14x16x32xf32> to vector<14x8x32xf32>
    %32 = vector.extract_strided_slice %30 {offsets = [0, 8, 0], sizes = [14, 8, 32], strides = [1, 1, 1]} : vector<14x16x32xf32> to vector<14x8x32xf32>
    %33 = arith.maximumf %31, %32 : vector<14x8x32xf32>
    %34 = vector.shape_cast %33 : vector<14x8x32xf32> to vector<112x32xf32>
    %35 = vector.extract_strided_slice %34 {offsets = [0, 0], sizes = [96, 32], strides = [1, 1]} : vector<112x32xf32> to vector<96x32xf32>
    %36 = vector.extract_strided_slice %34 {offsets = [8, 0], sizes = [96, 32], strides = [1, 1]} : vector<112x32xf32> to vector<96x32xf32>
    %37 = vector.extract_strided_slice %34 {offsets = [16, 0], sizes = [96, 32], strides = [1, 1]} : vector<112x32xf32> to vector<96x32xf32>
    %38 = tpu.concatenate %35, %36, %37 in 1 : vector<96x32xf32>, vector<96x32xf32>, vector<96x32xf32> -> vector<96x96xf32>
    %c0_17 = arith.constant 0 : index
    %c0_18 = arith.constant 0 : index
    %39 = vector.load %arg8[%c0_17, %c0_18] : memref<96x64xf32, #tpu.memory_space<vmem>>, vector<96x64xf32>
    %cst_19 = arith.constant dense<0.000000e+00> : vector<96x64xf32>
    %40 = tpu.matmul %38, %39, %cst_19 {dimension_numbers = #tpu.dot_dimension_numbers<[1], [0], [0], [1], [0, 0, 1, 1], [], []>} : vector<96x96xf32>, vector<96x64xf32>, vector<96x64xf32> -> vector<96x64xf32>
    %c0_20 = arith.constant 0 : index
    %c0_21 = arith.constant 0 : index
    %41 = vector.load %arg9[%c0_20, %c0_21] : memref<1x64xf32, #tpu.memory_space<vmem>>, vector<1x64xf32>
    %42 = vector.broadcast %41 : vector<1x64xf32> to vector<96x64xf32>
    %43 = arith.mulf %40, %42 : vector<96x64xf32>
    %c0_22 = arith.constant 0 : index
    %c0_23 = arith.constant 0 : index
    %44 = vector.load %arg10[%c0_22, %c0_23] : memref<1x64xf32, #tpu.memory_space<vmem>>, vector<1x64xf32>
    %45 = vector.broadcast %44 : vector<1x64xf32> to vector<96x64xf32>
    %46 = arith.addf %43, %45 : vector<96x64xf32>
    %cst_24 = arith.constant 0.000000e+00 : f32
    %47 = vector.broadcast %cst_24 : f32 to vector<96x64xf32>
    %48 = arith.maximumf %46, %47 : vector<96x64xf32>
    %49 = vector.extract_strided_slice %48 {offsets = [0, 0], sizes = [80, 64], strides = [1, 1]} : vector<96x64xf32> to vector<80x64xf32>
    %50 = vector.extract_strided_slice %48 {offsets = [8, 0], sizes = [80, 64], strides = [1, 1]} : vector<96x64xf32> to vector<80x64xf32>
    %51 = vector.extract_strided_slice %48 {offsets = [16, 0], sizes = [80, 64], strides = [1, 1]} : vector<96x64xf32> to vector<80x64xf32>
    %52 = tpu.concatenate %49, %50, %51 in 1 : vector<80x64xf32>, vector<80x64xf32>, vector<80x64xf32> -> vector<80x192xf32>
    %c0_25 = arith.constant 0 : index
    %c0_26 = arith.constant 0 : index
    %53 = vector.load %arg11[%c0_25, %c0_26] : memref<192x64xf32, #tpu.memory_space<vmem>>, vector<192x64xf32>
    %cst_27 = arith.constant dense<0.000000e+00> : vector<80x64xf32>
    %54 = tpu.matmul %52, %53, %cst_27 {dimension_numbers = #tpu.dot_dimension_numbers<[1], [0], [0], [1], [0, 0, 1, 1], [], []>} : vector<80x192xf32>, vector<192x64xf32>, vector<80x64xf32> -> vector<80x64xf32>
    %c0_28 = arith.constant 0 : index
    %c0_29 = arith.constant 0 : index
    %55 = vector.load %arg12[%c0_28, %c0_29] : memref<1x64xf32, #tpu.memory_space<vmem>>, vector<1x64xf32>
    %56 = vector.broadcast %55 : vector<1x64xf32> to vector<80x64xf32>
    %57 = arith.mulf %54, %56 : vector<80x64xf32>
    %c0_30 = arith.constant 0 : index
    %c0_31 = arith.constant 0 : index
    %58 = vector.load %arg13[%c0_30, %c0_31] : memref<1x64xf32, #tpu.memory_space<vmem>>, vector<1x64xf32>
    %59 = vector.broadcast %58 : vector<1x64xf32> to vector<80x64xf32>
    %60 = arith.addf %57, %59 : vector<80x64xf32>
    %cst_32 = arith.constant 0.000000e+00 : f32
    %61 = vector.broadcast %cst_32 : f32 to vector<80x64xf32>
    %62 = arith.maximumf %60, %61 : vector<80x64xf32>
    %63 = vector.shape_cast %62 : vector<80x64xf32> to vector<5x16x64xf32>
    %64 = vector.extract_strided_slice %63 {offsets = [0, 0, 0], sizes = [5, 8, 64], strides = [1, 1, 1]} : vector<5x16x64xf32> to vector<5x8x64xf32>
    %65 = vector.extract_strided_slice %63 {offsets = [0, 8, 0], sizes = [5, 8, 64], strides = [1, 1, 1]} : vector<5x16x64xf32> to vector<5x8x64xf32>
    %66 = arith.maximumf %64, %65 : vector<5x8x64xf32>
    %67 = vector.shape_cast %66 : vector<5x8x64xf32> to vector<40x64xf32>
    %68 = vector.extract_strided_slice %67 {offsets = [0, 0], sizes = [8, 64], strides = [1, 1]} : vector<40x64xf32> to vector<8x64xf32>
    %69 = vector.extract_strided_slice %67 {offsets = [8, 0], sizes = [8, 64], strides = [1, 1]} : vector<40x64xf32> to vector<8x64xf32>
    %70 = vector.extract_strided_slice %67 {offsets = [16, 0], sizes = [8, 64], strides = [1, 1]} : vector<40x64xf32> to vector<8x64xf32>
    %71 = vector.extract_strided_slice %67 {offsets = [24, 0], sizes = [8, 64], strides = [1, 1]} : vector<40x64xf32> to vector<8x64xf32>
    %72 = vector.extract_strided_slice %67 {offsets = [32, 0], sizes = [8, 64], strides = [1, 1]} : vector<40x64xf32> to vector<8x64xf32>
    %73 = tpu.concatenate %68, %69, %70, %71, %72 in 1 : vector<8x64xf32>, vector<8x64xf32>, vector<8x64xf32>, vector<8x64xf32>, vector<8x64xf32> -> vector<8x320xf32>
    %c0_33 = arith.constant 0 : index
    %c0_34 = arith.constant 0 : index
    %74 = vector.load %arg14[%c0_33, %c0_34] : memref<320x512xf32, #tpu.memory_space<vmem>>, vector<320x512xf32>
    %cst_35 = arith.constant dense<0.000000e+00> : vector<8x512xf32>
    %75 = tpu.matmul %73, %74, %cst_35 {dimension_numbers = #tpu.dot_dimension_numbers<[1], [0], [0], [1], [0, 0, 1, 1], [], []>} : vector<8x320xf32>, vector<320x512xf32>, vector<8x512xf32> -> vector<8x512xf32>
    %c0_36 = arith.constant 0 : index
    %c0_37 = arith.constant 0 : index
    %76 = vector.load %arg15[%c0_36, %c0_37] : memref<1x512xf32, #tpu.memory_space<vmem>>, vector<1x512xf32>
    %77 = vector.broadcast %76 : vector<1x512xf32> to vector<8x512xf32>
    %78 = arith.addf %75, %77 : vector<8x512xf32>
    %cst_38 = arith.constant 0.000000e+00 : f32
    %79 = vector.broadcast %cst_38 : f32 to vector<8x512xf32>
    %80 = arith.maximumf %78, %79 : vector<8x512xf32>
    %c0_39 = arith.constant 0 : index
    %c0_40 = arith.constant 0 : index
    %81 = vector.load %arg16[%c0_39, %c0_40] : memref<512x128xf32, #tpu.memory_space<vmem>>, vector<512x128xf32>
    %cst_41 = arith.constant dense<0.000000e+00> : vector<8x128xf32>
    %82 = tpu.matmul %80, %81, %cst_41 {dimension_numbers = #tpu.dot_dimension_numbers<[1], [0], [0], [1], [0, 0, 1, 1], [], []>} : vector<8x512xf32>, vector<512x128xf32>, vector<8x128xf32> -> vector<8x128xf32>
    %c0_42 = arith.constant 0 : index
    %c0_43 = arith.constant 0 : index
    %83 = vector.load %arg17[%c0_42, %c0_43] : memref<1x128xf32, #tpu.memory_space<vmem>>, vector<1x128xf32>
    %84 = vector.broadcast %83 : vector<1x128xf32> to vector<8x128xf32>
    %85 = arith.addf %82, %84 : vector<8x128xf32>
    %c0_44 = arith.constant 0 : index
    %c0_45 = arith.constant 0 : index
    %86 = vector.load %arg18[%c0_44, %c0_45] : memref<8x128xf32, #tpu.memory_space<vmem>>, vector<8x128xf32>
    tpu.vector_store %arg18[%c0_44, %c0_45], %85 {strides = array<i32>} : memref<8x128xf32, #tpu.memory_space<vmem>>, vector<8x128xf32>,
    return
  }
  func.func @transform_0(%arg0: i32) -> (i32, i32, i32) {
    %c0_i32 = arith.constant 0 : i32
    %c0_i32_0 = arith.constant 0 : i32
    %c0_i32_1 = arith.constant 0 : i32
    return %arg0, %c0_i32, %c0_i32_0 : i32, i32, i32
  }
  func.func @transform_1(%arg0: i32) -> (i32, i32) {
    %c0_i32 = arith.constant 0 : i32
    %c0_i32_0 = arith.constant 0 : i32
    %c0_i32_1 = arith.constant 0 : i32
    return %c0_i32, %c0_i32_0 : i32, i32
  }
  func.func @transform_2(%arg0: i32) -> (i32, i32) {
    %c0_i32 = arith.constant 0 : i32
    %c0_i32_0 = arith.constant 0 : i32
    %c0_i32_1 = arith.constant 0 : i32
    return %c0_i32, %c0_i32_0 : i32, i32
  }
  func.func @transform_3(%arg0: i32) -> (i32, i32) {
    %c0_i32 = arith.constant 0 : i32
    %c0_i32_0 = arith.constant 0 : i32
    %c0_i32_1 = arith.constant 0 : i32
    return %c0_i32, %c0_i32_0 : i32, i32
  }
  func.func @transform_4(%arg0: i32) -> (i32, i32) {
    %c0_i32 = arith.constant 0 : i32
    %c0_i32_0 = arith.constant 0 : i32
    %c0_i32_1 = arith.constant 0 : i32
    return %c0_i32, %c0_i32_0 : i32, i32
  }
  func.func @transform_5(%arg0: i32) -> (i32, i32) {
    %c0_i32 = arith.constant 0 : i32
    %c0_i32_0 = arith.constant 0 : i32
    %c0_i32_1 = arith.constant 0 : i32
    return %c0_i32, %c0_i32_0 : i32, i32
  }
  func.func @transform_6(%arg0: i32) -> (i32, i32) {
    %c0_i32 = arith.constant 0 : i32
    %c0_i32_0 = arith.constant 0 : i32
    %c0_i32_1 = arith.constant 0 : i32
    return %c0_i32, %c0_i32_0 : i32, i32
  }
  func.func @transform_7(%arg0: i32) -> (i32, i32) {
    %c0_i32 = arith.constant 0 : i32
    %c0_i32_0 = arith.constant 0 : i32
    %c0_i32_1 = arith.constant 0 : i32
    return %c0_i32, %c0_i32_0 : i32, i32
  }
  func.func @transform_8(%arg0: i32) -> (i32, i32) {
    %c0_i32 = arith.constant 0 : i32
    %c0_i32_0 = arith.constant 0 : i32
    %c0_i32_1 = arith.constant 0 : i32
    return %c0_i32, %c0_i32_0 : i32, i32
  }
  func.func @transform_9(%arg0: i32) -> (i32, i32) {
    %c0_i32 = arith.constant 0 : i32
    %c0_i32_0 = arith.constant 0 : i32
    %c0_i32_1 = arith.constant 0 : i32
    return %c0_i32, %c0_i32_0 : i32, i32
  }
  func.func @transform_10(%arg0: i32) -> (i32, i32) {
    %c0_i32 = arith.constant 0 : i32
    %c0_i32_0 = arith.constant 0 : i32
    %c0_i32_1 = arith.constant 0 : i32
    return %c0_i32, %c0_i32_0 : i32, i32
  }
  func.func @transform_11(%arg0: i32) -> (i32, i32) {
    %c0_i32 = arith.constant 0 : i32
    %c0_i32_0 = arith.constant 0 : i32
    %c0_i32_1 = arith.constant 0 : i32
    return %c0_i32, %c0_i32_0 : i32, i32
  }
  func.func @transform_12(%arg0: i32) -> (i32, i32) {
    %c0_i32 = arith.constant 0 : i32
    %c0_i32_0 = arith.constant 0 : i32
    %c0_i32_1 = arith.constant 0 : i32
    return %c0_i32, %c0_i32_0 : i32, i32
  }
  func.func @transform_13(%arg0: i32) -> (i32, i32) {
    %c0_i32 = arith.constant 0 : i32
    %c0_i32_0 = arith.constant 0 : i32
    %c0_i32_1 = arith.constant 0 : i32
    return %c0_i32, %c0_i32_0 : i32, i32
  }
  func.func @transform_14(%arg0: i32) -> (i32, i32) {
    %c0_i32 = arith.constant 0 : i32
    %c0_i32_0 = arith.constant 0 : i32
    %c0_i32_1 = arith.constant 0 : i32
    return %c0_i32, %c0_i32_0 : i32, i32
  }
  func.func @transform_15(%arg0: i32) -> (i32, i32) {
    %c0_i32 = arith.constant 0 : i32
    %c0_i32_0 = arith.constant 0 : i32
    %c0_i32_1 = arith.constant 0 : i32
    return %c0_i32, %c0_i32_0 : i32, i32
  }
  func.func @transform_16(%arg0: i32) -> (i32, i32) {
    %c0_i32 = arith.constant 0 : i32
    %c0_i32_0 = arith.constant 0 : i32
    %c0_i32_1 = arith.constant 0 : i32
    return %c0_i32, %c0_i32_0 : i32, i32
  }
  func.func @transform_17(%arg0: i32) -> (i32, i32) {
    %c0_i32 = arith.constant 0 : i32
    %c0_i32_0 = arith.constant 0 : i32
    return %arg0, %c0_i32 : i32, i32
  }
}

</mosaic_0001>

<bundles_post_ra>
// kernel: tpu_custom_call.1
= control target key start
LH: loop header
LB: loop body
LE: loop exit
PB: predicated region body
PF: predicated region fallthrough
CT: control target
= control target key end

     0   :  { %s5785_s0 = inlined_call_operand.vmem [shape: f32[2,256,4], index: 0, kind: input, shape index: {}]   ;;  %s5786_s1 = inlined_call_operand.vmem [shape: f32[12,32], index: 1, kind: input, shape index: {}]   ;;  %s5787_s2 = inlined_call_operand.vmem [shape: f32[1,32], index: 2, kind: input, shape index: {}]   ;;  %s5788_s3 = inlined_call_operand.vmem [shape: f32[1,32], index: 3, kind: input, shape index: {}]   ;;  %s5789_s4 = inlined_call_operand.vmem [shape: f32[96,32], index: 4, kind: input, shape index: {}]   ;;  %s5790_s5 = inlined_call_operand.vmem [shape: f32[1,32], index: 5, kind: input, shape index: {}]   ;;  %s5791_s6 = inlined_call_operand.vmem [shape: f32[1,32], index: 6, kind: input, shape index: {}]   ;;  %s5792_s7 = inlined_call_operand.vmem [shape: f32[96,64], index: 7, kind: input, shape index: {}]   ;;  %s5793_s8 = inlined_call_operand.vmem [shape: f32[1,64], index: 8, kind: input, shape index: {}]   ;;  %s5794_s9 = inlined_call_operand.vmem [shape: f32[1,64], index: 9, kind: input, shape index: {}]   ;;  %s5795_s10 = inlined_call_operand.vmem [shape: f32[192,64], index: 10, kind: input, shape index: {}]   ;;  %s5796_s11 = inlined_call_operand.vmem [shape: f32[1,64], index: 11, kind: input, shape index: {}]   ;;  %s5797_s12 = inlined_call_operand.vmem [shape: f32[1,64], index: 12, kind: input, shape index: {}]   ;;  %s5798_s13 = inlined_call_operand.hbm [shape: f32[320,512], index: 13, kind: input, shape index: {}]   ;;  %s5799_s14 = inlined_call_operand.vmem [shape: f32[1,512], index: 14, kind: input, shape index: {}]   ;;  %s5800_s15 = inlined_call_operand.vmem [shape: f32[512,128], index: 15, kind: input, shape index: {}]   ;;  %s5801_s16 = inlined_call_operand.vmem [shape: f32[1,128], index: 16, kind: input, shape index: {}]   ;;  %s5802_s17 = inlined_call_operand.hbm [shape: f32[16,128], index: 17, kind: output, shape index: {}]  }
   0x1   :  { %5813 = sst [smem:[#allocation14_spill]] %s5785_s0 }
   0x2   :  { %5814 = sst [smem:[#allocation15_spill]] %s5786_s1 }
   0x3   :  { %5815 = sst [smem:[#allocation16_spill]] %s5787_s2 }
   0x4   :  { %22 = vsyncpa [#allocation3], 0 }
   0x5   :  { %23 = vsyncpa [#allocation4], 0 }
   0x6   :  { %25 = vsyncpa [#allocation4 + $0x1], 0  ;;  %s4335_s24 = smov 0   ;;  %s4337_s25 = smov 0  }
   0x7   :  { %s4339_s26 = smov 0   ;;  %s4341_s27 = smov 0  }
   0x8 LB: > { %5816 = sst [smem:[#allocation8_spill]] %s4220_s24  ;;  %s4356_s28 = sadd.s32 4294967295, %s4232_s27   ;;  %s4232_s27 = sphi %s4341_s27, %s5837_s27   ;;  %s4228_s26 = sphi %s4339_s26, %s5839_s26   ;;  %s4224_s25 = sphi %s4337_s25, %s5841_s25   ;;  %s4220_s24 = sphi %s4335_s24, %s5840_s24  }
   0x9   : > { %5817 = sst [smem:[#allocation9_spill]] %s4228_s26  ;;  %s3323_s29 = sadd.s32 4294967294, %s4232_s27  }
   0xa   : > { %5818 = sst [smem:[#allocation10_spill]] %s4232_s27  ;;  %s4360_s0 = sadd.s32 1, %s4232_s27  }
   0xb   : > { %5819 = sst [smem:[#allocation11_spill]] %s4360_s0  ;;  %s400_s30 = sadd.s32 1, %s4228_s26 }
   0xc   : > { %s397_s18 = ssub.s32 %s4232_s27, %s4360_s0  ;;  %p410_p0 = scmp.ne.s32.totalorder %s4228_s26, %s4224_s25 }
   0xd   : > { %p398_p1 = scmp.eq.s32.totalorder %s397_s18, 0  ;;  %p411_p2 = scmp.eq.s32.totalorder %s4356_s28, 1 }
   0xe   : > { %p416_p3 = scmp.ne.s32.totalorder %s4224_s25, %s4220_s24  ;;  %p417_p4 = scmp.eq.s32.totalorder %s3323_s29, 1 }
   0xf   : > { %s4371_s19 = scalar_select %p398_p1, %s4228_s26, %s400_s30  }
  0x10   : > { %p4373_p5 = por %p411_p2, %p410_p0  ;;  %p4377_p6 = por %p417_p4, %p416_p3 }
  0x11   : > { %5820 = sst [smem:[#allocation12_spill]] %s4371_s19  ;;  %p3324_p7 = scmp.ge.s32.totalorder %s4232_s27, 1 }
  0x12   : > { %s5821_s1 = scalar_select %p4373_p5, 1, 0 }
  0x13   : > { %s5822_s20 = scalar_select %p4377_p6, 1, 0 }
  0x14   : > { %p424_p8 = scmp.lt.s32.totalorder %s4232_s27, 3  ;;  %p5809_p9 = scmp.eq.s32.totalorder %s4356_s28, 0 }
  0x15   : > { %5823 = sst [smem:[#allocation13_spill]] %s5822_s20  ;;  %s4234_s22 = smov [#allocation2]  }
  0x16   : > { %p4384_p10 = pnand %p3324_p7, %p424_p8  ;;  %s472_s23 = sshll.u32 %s4234_s22, 4  ;;  %s473_s23 = int_to_ptr.vmem [resolvable:$true] %s472_s23 }
  0x17   : > { %s4138_s19 = scalar_lea.hbm %s5798_s13, 20480 }
  0x18   : > { %s5824_s21 = scalar_select %p4384_p10, 1, 0 }
  0x19   : > { %p4080_p11 = pneg %p4384_p10  ;;  %p4139_p13 = scmp.ne.s32.totalorder %s5798_s13, %s4138_s19 }
  0x1a   : > { %p4145_p3 = scmp.lt.u32.totalorder %s4138_s19, %s5798_s13 }
  0x1b   : > { %p4392_p12 = pnand %p5809_p9, %p4080_p11 }
  0x1d   : > { %p4140_p0 = pneg %p4392_p12 }
  0x1f   : > { %p4141_p1 = pnand %p4140_p0, %p4139_p13 }
  0x21   : > { %p4142_p2 = pneg %p4141_p1 }
  0x23   : > { %p4147_p4 = pnand %p4145_p3, %p4142_p2 }
  0x25   : > { %4150 = shalt.err (!%p4147_p4)
}
  0x26   : > { %s4151_s24 = scalar_lea.vmem %s473_s23, 20480  ;;  %p4159_p9 = scmp.lt.s32.totalorder %s473_s23, %s473_s23 }
  0x27   : > { %p4152_p7 = scmp.ne.s32.totalorder %s473_s23, %s4151_s24  ;;  %p4160_p6 = scmp.lt.s32.totalorder %s4151_s24, %s4151_s24 }
  0x29   : > { %p4154_p8 = pnand %p4152_p7, %p4140_p0  ;;  %p4161_p5 = por %p4160_p6, %p4159_p9 }
  0x2b   : > { %p4155_p11 = pneg %p4154_p8 }
  0x2d   : > { %p4162_p10 = pnand %p4161_p5, %p4155_p11 }
  0x2f   : > { %4165 = shalt.err (!%p4162_p10)
}
  0x30   : > { %s4235_s26 = smov 512   ;;  %s4236_s0 = smov 32  }
  0x31   : > { %4083 = dma.hbm_to_vmem [thread:$0]  (!%p4392_p12), %s5798_s13, 20480, %s473_s23, [#allocation3], %s4235_s26, %s4235_s26, %s4236_s0  }
  0x32   : > { %p5826_p13 = scmp.ne.s32.totalorder %s5824_s21, 0 }
  0x33   : > { %p5827_p1 = scmp.eq.s32.totalorder (!%p5826_p13), %s4356_s28, 0 }
  0x34   : > { %505 = sbr.rel (%p5826_p13) target bundleno = 2104 (0x838), region = 88 }
  0x3b   : > { %4211 = dma.done.wait (%p5827_p1), [#allocation3], 20480   ;;  %p5828_p0 = pmov %p5827_p1 }
  0x3c   : > { %p557_p5 = scmp.lt.s32.totalorder %s4356_s28, 1  ;;  %s5829_s22 = sld [smem:[#allocation14_spill]]  ;;  %vm960_vm0 = vcmask 1043456   ;;  %vm4239_vm1 = vmmov 1   ;;  %vm805_vm3 = vcmask 31744   ;;  %vm836_vm4 = vcmask 64512  }
  0x3d   : > { %4213 = vsyncadd (%p5828_p0), [#allocation3], 4294946816  ;;  %s4237_s21 = smov 8   ;;  %s4238_s23 = smov 4   ;;  %vm869_vm5 = vcmask 97280   ;;  %vm1480_vm6 = vcmask 261120  }
  0x3e   : > { %s558_s24 = scalar_select %p557_p5, %s4356_s28, 1  ;;  %vm3753_vm2 = vmpackc.low %vm960_vm0, %vm4239_vm1  ;;  %vm1509_vm7 = vcmask 523264   ;;  %vm1550_vm8 = vcmask 785408  }
  0x3f   : > { %s5830_s30 = sld [smem:[#allocation15_spill]]  ;;  %s5831_s2 = sld [smem:[#allocation16_spill]] }
  0x40   : > { %s3428_s19 = sshll.u32 %s558_s24, 8  ;;  %s4241_s26 = smov 64  }
  0x41   : > { %s554_s20 = sand.u32 1, %s4224_s25   ;;  %p5832_p9 = scmp.ne.s32.totalorder %s5821_s1, 0 }
  0x42   : > { %s4423_s27 = scalar_lea.vmem %s5829_s22, %s3428_s19 }
  0x43   : > { %v4426_v0 = vld [vmem:[%s4423_s27 + $0x10] sm:$0xff]  ;;  %v4429_v1 = vld [vmem:[%s4423_s27 + $0x8] sm:$0xff]  ;;  %v4436_v2 = vld [vmem:[%s4423_s27 + $0x18] sm:$0xff] }
  0x44   : > { %715 = vrot.lane.b32.xlu1 %v4426_v0, %s4237_s21  ;;  %624 = vrot.lane.b32.xlu0 %v4429_v1, %s4238_s23  ;;  %v4443_v3 = vld [vmem:[%s4423_s27 + $0x20] sm:$0xff]  ;;  %v4450_v4 = vld [vmem:[%s4423_s27 + $0x28] sm:$0xff] }
  0x45   : > { %v867_v5 = vld [vmem:[%s5830_s30] sm:$0xff]  ;;  %v868_v6 = vld [vmem:[%s5830_s30 + $0x8] sm:$0xf]  ;;  %v4463_v8 = vld [vmem:[%s4423_s27 + $0x30] sm:$0xff] }
  0x46   : > { %v3752_v7 = vpack.c.bf16 %v868_v6, %v867_v5  ;;  %v4470_v9 = vld [vmem:[%s4423_s27 + $0x38] sm:$0xff]  ;;  %v4477_v10 = vld [vmem:[%s4423_s27 + $0x40] sm:$0xff]  ;;  %v4484_v11 = vld [vmem:[%s4423_s27 + $0x48] sm:$0xff] }
  0x47   : > { %v4491_v12 = vld [vmem:[%s4423_s27 + $0x50] sm:$0xff]  ;;  %v4498_v13 = vld [vmem:[%s4423_s27 + $0x58] sm:$0xff]  ;;  %v4505_v14 = vld [vmem:[%s4423_s27 + $0x60] sm:$0xff] }
  0x48   : > { %717 = vrot.lane.b32.xlu1 %v4436_v2, %s4237_s21  ;;  %626 = vrot.lane.b32.xlu0 %v4426_v0, %s4238_s23  ;;  %v4512_v15 = vld [vmem:[%s4423_s27 + $0x68] sm:$0xff]  ;;  %v4519_v16 = vld [vmem:[%s4423_s27 + $0x70] sm:$0xff] }
  0x49   : > { %3754 = vmatprep.subr.msk.bf16.mxu0 %vm3753_vm2, %v3752_v7  ;;  %v4526_v17 = vld [vmem:[%s4423_s27 + $0x78] sm:$0xff]  ;;  %v4533_v18 = vld [vmem:[%s4423_s27 + $0x80] sm:$0xff]  ;;  %v4540_v19 = vld [vmem:[%s4423_s27 + $0x88] sm:$0xff] }
  0x4a   : > { %3757 = vmatpush3.bf16.msk.msra.mxu0 %vm3753_vm2, %v3752_v7  ;;  %v4547_v20 = vld [vmem:[%s4423_s27 + $0x90] sm:$0xff]  ;;  %v4554_v21 = vld [vmem:[%s4423_s27 + $0x98] sm:$0xff]  ;;  %v4561_v22 = vld [vmem:[%s4423_s27 + $0xa0] sm:$0xff] }
  0x4b   : > { %v4568_v23 = vld [vmem:[%s4423_s27 + $0xa8] sm:$0xff]  ;;  %v4575_v24 = vld [vmem:[%s4423_s27 + $0xb0] sm:$0xff]  ;;  %v4582_v25 = vld [vmem:[%s4423_s27 + $0xb8] sm:$0xff] }
  0x4c   : > { %630 = vrot.lane.b32.xlu1 %v4443_v3, %s4238_s23  ;;  %628 = vrot.lane.b32.xlu0 %v4436_v2, %s4238_s23  ;;  %v4589_v26 = vld [vmem:[%s4423_s27 + $0xc0] sm:$0xff]  ;;  %v4596_v27 = vld [vmem:[%s4423_s27 + $0xc8] sm:$0xff] }
  0x4d   : > { %v4603_v28 = vld [vmem:[%s4423_s27 + $0xd0] sm:$0xff]  ;;  %v4610_v29 = vld [vmem:[%s4423_s27 + $0xd8] sm:$0xff]  ;;  %v4617_v30 = vld [vmem:[%s4423_s27 + $0xe0] sm:$0xff] }
  0x4e   : > { %v4624_v31 = vld [vmem:[%s4423_s27 + $0xe8] sm:$0xff]  ;;  %v592_v32 = vld [vmem:[%s4423_s27 + $0xf0] sm:$0xff]  ;;  %v562_v33 = vld [vmem:[%s4423_s27] sm:$0xff] }
  0x4f   : > { %v593_v34 = vld [vmem:[%s4423_s27 + $0xf8] sm:$0xff]  ;;  %s3239_s27 = scalar_lea.sflag [#allocation4], %s554_s20 }
  0x50   : > { %721 = vrot.lane.b32.xlu1 %v4450_v4, %s4237_s21  ;;  %719 = vrot.lane.b32.xlu0 %v4443_v3, %s4237_s21 }
  0x54   : > { %634 = vrot.lane.b32.xlu1 %v4463_v8, %s4238_s23  ;;  %632 = vrot.lane.b32.xlu0 %v4450_v4, %s4238_s23 }
  0x58   : > { %725 = vrot.lane.b32.xlu1 %v4470_v9, %s4237_s21  ;;  %723 = vrot.lane.b32.xlu0 %v4463_v8, %s4237_s21 }
  0x5c   : > { %638 = vrot.lane.b32.xlu1 %v4477_v10, %s4238_s23  ;;  %636 = vrot.lane.b32.xlu0 %v4470_v9, %s4238_s23 }
  0x60   : > { %729 = vrot.lane.b32.xlu1 %v4484_v11, %s4237_s21  ;;  %727 = vrot.lane.b32.xlu0 %v4477_v10, %s4237_s21 }
  0x64   : > { %642 = vrot.lane.b32.xlu1 %v4491_v12, %s4238_s23  ;;  %640 = vrot.lane.b32.xlu0 %v4484_v11, %s4238_s23 }
  0x68   : > { %733 = vrot.lane.b32.xlu1 %v4498_v13, %s4237_s21  ;;  %731 = vrot.lane.b32.xlu0 %v4491_v12, %s4237_s21 }
  0x6c   : > { %646 = vrot.lane.b32.xlu1 %v4505_v14, %s4238_s23  ;;  %644 = vrot.lane.b32.xlu0 %v4498_v13, %s4238_s23 }
  0x70   : > { %737 = vrot.lane.b32.xlu1 %v4512_v15, %s4237_s21  ;;  %735 = vrot.lane.b32.xlu0 %v4505_v14, %s4237_s21 }
  0x74   : > { %650 = vrot.lane.b32.xlu1 %v4519_v16, %s4238_s23  ;;  %648 = vrot.lane.b32.xlu0 %v4512_v15, %s4238_s23 }
  0x78   : > { %741 = vrot.lane.b32.xlu1 %v4526_v17, %s4237_s21  ;;  %739 = vrot.lane.b32.xlu0 %v4519_v16, %s4237_s21 }
  0x7c   : > { %654 = vrot.lane.b32.xlu1 %v4533_v18, %s4238_s23  ;;  %652 = vrot.lane.b32.xlu0 %v4526_v17, %s4238_s23 }
  0x80   : > { %745 = vrot.lane.b32.xlu1 %v4540_v19, %s4237_s21  ;;  %743 = vrot.lane.b32.xlu0 %v4533_v18, %s4237_s21 }
  0x84   : > { %658 = vrot.lane.b32.xlu1 %v4547_v20, %s4238_s23  ;;  %656 = vrot.lane.b32.xlu0 %v4540_v19, %s4238_s23 }
  0x88   : > { %749 = vrot.lane.b32.xlu1 %v4554_v21, %s4237_s21  ;;  %747 = vrot.lane.b32.xlu0 %v4547_v20, %s4237_s21 }
  0x8c   : > { %662 = vrot.lane.b32.xlu1 %v4561_v22, %s4238_s23  ;;  %660 = vrot.lane.b32.xlu0 %v4554_v21, %s4238_s23 }
  0x90   : > { %753 = vrot.lane.b32.xlu1 %v4568_v23, %s4237_s21  ;;  %751 = vrot.lane.b32.xlu0 %v4561_v22, %s4237_s21 }
  0x94   : > { %666 = vrot.lane.b32.xlu1 %v4575_v24, %s4238_s23  ;;  %664 = vrot.lane.b32.xlu0 %v4568_v23, %s4238_s23 }
  0x98   : > { %757 = vrot.lane.b32.xlu1 %v4582_v25, %s4237_s21  ;;  %755 = vrot.lane.b32.xlu0 %v4575_v24, %s4237_s21 }
  0x9c   : > { %670 = vrot.lane.b32.xlu1 %v4589_v26, %s4238_s23  ;;  %668 = vrot.lane.b32.xlu0 %v4582_v25, %s4238_s23 }
  0xa0   : > { %761 = vrot.lane.b32.xlu1 %v4596_v27, %s4237_s21  ;;  %759 = vrot.lane.b32.xlu0 %v4589_v26, %s4237_s21 }
  0xa4   : > { %674 = vrot.lane.b32.xlu1 %v4603_v28, %s4238_s23  ;;  %672 = vrot.lane.b32.xlu0 %v4596_v27, %s4238_s23 }
  0xa8   : > { %765 = vrot.lane.b32.xlu1 %v4610_v29, %s4237_s21  ;;  %763 = vrot.lane.b32.xlu0 %v4603_v28, %s4237_s21 }
  0xac   : > { %676 = vrot.lane.b32.xlu0 %v4610_v29, %s4238_s23  ;;  %678 = vrot.lane.b32.xlu1 %v4617_v30, %s4238_s23 }
  0xb0   : > { %767 = vrot.lane.b32.xlu0 %v4617_v30, %s4237_s21  ;;  %769 = vrot.lane.b32.xlu1 %v4624_v31, %s4237_s21 }
  0xb4   : > { %680 = vrot.lane.b32.xlu0 %v4624_v31, %s4238_s23  ;;  %682 = vrot.lane.b32.xlu1 %v592_v32, %s4238_s23  ;;  %s4240_s23 = smov 32  }
  0xb6   : > { %v716_v35 = vpop.permute.xlu1 %715  ;;  %v625_v36 = vpop.permute.xlu0 %624 }
  0xb7   : > { %v806_v37 = vsel %vm805_vm3, %v562_v33, %v625_v36 }
  0xb8   : > { %771 = vrot.lane.b32.xlu0 %v592_v32, %s4237_s21  ;;  %773 = vrot.lane.b32.xlu1 %v593_v34, %s4237_s21  ;;  %v837_v38 = vsel %vm836_vm4, %v806_v37, %v716_v35  ;;  %s3425_s21 = sshll.u32 %s4356_s28, 7  ;;  %s4244_s28 = smov [#allocation5]  }
  0xb9   : > { %3599 = vmatprep.mubr.msk.f32.mxu0 %vm869_vm5, %v837_v38  ;;  %s5743_s24 = scalar_lea.hbm %s5802_s17, %s3425_s21 }
  0xba   : > { %v718_v39 = vpop.permute.xlu1 %717  ;;  %v627_v40 = vpop.permute.xlu0 %626 }
  0xbb   : > { %v807_v41 = vsel %vm805_vm3, %v4429_v1, %v627_v40 }
  0xbc   : > { %v838_v42 = vsel %vm836_vm4, %v807_v41, %v718_v39 }
  0xbd   : > { %3600 = vmatmul.mubr.msk.f32.vlgmr.msra.gmra.mrb[0].mxu0 %vm869_vm5, %v838_v42 }
  0xbe   : > { %v631_v43 = vpop.permute.xlu1 %630  ;;  %v629_v44 = vpop.permute.xlu0 %628 }
  0xbf   : > { %v809_v45 = vsel %vm805_vm3, %v4436_v2, %v631_v43  ;;  %v808_v46 = vsel %vm805_vm3, %v4426_v0, %v629_v44 }
  0xc2   : > { %v722_v47 = vpop.permute.xlu1 %721  ;;  %v720_v48 = vpop.permute.xlu0 %719 }
  0xc3   : > { %v840_v49 = vsel %vm836_vm4, %v809_v45, %v722_v47  ;;  %v839_v50 = vsel %vm836_vm4, %v808_v46, %v720_v48 }
  0xc4   : > { %3602 = vmatprep.mubr.msk.f32.mxu0 %vm869_vm5, %v839_v50 }
  0xc5   : > { %3603 = vmatmul.mubr.msk.f32.gmra.mrb[2].mxu0 %vm869_vm5, %v840_v49 }
  0xc6   : > { %v635_v51 = vpop.permute.xlu1 %634  ;;  %v633_v52 = vpop.permute.xlu0 %632 }
  0xc7   : > { %v811_v53 = vsel %vm805_vm3, %v4450_v4, %v635_v51  ;;  %v810_v54 = vsel %vm805_vm3, %v4443_v3, %v633_v52 }
  0xca   : > { %v726_v55 = vpop.permute.xlu1 %725  ;;  %v724_v56 = vpop.permute.xlu0 %723 }
  0xcb   : > { %v842_v57 = vsel %vm836_vm4, %v811_v53, %v726_v55  ;;  %v841_v58 = vsel %vm836_vm4, %v810_v54, %v724_v56 }
  0xcc   : > { %3605 = vmatprep.mubr.msk.f32.mxu0 %vm869_vm5, %v841_v58 }
  0xcd   : > { %3606 = vmatmul.mubr.msk.f32.gmra.mrb[4].mxu0 %vm869_vm5, %v842_v57 }
  0xce   : > { %v639_v59 = vpop.permute.xlu1 %638  ;;  %v637_v60 = vpop.permute.xlu0 %636 }
  0xcf   : > { %v813_v61 = vsel %vm805_vm3, %v4470_v9, %v639_v59  ;;  %v812_v62 = vsel %vm805_vm3, %v4463_v8, %v637_v60 }
  0xd2   : > { %v730_v63 = vpop.permute.xlu1 %729  ;;  %v728_v0 = vpop.permute.xlu0 %727 }
  0xd3   : > { %v844_v1 = vsel %vm836_vm4, %v813_v61, %v730_v63  ;;  %v843_v2 = vsel %vm836_vm4, %v812_v62, %v728_v0 }
  0xd4   : > { %3608 = vmatprep.mubr.msk.f32.mxu0 %vm869_vm5, %v843_v2 }
  0xd5   : > { %3609 = vmatmul.mubr.msk.f32.gmra.mrb[6].mxu0 %vm869_vm5, %v844_v1 }
  0xd6   : > { %v643_v3 = vpop.permute.xlu1 %642  ;;  %v641_v4 = vpop.permute.xlu0 %640 }
  0xd7   : > { %v815_v5 = vsel %vm805_vm3, %v4484_v11, %v643_v3  ;;  %v814_v6 = vsel %vm805_vm3, %v4477_v10, %v641_v4 }
  0xda   : > { %v734_v7 = vpop.permute.xlu1 %733  ;;  %v732_v8 = vpop.permute.xlu0 %731 }
  0xdb   : > { %v846_v9 = vsel %vm836_vm4, %v815_v5, %v734_v7  ;;  %v845_v32 = vsel %vm836_vm4, %v814_v6, %v732_v8 }
  0xdc   : > { %3611 = vmatprep.mubr.msk.f32.mxu0 %vm869_vm5, %v845_v32 }
  0xdd   : > { %3612 = vmatmul.mubr.msk.f32.gmra.mrb[8].mxu0 %vm869_vm5, %v846_v9 }
  0xde   : > { %v647_v33 = vpop.permute.xlu1 %646  ;;  %v645_v34 = vpop.permute.xlu0 %644 }
  0xdf   : > { %v817_v35 = vsel %vm805_vm3, %v4498_v13, %v647_v33  ;;  %v816_v11 = vsel %vm805_vm3, %v4491_v12, %v645_v34 }
  0xe2   : > { %v738_v36 = vpop.permute.xlu1 %737  ;;  %v736_v10 = vpop.permute.xlu0 %735 }
  0xe3   : > { %v848_v37 = vsel %vm836_vm4, %v817_v35, %v738_v36  ;;  %v847_v38 = vsel %vm836_vm4, %v816_v11, %v736_v10 }
  0xe4   : > { %3614 = vmatprep.mubr.msk.f32.mxu0 %vm869_vm5, %v847_v38 }
  0xe5   : > { %3615 = vmatmul.mubr.msk.f32.gmra.mrb[10].mxu0 %vm869_vm5, %v848_v37 }
  0xe6   : > { %v651_v39 = vpop.permute.xlu1 %650  ;;  %v649_v40 = vpop.permute.xlu0 %648 }
  0xe7   : > { %v819_v41 = vsel %vm805_vm3, %v4512_v15, %v651_v39  ;;  %v818_v13 = vsel %vm805_vm3, %v4505_v14, %v649_v40 }
  0xea   : > { %v742_v42 = vpop.permute.xlu1 %741  ;;  %v740_v12 = vpop.permute.xlu0 %739 }
  0xeb   : > { %v850_v43 = vsel %vm836_vm4, %v819_v41, %v742_v42  ;;  %v849_v44 = vsel %vm836_vm4, %v818_v13, %v740_v12 }
  0xec   : > { %3617 = vmatprep.mubr.msk.f32.mxu0 %vm869_vm5, %v849_v44 }
  0xed   : > { %3618 = vmatmul.mubr.msk.f32.gmra.mrb[12].mxu0 %vm869_vm5, %v850_v43 }
  0xee   : > { %v655_v45 = vpop.permute.xlu1 %654  ;;  %v653_v46 = vpop.permute.xlu0 %652 }
  0xef   : > { %v821_v47 = vsel %vm805_vm3, %v4526_v17, %v655_v45  ;;  %v820_v15 = vsel %vm805_vm3, %v4519_v16, %v653_v46 }
  0xf2   : > { %v746_v48 = vpop.permute.xlu1 %745  ;;  %v744_v14 = vpop.permute.xlu0 %743 }
  0xf3   : > { %v852_v49 = vsel %vm836_vm4, %v821_v47, %v746_v48  ;;  %v851_v50 = vsel %vm836_vm4, %v820_v15, %v744_v14  ;;  %v1538_v47 = vld [vmem:[%s5789_s4] sm:$0xff]  ;;  %v1541_v48 = vld [vmem:[%s5789_s4 + $0x18] sm:$0xff] }
  0xf4   : > { %3620 = vmatprep.mubr.msk.f32.mxu0 %vm869_vm5, %v851_v50  ;;  %v1543_v50 = vld [vmem:[%s5789_s4 + $0x28] sm:$0xff] }
  0xf5   : > { %3621 = vmatmul.mubr.msk.f32.gmra.mrb[14].mxu0 %vm869_vm5, %v852_v49  ;;  %v1542_v49 = vld [vmem:[%s5789_s4 + $0x20] sm:$0xff] }
  0xf6   : > { %v659_v51 = vpop.permute.xlu1 %658  ;;  %v657_v52 = vpop.permute.xlu0 %656 }
  0xf7   : > { %v823_v53 = vsel %vm805_vm3, %v4540_v19, %v659_v51  ;;  %v822_v17 = vsel %vm805_vm3, %v4533_v18, %v657_v52  ;;  %v3766_v51 = vpack.c.bf16 %v1543_v50, %v1542_v49  ;;  %v1544_v52 = vld [vmem:[%s5789_s4 + $0x30] sm:$0xff] }
  0xfa   : > { %v750_v54 = vpop.permute.xlu1 %749  ;;  %v748_v16 = vpop.permute.xlu0 %747 }
  0xfb   : > { %v854_v55 = vsel %vm836_vm4, %v823_v53, %v750_v54  ;;  %v853_v56 = vsel %vm836_vm4, %v822_v17, %v748_v16  ;;  %v1545_v53 = vld [vmem:[%s5789_s4 + $0x38] sm:$0xff]  ;;  %v1546_v54 = vld [vmem:[%s5789_s4 + $0x40] sm:$0xff]  ;;  %v1547_v16 = vld [vmem:[%s5789_s4 + $0x48] sm:$0xff] }
  0xfc   : > { %3623 = vmatprep.mubr.msk.f32.mxu0 %vm869_vm5, %v853_v56  ;;  %v3770_v17 = vpack.c.bf16 %v1545_v53, %v1544_v52  ;;  %v4790_v56 = vld [vmem:[%s5831_s2] ss:$0 sm:$0xff] }
  0xfd   : > { %3624 = vmatmul.mubr.msk.f32.gmra.mrb[16].mxu0 %vm869_vm5, %v854_v55  ;;  %v3774_v55 = vpack.c.bf16 %v1547_v16, %v1546_v54 }
  0xfe   : > { %v663_v57 = vpop.permute.xlu1 %662  ;;  %v661_v58 = vpop.permute.xlu0 %660 }
  0xff   : > { %v825_v59 = vsel %vm805_vm3, %v4554_v21, %v663_v57  ;;  %v824_v19 = vsel %vm805_vm3, %v4547_v20, %v661_v58  ;;  %v4795_v58 = vld [vmem:[%s5788_s3] ss:$0 sm:$0xff] }
 0x102   : > { %v754_v60 = vpop.permute.xlu1 %753  ;;  %v752_v18 = vpop.permute.xlu0 %751 }
 0x103   : > { %v856_v61 = vsel %vm836_vm4, %v825_v59, %v754_v60  ;;  %v855_v62 = vsel %vm836_vm4, %v824_v19, %v752_v18  ;;  %v1548_v60 = vld [vmem:[%s5789_s4 + $0x50] sm:$0xff]  ;;  %v1549_v18 = vld [vmem:[%s5789_s4 + $0x58] sm:$0xff] }
 0x104   : > { %3626 = vmatprep.mubr.msk.f32.mxu0 %vm869_vm5, %v855_v62 }
 0x105   : > { %3627 = vmatmul.mubr.msk.f32.gmra.mrb[18].mxu0 %vm869_vm5, %v856_v61  ;;  %v3778_v61 = vpack.c.bf16 %v1549_v18, %v1548_v60 }
 0x106   : > { %v667_v63 = vpop.permute.xlu1 %666  ;;  %v665_v0 = vpop.permute.xlu0 %664 }
 0x107   : > { %v827_v1 = vsel %vm805_vm3, %v4568_v23, %v667_v63  ;;  %v826_v21 = vsel %vm805_vm3, %v4561_v22, %v665_v0 }
 0x10a   : > { %v758_v2 = vpop.permute.xlu1 %757  ;;  %v756_v20 = vpop.permute.xlu0 %755 }
 0x10b   : > { %v858_v3 = vsel %vm836_vm4, %v827_v1, %v758_v2  ;;  %v857_v4 = vsel %vm836_vm4, %v826_v21, %v756_v20 }
 0x10c   : > { %3629 = vmatprep.mubr.msk.f32.mxu0 %vm869_vm5, %v857_v4 }
 0x10d   : > { %3630 = vmatmul.mubr.msk.f32.gmra.mrb[20].mxu0 %vm869_vm5, %v858_v3 }
 0x10e   : > { %v671_v5 = vpop.permute.xlu1 %670  ;;  %v669_v6 = vpop.permute.xlu0 %668 }
 0x10f   : > { %v829_v7 = vsel %vm805_vm3, %v4582_v25, %v671_v5  ;;  %v828_v23 = vsel %vm805_vm3, %v4575_v24, %v669_v6 }
 0x112   : > { %v762_v8 = vpop.permute.xlu1 %761  ;;  %v760_v22 = vpop.permute.xlu0 %759 }
 0x113   : > { %v860_v9 = vsel %vm836_vm4, %v829_v7, %v762_v8  ;;  %v859_v32 = vsel %vm836_vm4, %v828_v23, %v760_v22 }
 0x114   : > { %3632 = vmatprep.mubr.msk.f32.mxu0 %vm869_vm5, %v859_v32 }
 0x115   : > { %3633 = vmatmul.mubr.msk.f32.gmra.mrb[22].mxu0 %vm869_vm5, %v860_v9 }
 0x116   : > { %v675_v33 = vpop.permute.xlu1 %674  ;;  %v673_v34 = vpop.permute.xlu0 %672 }
 0x117   : > { %v831_v35 = vsel %vm805_vm3, %v4596_v27, %v675_v33  ;;  %v830_v25 = vsel %vm805_vm3, %v4589_v26, %v673_v34 }
 0x11a   : > { %v766_v11 = vpop.permute.xlu1 %765  ;;  %v764_v24 = vpop.permute.xlu0 %763 }
 0x11b   : > { %v862_v36 = vsel %vm836_vm4, %v831_v35, %v766_v11  ;;  %v861_v10 = vsel %vm836_vm4, %v830_v25, %v764_v24 }
 0x11c   : > { %3635 = vmatprep.mubr.msk.f32.mxu0 %vm869_vm5, %v861_v10 }
 0x11d   : > { %3636 = vmatmul.mubr.msk.f32.gmra.mrb[24].mxu0 %vm869_vm5, %v862_v36 }
 0x11e   : > { %v677_v37 = vpop.permute.xlu0 %676  ;;  %v679_v38 = vpop.permute.xlu1 %678 }
 0x11f   : > { %v832_v39 = vsel %vm805_vm3, %v4603_v28, %v677_v37  ;;  %v833_v27 = vsel %vm805_vm3, %v4610_v29, %v679_v38 }
 0x122   : > { %v768_v40 = vpop.permute.xlu0 %767  ;;  %v770_v26 = vpop.permute.xlu1 %769 }
 0x123   : > { %v863_v41 = vsel %vm836_vm4, %v832_v39, %v768_v40  ;;  %v864_v13 = vsel %vm836_vm4, %v833_v27, %v770_v26 }
 0x124   : > { %3638 = vmatprep.mubr.msk.f32.mxu0 %vm869_vm5, %v863_v41 }
 0x125   : > { %3639 = vmatmul.mubr.msk.f32.gmra.mrb[26].mxu0 %vm869_vm5, %v864_v13 }
 0x126   : > { %v681_v42 = vpop.permute.xlu0 %680  ;;  %v683_v12 = vpop.permute.xlu1 %682 }
 0x127   : > { %v834_v43 = vsel %vm805_vm3, %v4617_v30, %v681_v42  ;;  %v835_v28 = vsel %vm805_vm3, %v4624_v31, %v683_v12  ;;  %v1539_v30 = vld [vmem:[%s5789_s4 + $0x8] sm:$0xff]  ;;  %v1540_v31 = vld [vmem:[%s5789_s4 + $0x10] sm:$0xff] }
 0x128   : > { %v3758_v15 = vpack.c.bf16 %v1539_v30, %v1538_v47  ;;  %v3762_v14 = vpack.c.bf16 %v1541_v48, %v1540_v31 }
 0x12a   : > { %v772_v44 = vpop.permute.xlu0 %771  ;;  %v774_v29 = vpop.permute.xlu1 %773  ;;  %3759 = vmatprep.subr.bf16.mxu1 %v3758_v15 }
 0x12b   : > { %v865_v45 = vsel %vm836_vm4, %v834_v43, %v772_v44  ;;  %v866_v46 = vsel %vm836_vm4, %v835_v28, %v774_v29  ;;  %3761 = vmatpush3.bf16.msra.mxu1 %v3758_v15 }
 0x12c   : > { %3641 = vmatprep.mubr.msk.f32.mxu0 %vm869_vm5, %v865_v45  ;;  %3763 = vmatprep.subr.bf16.mxu1 %v3762_v14 }
 0x12d   : > { %3642 = vmatmul.mubr.msk.f32.gmra.mrb[28].mxu0 %vm869_vm5, %v866_v46 }
 0x12f   : > { %3765 = vmatpush3.bf16.msra.mxu1 %v3762_v14 }
 0x130   : > { %3767 = vmatprep.subr.bf16.mxu1 %v3766_v51 }
 0x133   : > { %3769 = vmatpush3.bf16.msra.mxu1 %v3766_v51 }
 0x134   : > { %3771 = vmatprep.subr.bf16.mxu1 %v3770_v17 }
 0x137   : > { %3773 = vmatpush3.bf16.msra.mxu1 %v3770_v17 }
 0x138   : > { %3775 = vmatprep.subr.bf16.mxu1 %v3774_v55 }
 0x13b   : > { %3777 = vmatpush3.bf16.msra.mxu1 %v3774_v55 }
 0x13c   : > { %3779 = vmatprep.subr.bf16.mxu1 %v3778_v61 }
 0x13f   : > { %3781 = vmatpush3.bf16.msra.mxu1 %v3778_v61 }
 0x190   : > { %v3601_v57 = vpop.f32.mrb[0].mxu0 }
 0x191   : > { %v1187_v59 = vmul.f32 %v3601_v57, %v4790_v56  ;;  %v4798_v19 = vpop.f32.mrb[1].mxu0 }
 0x193   : > { %v4807_v62 = vadd.f32 %v4795_v58, %v1187_v59 }
 0x195   : > { %v1254_v63 = vmax.f32 %v4807_v62, 0.0 }
 0x197   : > { %1311 = vrot.lane.b32.xlu0 %v1254_v63, %s4240_s23 }
 0x198   : > { %v3604_v0 = vpop.f32.mrb[2].mxu0 }
 0x199   : > { %v1189_v1 = vmul.f32 %v3604_v0, %v4790_v56  ;;  %v1040_v21 = vpop.f32.mrb[3].mxu0 }
 0x19a   : > { %v1188_v2 = vmul.f32 %v4790_v56, %v1040_v21 }
 0x19b   : > { %v1226_v20 = vadd.f32 %v4795_v58, %v1189_v1 }
 0x19c   : > { %v1225_v4 = vadd.f32 %v4795_v58, %v1188_v2 }
 0x19d   : > { %v4816_v3 = vmax.f32 %v1226_v20, 0.0 }
 0x19e   : > { %v4823_v6 = vmax.f32 %v1225_v4, 0.0 }
 0x19f   : > { %1315 = vrot.lane.b32.xlu0 %v4816_v3, %s4240_s23  ;;  %1398 = vrot.lane.b32.xlu1 %v4816_v3, %s4241_s26 }
 0x1a0   : > { %v3607_v5 = vpop.f32.mrb[4].mxu0 }
 0x1a1   : > { %v1191_v7 = vmul.f32 %v3607_v5, %v4790_v56  ;;  %v1050_v23 = vpop.f32.mrb[5].mxu0 }
 0x1a2   : > { %v1190_v8 = vmul.f32 %v4790_v56, %v1050_v23 }
 0x1a3   : > { %v1228_v22 = vadd.f32 %v4795_v58, %v1191_v7  ;;  %1396 = vrot.lane.b32.xlu0 %v4823_v6, %s4241_s26  ;;  %1313 = vrot.lane.b32.xlu1 %v4823_v6, %s4240_s23 }
 0x1a4   : > { %v1227_v32 = vadd.f32 %v4795_v58, %v1190_v8 }
 0x1a5   : > { %v4832_v9 = vmax.f32 %v1228_v22, 0.0 }
 0x1a6   : > { %v4839_v34 = vmax.f32 %v1227_v32, 0.0 }
 0x1a7   : > { %1319 = vrot.lane.b32.xlu0 %v4832_v9, %s4240_s23  ;;  %1402 = vrot.lane.b32.xlu1 %v4832_v9, %s4241_s26 }
 0x1a8   : > { %v3610_v33 = vpop.f32.mrb[6].mxu0 }
 0x1a9   : > { %v1193_v35 = vmul.f32 %v3610_v33, %v4790_v56  ;;  %v1060_v25 = vpop.f32.mrb[7].mxu0 }
 0x1aa   : > { %v1192_v11 = vmul.f32 %v4790_v56, %v1060_v25 }
 0x1ab   : > { %v1230_v24 = vadd.f32 %v4795_v58, %v1193_v35  ;;  %1400 = vrot.lane.b32.xlu0 %v4839_v34, %s4241_s26  ;;  %1317 = vrot.lane.b32.xlu1 %v4839_v34, %s4240_s23 }
 0x1ac   : > { %v1229_v10 = vadd.f32 %v4795_v58, %v1192_v11 }
 0x1ad   : > { %v4848_v36 = vmax.f32 %v1230_v24, 0.0 }
 0x1ae   : > { %v4855_v38 = vmax.f32 %v1229_v10, 0.0 }
 0x1af   : > { %1323 = vrot.lane.b32.xlu0 %v4848_v36, %s4240_s23  ;;  %1406 = vrot.lane.b32.xlu1 %v4848_v36, %s4241_s26 }
 0x1b0   : > { %v3613_v37 = vpop.f32.mrb[8].mxu0 }
 0x1b1   : > { %v1195_v39 = vmul.f32 %v3613_v37, %v4790_v56  ;;  %v1070_v27 = vpop.f32.mrb[9].mxu0 }
 0x1b2   : > { %v1194_v40 = vmul.f32 %v4790_v56, %v1070_v27 }
 0x1b3   : > { %v1232_v26 = vadd.f32 %v4795_v58, %v1195_v39  ;;  %1404 = vrot.lane.b32.xlu0 %v4855_v38, %s4241_s26  ;;  %1321 = vrot.lane.b32.xlu1 %v4855_v38, %s4240_s23 }
 0x1b4   : > { %v1231_v13 = vadd.f32 %v4795_v58, %v1194_v40 }
 0x1b5   : > { %v4864_v41 = vmax.f32 %v1232_v26, 0.0 }
 0x1b6   : > { %v4871_v12 = vmax.f32 %v1231_v13, 0.0 }
 0x1b7   : > { %1327 = vrot.lane.b32.xlu0 %v4864_v41, %s4240_s23  ;;  %1410 = vrot.lane.b32.xlu1 %v4864_v41, %s4241_s26 }
 0x1b8   : > { %v3616_v42 = vpop.f32.mrb[10].mxu0 }
 0x1b9   : > { %v1197_v43 = vmul.f32 %v3616_v42, %v4790_v56  ;;  %v1080_v28 = vpop.f32.mrb[11].mxu0 }
 0x1ba   : > { %v1196_v44 = vmul.f32 %v4790_v56, %v1080_v28 }
 0x1bb   : > { %v1234_v29 = vadd.f32 %v4795_v58, %v1197_v43  ;;  %1408 = vrot.lane.b32.xlu0 %v4871_v12, %s4241_s26  ;;  %1325 = vrot.lane.b32.xlu1 %v4871_v12, %s4240_s23 }
 0x1bc   : > { %v1233_v46 = vadd.f32 %v4795_v58, %v1196_v44 }
 0x1bd   : > { %v4880_v45 = vmax.f32 %v1234_v29, 0.0 }
 0x1be   : > { %v4887_v30 = vmax.f32 %v1233_v46, 0.0 }
 0x1bf   : > { %1331 = vrot.lane.b32.xlu0 %v4880_v45, %s4240_s23  ;;  %1414 = vrot.lane.b32.xlu1 %v4880_v45, %s4241_s26 }
 0x1c0   : > { %v3619_v47 = vpop.f32.mrb[12].mxu0 }
 0x1c1   : > { %v1199_v15 = vmul.f32 %v3619_v47, %v4790_v56  ;;  %v1090_v31 = vpop.f32.mrb[13].mxu0 }
 0x1c2   : > { %v1198_v48 = vmul.f32 %v4790_v56, %v1090_v31 }
 0x1c3   : > { %v1236_v14 = vadd.f32 %v4795_v58, %v1199_v15  ;;  %1412 = vrot.lane.b32.xlu0 %v4887_v30, %s4241_s26  ;;  %1329 = vrot.lane.b32.xlu1 %v4887_v30, %s4240_s23 }
 0x1c4   : > { %v1235_v50 = vadd.f32 %v4795_v58, %v1198_v48 }
 0x1c5   : > { %v4896_v49 = vmax.f32 %v1236_v14, 0.0 }
 0x1c6   : > { %v4903_v52 = vmax.f32 %v1235_v50, 0.0 }
 0x1c7   : > { %1335 = vrot.lane.b32.xlu0 %v4896_v49, %s4240_s23  ;;  %1418 = vrot.lane.b32.xlu1 %v4896_v49, %s4241_s26 }
 0x1c8   : > { %v3622_v51 = vpop.f32.mrb[14].mxu0 }
 0x1c9   : > { %v1201_v53 = vmul.f32 %v3622_v51, %v4790_v56  ;;  %v1100_v17 = vpop.f32.mrb[15].mxu0 }
 0x1ca   : > { %v1200_v54 = vmul.f32 %v4790_v56, %v1100_v17 }
 0x1cb   : > { %v1238_v16 = vadd.f32 %v4795_v58, %v1201_v53  ;;  %1416 = vrot.lane.b32.xlu0 %v4903_v52, %s4241_s26  ;;  %1333 = vrot.lane.b32.xlu1 %v4903_v52, %s4240_s23 }
 0x1cc   : > { %v1237_v57 = vadd.f32 %v4795_v58, %v1200_v54 }
 0x1cd   : > { %v4912_v55 = vmax.f32 %v1238_v16, 0.0 }
 0x1ce   : > { %v4919_v60 = vmax.f32 %v1237_v57, 0.0 }
 0x1cf   : > { %1339 = vrot.lane.b32.xlu0 %v4912_v55, %s4240_s23  ;;  %1422 = vrot.lane.b32.xlu1 %v4912_v55, %s4241_s26 }
 0x1d0   : > { %v3625_v59 = vpop.f32.mrb[16].mxu0 }
 0x1d1   : > { %v1203_v18 = vmul.f32 %v3625_v59, %v4790_v56  ;;  %v1110_v61 = vpop.f32.mrb[17].mxu0 }
 0x1d2   : > { %v1202_v0 = vmul.f32 %v4790_v56, %v1110_v61 }
 0x1d3   : > { %v1240_v1 = vadd.f32 %v4795_v58, %v1203_v18  ;;  %1420 = vrot.lane.b32.xlu0 %v4919_v60, %s4241_s26  ;;  %1337 = vrot.lane.b32.xlu1 %v4919_v60, %s4240_s23 }
 0x1d4   : > { %v1239_v2 = vadd.f32 %v4795_v58, %v1202_v0 }
 0x1d5   : > { %v4928_v21 = vmax.f32 %v1240_v1, 0.0 }
 0x1d6   : > { %v4935_v4 = vmax.f32 %v1239_v2, 0.0 }
 0x1d7   : > { %1343 = vrot.lane.b32.xlu0 %v4928_v21, %s4240_s23  ;;  %1426 = vrot.lane.b32.xlu1 %v4928_v21, %s4241_s26 }
 0x1d8   : > { %v3628_v20 = vpop.f32.mrb[18].mxu0 }
 0x1d9   : > { %v1205_v5 = vmul.f32 %v3628_v20, %v4790_v56  ;;  %v1120_v7 = vpop.f32.mrb[19].mxu0 }
 0x1da   : > { %v1204_v23 = vmul.f32 %v4790_v56, %v1120_v7 }
 0x1db   : > { %v1242_v8 = vadd.f32 %v4795_v58, %v1205_v5  ;;  %1424 = vrot.lane.b32.xlu0 %v4935_v4, %s4241_s26  ;;  %1341 = vrot.lane.b32.xlu1 %v4935_v4, %s4240_s23 }
 0x1dc   : > { %v1241_v32 = vadd.f32 %v4795_v58, %v1204_v23 }
 0x1dd   : > { %v4944_v22 = vmax.f32 %v1242_v8, 0.0 }
 0x1de   : > { %v4951_v35 = vmax.f32 %v1241_v32, 0.0  ;;  %v1186_v32 = vmul.f32 %v4790_v56, %v4798_v19 }
 0x1df   : > { %1347 = vrot.lane.b32.xlu0 %v4944_v22, %s4240_s23  ;;  %1430 = vrot.lane.b32.xlu1 %v4944_v22, %s4241_s26 }
 0x1e0   : > { %v3631_v33 = vpop.f32.mrb[20].mxu0 }
 0x1e1   : > { %v1207_v25 = vmul.f32 %v3631_v33, %v4790_v56  ;;  %v1130_v11 = vpop.f32.mrb[21].mxu0 }
 0x1e2   : > { %v1206_v24 = vmul.f32 %v4790_v56, %v1130_v11 }
 0x1e3   : > { %v1244_v10 = vadd.f32 %v4795_v58, %v1207_v25  ;;  %1428 = vrot.lane.b32.xlu0 %v4951_v35, %s4241_s26  ;;  %1345 = vrot.lane.b32.xlu1 %v4951_v35, %s4240_s23  ;;  %v1223_v25 = vadd.f32 %v4795_v58, %v1186_v32 }
 0x1e4   : > { %v1243_v39 = vadd.f32 %v4795_v58, %v1206_v24 }
 0x1e5   : > { %v4960_v37 = vmax.f32 %v1244_v10, 0.0  ;;  %v1253_v10 = vmax.f32 %v1223_v25, 0.0 }
 0x1e6   : > { %v4967_v40 = vmax.f32 %v1243_v39, 0.0 }
 0x1e7   : > { %1351 = vrot.lane.b32.xlu0 %v4960_v37, %s4240_s23  ;;  %1434 = vrot.lane.b32.xlu1 %v4960_v37, %s4241_s26 }
 0x1e8   : > { %v3634_v27 = vpop.f32.mrb[22].mxu0 }
 0x1e9   : > { %v1209_v26 = vmul.f32 %v3634_v27, %v4790_v56  ;;  %v1140_v13 = vpop.f32.mrb[23].mxu0 }
 0x1ea   : > { %v1208_v42 = vmul.f32 %v4790_v56, %v1140_v13 }
 0x1eb   : > { %v1246_v43 = vadd.f32 %v4795_v58, %v1209_v26  ;;  %1432 = vrot.lane.b32.xlu0 %v4967_v40, %s4241_s26  ;;  %1349 = vrot.lane.b32.xlu1 %v4967_v40, %s4240_s23 }
 0x1ec   : > { %v1245_v44 = vadd.f32 %v4795_v58, %v1208_v42 }
 0x1ed   : > { %v4976_v28 = vmax.f32 %v1246_v43, 0.0 }
 0x1ee   : > { %v4983_v46 = vmax.f32 %v1245_v44, 0.0 }
 0x1ef   : > { %1355 = vrot.lane.b32.xlu0 %v4976_v28, %s4240_s23  ;;  %1438 = vrot.lane.b32.xlu1 %v4976_v28, %s4241_s26 }
 0x1f0   : > { %v3637_v29 = vpop.f32.mrb[24].mxu0 }
 0x1f1   : > { %v1150_v47 = vpop.f32.mrb[25].mxu0  ;;  %v1211_v15 = vmul.f32 %v3637_v29, %v4790_v56 }
 0x1f2   : > { %v1210_v31 = vmul.f32 %v4790_v56, %v1150_v47 }
 0x1f3   : > { %1436 = vrot.lane.b32.xlu0 %v4983_v46, %s4241_s26  ;;  %1353 = vrot.lane.b32.xlu1 %v4983_v46, %s4240_s23  ;;  %v1248_v14 = vadd.f32 %v4795_v58, %v1211_v15 }
 0x1f4   : > { %v1247_v48 = vadd.f32 %v4795_v58, %v1210_v31 }
 0x1f5   : > { %v5000_v54 = vmax.f32 %v1248_v14, 0.0 }
 0x1f6   : > { %v4993_v50 = vmax.f32 %v1247_v48, 0.0 }
 0x1f8   : > { %1440 = vrot.lane.b32.xlu0 %v4993_v50, %s4241_s26  ;;  %1357 = vrot.lane.b32.xlu1 %v4993_v50, %s4240_s23  ;;  %v3640_v51 = vpop.f32.mrb[26].mxu0 }
 0x1f9   : > { %v1213_v53 = vmul.f32 %v3640_v51, %v4790_v56  ;;  %v1160_v17 = vpop.f32.mrb[27].mxu0 }
 0x1fa   : > { %v1212_v16 = vmul.f32 %v4790_v56, %v1160_v17 }
 0x1fb   : > { %v1250_v57 = vadd.f32 %v4795_v58, %v1213_v53 }
 0x1fc   : > { %1359 = vrot.lane.b32.xlu0 %v5000_v54, %s4240_s23  ;;  %1442 = vrot.lane.b32.xlu1 %v5000_v54, %s4241_s26  ;;  %v1249_v59 = vadd.f32 %v4795_v58, %v1212_v16 }
 0x1fd   : > { %v5009_v18 = vmax.f32 %v1250_v57, 0.0 }
 0x1fe   : > { %v5011_v61 = vmax.f32 %v1249_v59, 0.0 }
 0x200   : > { %1363 = vrot.lane.b32.xlu0 %v5009_v18, %s4240_s23  ;;  %1446 = vrot.lane.b32.xlu1 %v5009_v18, %s4241_s26  ;;  %v3643_v0 = vpop.f32.mrb[28].mxu0 }
 0x201   : > { %v1215_v1 = vmul.f32 %v3643_v0, %v4790_v56  ;;  %v1170_v2 = vpop.f32.mrb[29].mxu0 }
 0x202   : > { %v1214_v20 = vmul.f32 %v4790_v56, %v1170_v2 }
 0x203   : > { %v1252_v5 = vadd.f32 %v4795_v58, %v1215_v1 }
 0x204   : > { %v1251_v7 = vadd.f32 %v4795_v58, %v1214_v20  ;;  %1444 = vrot.lane.b32.xlu0 %v5011_v61, %s4241_s26  ;;  %1361 = vrot.lane.b32.xlu1 %v5011_v61, %s4240_s23 }
 0x205   : > { %v1282_v8 = vmax.f32 %v1252_v5, 0.0 }
 0x206   : > { %v1281_v23 = vmax.f32 %v1251_v7, 0.0 }
 0x208   : > { %1448 = vrot.lane.b32.xlu0 %v1281_v23, %s4241_s26  ;;  %1365 = vrot.lane.b32.xlu1 %v1281_v23, %s4240_s23 }
 0x209   : > { %v1312_v33 = vpop.permute.xlu0 %1311 }
 0x20a   : > { %v1481_v39 = vsel %vm1480_vm6, %v1253_v10, %v1312_v33 }
 0x20c   : > { %1450 = vrot.lane.b32.xlu1 %v1282_v8, %s4241_s26 }
 0x211   : > { %v1316_v11 = vpop.permute.xlu0 %1315  ;;  %v1399_v24 = vpop.permute.xlu1 %1398 }
 0x212   : > { %v1483_v43 = vsel %vm1480_vm6, %v4823_v6, %v1316_v11 }
 0x215   : > { %v1397_v27 = vpop.permute.xlu0 %1396  ;;  %v1314_v26 = vpop.permute.xlu1 %1313 }
 0x216   : > { %v1482_v13 = vsel %vm1480_vm6, %v1254_v63, %v1314_v26  ;;  %v1510_v56 = vsel %vm1509_vm7, %v1481_v39, %v1397_v27 }
 0x217   : > { %3668 = vmatprep.mubr.msk.f32.mxu1 %vm1550_vm8, %v1510_v56  ;;  %v1511_v58 = vsel %vm1509_vm7, %v1482_v13, %v1399_v24 }
 0x218   : > { %3669 = vmatmul.mubr.msk.f32.vlgmr.msra.gmra.mrb[0].mxu1 %vm1550_vm8, %v1511_v58 }
 0x219   : > { %v1320_v19 = vpop.permute.xlu0 %1319  ;;  %v1403_v42 = vpop.permute.xlu1 %1402 }
 0x21a   : > { %v1485_v48 = vsel %vm1480_vm6, %v4839_v34, %v1320_v19 }
 0x21d   : > { %v1401_v44 = vpop.permute.xlu0 %1400  ;;  %v1318_v29 = vpop.permute.xlu1 %1317 }
 0x21e   : > { %v1512_v47 = vsel %vm1509_vm7, %v1483_v43, %v1401_v44  ;;  %v1484_v62 = vsel %vm1480_vm6, %v4816_v3, %v1318_v29 }
 0x21f   : > { %3671 = vmatprep.mubr.msk.f32.mxu1 %vm1550_vm8, %v1512_v47  ;;  %v1513_v63 = vsel %vm1509_vm7, %v1484_v62, %v1403_v42 }
 0x220   : > { %3672 = vmatmul.mubr.msk.f32.gmra.mrb[2].mxu1 %vm1550_vm8, %v1513_v63 }
 0x221   : > { %v1324_v15 = vpop.permute.xlu0 %1323  ;;  %v1407_v31 = vpop.permute.xlu1 %1406 }
 0x222   : > { %v1487_v57 = vsel %vm1480_vm6, %v4855_v38, %v1324_v15 }
 0x225   : > { %v1405_v14 = vpop.permute.xlu0 %1404  ;;  %v1322_v6 = vpop.permute.xlu1 %1321 }
 0x226   : > { %v1514_v51 = vsel %vm1509_vm7, %v1485_v48, %v1405_v14  ;;  %v1486_v53 = vsel %vm1480_vm6, %v4832_v9, %v1322_v6 }
 0x227   : > { %3674 = vmatprep.mubr.msk.f32.mxu1 %vm1550_vm8, %v1514_v51  ;;  %v1515_v3 = vsel %vm1509_vm7, %v1486_v53, %v1407_v31 }
 0x228   : > { %3675 = vmatmul.mubr.msk.f32.gmra.mrb[4].mxu1 %vm1550_vm8, %v1515_v3 }
 0x229   : > { %v1328_v17 = vpop.permute.xlu0 %1327  ;;  %v1411_v16 = vpop.permute.xlu1 %1410 }
 0x22a   : > { %v1489_v5 = vsel %vm1480_vm6, %v4871_v12, %v1328_v17 }
 0x22d   : > { %v1409_v59 = vpop.permute.xlu0 %1408  ;;  %v1326_v34 = vpop.permute.xlu1 %1325 }
 0x22e   : > { %v1516_v0 = vsel %vm1509_vm7, %v1487_v57, %v1409_v59  ;;  %v1488_v1 = vsel %vm1480_vm6, %v4848_v36, %v1326_v34 }
 0x22f   : > { %3677 = vmatprep.mubr.msk.f32.mxu1 %vm1550_vm8, %v1516_v0  ;;  %v1517_v9 = vsel %vm1509_vm7, %v1488_v1, %v1411_v16 }
 0x230   : > { %3678 = vmatmul.mubr.msk.f32.gmra.mrb[6].mxu1 %vm1550_vm8, %v1517_v9 }
 0x231   : > { %v1332_v2 = vpop.permute.xlu0 %1331  ;;  %v1415_v20 = vpop.permute.xlu1 %1414 }
 0x232   : > { %v1491_v25 = vsel %vm1480_vm6, %v4887_v30, %v1332_v2 }
 0x235   : > { %v1413_v7 = vpop.permute.xlu0 %1412  ;;  %v1330_v38 = vpop.permute.xlu1 %1329 }
 0x236   : > { %v1518_v23 = vsel %vm1509_vm7, %v1489_v5, %v1413_v7  ;;  %v1490_v8 = vsel %vm1480_vm6, %v4864_v41, %v1330_v38 }
 0x237   : > { %3680 = vmatprep.mubr.msk.f32.mxu1 %vm1550_vm8, %v1518_v23  ;;  %v1519_v36 = vsel %vm1509_vm7, %v1490_v8, %v1415_v20 }
 0x238   : > { %3681 = vmatmul.mubr.msk.f32.gmra.mrb[8].mxu1 %vm1550_vm8, %v1519_v36 }
 0x239   : > { %v1336_v32 = vpop.permute.xlu0 %1335  ;;  %v1419_v33 = vpop.permute.xlu1 %1418 }
 0x23a   : > { %v1493_v26 = vsel %vm1480_vm6, %v4903_v52, %v1336_v32 }
 0x23d   : > { %v1417_v11 = vpop.permute.xlu0 %1416  ;;  %v1334_v12 = vpop.permute.xlu1 %1333 }
 0x23e   : > { %v1520_v24 = vsel %vm1509_vm7, %v1491_v25, %v1417_v11  ;;  %v1492_v10 = vsel %vm1480_vm6, %v4880_v45, %v1334_v12 }
 0x23f   : > { %3683 = vmatprep.mubr.msk.f32.mxu1 %vm1550_vm8, %v1520_v24  ;;  %v1521_v41 = vsel %vm1509_vm7, %v1492_v10, %v1419_v33 }
 0x240   : > { %3684 = vmatmul.mubr.msk.f32.gmra.mrb[10].mxu1 %vm1550_vm8, %v1521_v41 }
 0x241   : > { %v1340_v39 = vpop.permute.xlu0 %1339  ;;  %v1423_v27 = vpop.permute.xlu1 %1422 }
 0x242   : > { %v1495_v43 = vsel %vm1480_vm6, %v4919_v60, %v1340_v39 }
 0x245   : > { %v1421_v13 = vpop.permute.xlu0 %1420  ;;  %v1338_v30 = vpop.permute.xlu1 %1337 }
 0x246   : > { %v1522_v56 = vsel %vm1509_vm7, %v1493_v26, %v1421_v13  ;;  %v1494_v58 = vsel %vm1480_vm6, %v4896_v49, %v1338_v30  ;;  %v2063_v26 = vld [vmem:[%s5792_s7 + $0x10] sm:$0xff] }
 0x247   : > { %3686 = vmatprep.mubr.msk.f32.mxu1 %vm1550_vm8, %v1522_v56  ;;  %v1523_v45 = vsel %vm1509_vm7, %v1494_v58, %v1423_v27  ;;  %v2061_v27 = vld [vmem:[%s5792_s7] sm:$0xff] }
 0x248   : > { %3687 = vmatmul.mubr.msk.f32.gmra.mrb[12].mxu1 %vm1550_vm8, %v1523_v45  ;;  %v5158_v56 = vld [vmem:[%s5790_s5] ss:$0 sm:$0xff] }
 0x249   : > { %v1344_v19 = vpop.permute.xlu0 %1343  ;;  %v1427_v42 = vpop.permute.xlu1 %1426  ;;  %v5163_v45 = vld [vmem:[%s5791_s6] ss:$0 sm:$0xff] }
 0x24a   : > { %v1497_v15 = vsel %vm1480_vm6, %v4935_v4, %v1344_v19 }
 0x24d   : > { %v1425_v44 = vpop.permute.xlu0 %1424  ;;  %v1342_v52 = vpop.permute.xlu1 %1341 }
 0x24e   : > { %v1524_v29 = vsel %vm1509_vm7, %v1495_v43, %v1425_v44  ;;  %v1496_v47 = vsel %vm1480_vm6, %v4912_v55, %v1342_v52  ;;  %v2065_v52 = vld [vmem:[%s5792_s7 + $0x20] sm:$0xff] }
 0x24f   : > { %3689 = vmatprep.mubr.msk.f32.mxu1 %vm1550_vm8, %v1524_v29  ;;  %v1525_v49 = vsel %vm1509_vm7, %v1496_v47, %v1427_v42  ;;  %v2066_v29 = vld [vmem:[%s5792_s7 + $0x28] sm:$0xff] }
 0x250   : > { %3690 = vmatmul.mubr.msk.f32.gmra.mrb[14].mxu1 %vm1550_vm8, %v1525_v49  ;;  %v3790_v49 = vpack.c.bf16 %v2066_v29, %v2065_v52 }
 0x251   : > { %v1348_v62 = vpop.permute.xlu0 %1347  ;;  %v1431_v63 = vpop.permute.xlu1 %1430 }
 0x252   : > { %v1499_v53 = vsel %vm1480_vm6, %v4951_v35, %v1348_v62 }
 0x255   : > { %v1429_v31 = vpop.permute.xlu0 %1428  ;;  %v1346_v60 = vpop.permute.xlu1 %1345 }
 0x256   : > { %v1526_v48 = vsel %vm1509_vm7, %v1497_v15, %v1429_v31  ;;  %v1498_v14 = vsel %vm1480_vm6, %v4928_v21, %v1346_v60  ;;  %v2068_v15 = vld [vmem:[%s5792_s7 + $0x38] sm:$0xff] }
 0x257   : > { %3692 = vmatprep.mubr.msk.f32.mxu1 %vm1550_vm8, %v1526_v48  ;;  %v1527_v55 = vsel %vm1509_vm7, %v1498_v14, %v1431_v63  ;;  %v2067_v63 = vld [vmem:[%s5792_s7 + $0x30] sm:$0xff] }
 0x258   : > { %3693 = vmatmul.mubr.msk.f32.gmra.mrb[16].mxu1 %vm1550_vm8, %v1527_v55  ;;  %v3794_v60 = vpack.c.bf16 %v2068_v15, %v2067_v63 }
 0x259   : > { %v1352_v6 = vpop.permute.xlu0 %1351  ;;  %v1435_v51 = vpop.permute.xlu1 %1434 }
 0x25a   : > { %v1501_v34 = vsel %vm1480_vm6, %v4967_v40, %v1352_v6 }
 0x25d   : > { %v1433_v3 = vpop.permute.xlu0 %1432  ;;  %v1350_v4 = vpop.permute.xlu1 %1349 }
 0x25e   : > { %v1528_v17 = vsel %vm1509_vm7, %v1499_v53, %v1433_v3  ;;  %v1500_v16 = vsel %vm1480_vm6, %v4944_v22, %v1350_v4  ;;  %v2069_v3 = vld [vmem:[%s5792_s7 + $0x40] sm:$0xff]  ;;  %v2070_v4 = vld [vmem:[%s5792_s7 + $0x48] sm:$0xff] }
 0x25f   : > { %3695 = vmatprep.mubr.msk.f32.mxu1 %vm1550_vm8, %v1528_v17  ;;  %v1529_v21 = vsel %vm1509_vm7, %v1500_v16, %v1435_v51  ;;  %v3798_v16 = vpack.c.bf16 %v2070_v4, %v2069_v3 }
 0x260   : > { %3696 = vmatmul.mubr.msk.f32.gmra.mrb[18].mxu1 %vm1550_vm8, %v1529_v21 }
 0x261   : > { %v1356_v57 = vpop.permute.xlu0 %1355  ;;  %v1439_v59 = vpop.permute.xlu1 %1438 }
 0x262   : > { %v1503_v2 = vsel %vm1480_vm6, %v4983_v46, %v1356_v57 }
 0x265   : > { %v1437_v0 = vpop.permute.xlu0 %1436  ;;  %v1354_v35 = vpop.permute.xlu1 %1353 }
 0x266   : > { %v1530_v1 = vsel %vm1509_vm7, %v1501_v34, %v1437_v0  ;;  %v1502_v9 = vsel %vm1480_vm6, %v4960_v37, %v1354_v35  ;;  %v2072_v34 = vld [vmem:[%s5792_s7 + $0x58] sm:$0xff] }
 0x267   : > { %3698 = vmatprep.mubr.msk.f32.mxu1 %vm1550_vm8, %v1530_v1  ;;  %v1531_v22 = vsel %vm1509_vm7, %v1502_v9, %v1439_v59  ;;  %v2071_v59 = vld [vmem:[%s5792_s7 + $0x50] sm:$0xff] }
 0x268   : > { %3699 = vmatmul.mubr.msk.f32.gmra.mrb[20].mxu1 %vm1550_vm8, %v1531_v22  ;;  %v3802_v0 = vpack.c.bf16 %v2072_v34, %v2071_v59 }
 0x26a   : > { %v1441_v20 = vpop.permute.xlu0 %1440  ;;  %v1358_v5 = vpop.permute.xlu1 %1357 }
 0x26b   : > { %v1532_v40 = vsel %vm1509_vm7, %v1503_v2, %v1441_v20  ;;  %v1504_v7 = vsel %vm1480_vm6, %v4976_v28, %v1358_v5 }
 0x26c   : > { %3701 = vmatprep.mubr.msk.f32.mxu1 %vm1550_vm8, %v1532_v40 }
 0x26e   : > { %v1360_v38 = vpop.permute.xlu0 %1359  ;;  %v1443_v37 = vpop.permute.xlu1 %1442 }
 0x26f   : > { %v1533_v23 = vsel %vm1509_vm7, %v1504_v7, %v1443_v37  ;;  %v1505_v46 = vsel %vm1480_vm6, %v4993_v50, %v1360_v38 }
 0x270   : > { %3702 = vmatmul.mubr.msk.f32.gmra.mrb[22].mxu1 %vm1550_vm8, %v1533_v23 }
 0x272   : > { %v1364_v8 = vpop.permute.xlu0 %1363  ;;  %v1447_v36 = vpop.permute.xlu1 %1446 }
 0x273   : > { %v1507_v12 = vsel %vm1480_vm6, %v5011_v61, %v1364_v8  ;;  %v2062_v61 = vld [vmem:[%s5792_s7 + $0x8] sm:$0xff] }
 0x274   : > { %v3782_v13 = vpack.c.bf16 %v2062_v61, %v2061_v27 }
 0x276   : > { %v1445_v32 = vpop.permute.xlu0 %1444  ;;  %v1362_v33 = vpop.permute.xlu1 %1361  ;;  %3783 = vmatprep.subr.bf16.mxu0 %v3782_v13 }
 0x277   : > { %v1534_v25 = vsel %vm1509_vm7, %v1505_v46, %v1445_v32  ;;  %v1506_v11 = vsel %vm1480_vm6, %v5000_v54, %v1362_v33  ;;  %3785 = vmatpush3.bf16.msra.mxu0 %v3782_v13 }
 0x278   : > { %3704 = vmatprep.mubr.msk.f32.mxu1 %vm1550_vm8, %v1534_v25  ;;  %v1535_v28 = vsel %vm1509_vm7, %v1506_v11, %v1447_v36 }
 0x279   : > { %3705 = vmatmul.mubr.msk.f32.gmra.mrb[24].mxu1 %vm1550_vm8, %v1535_v28 }
 0x27a   : > { %v1449_v24 = vpop.permute.xlu0 %1448  ;;  %v1366_v10 = vpop.permute.xlu1 %1365 }
 0x27b   : > { %v1536_v50 = vsel %vm1509_vm7, %v1507_v12, %v1449_v24  ;;  %v1508_v41 = vsel %vm1480_vm6, %v5009_v18, %v1366_v10  ;;  %v2064_v18 = vld [vmem:[%s5792_s7 + $0x18] sm:$0xff] }
 0x27c   : > { %3707 = vmatprep.mubr.msk.f32.mxu1 %vm1550_vm8, %v1536_v50  ;;  %v3786_v30 = vpack.c.bf16 %v2064_v18, %v2063_v26 }
 0x27e   : > { %v1451_v39 = vpop.permute.xlu1 %1450  ;;  %3787 = vmatprep.subr.bf16.mxu0 %v3786_v30 }
 0x27f   : > { %v1537_v54 = vsel %vm1509_vm7, %v1508_v41, %v1451_v39  ;;  %3789 = vmatpush3.bf16.msra.mxu0 %v3786_v30 }
 0x280   : > { %3708 = vmatmul.mubr.msk.f32.gmra.mrb[26].mxu1 %vm1550_vm8, %v1537_v54  ;;  %3791 = vmatprep.subr.bf16.mxu0 %v3790_v49 }
 0x283   : > { %3793 = vmatpush3.bf16.msra.mxu0 %v3790_v49 }
 0x284   : > { %3795 = vmatprep.subr.bf16.mxu0 %v3794_v60 }
 0x287   : > { %3797 = vmatpush3.bf16.msra.mxu0 %v3794_v60 }
 0x288   : > { %3799 = vmatprep.subr.bf16.mxu0 %v3798_v16 }
 0x28b   : > { %3801 = vmatpush3.bf16.msra.mxu0 %v3798_v16 }
 0x28c   : > { %3803 = vmatprep.subr.bf16.mxu0 %v3802_v0 }
 0x28f   : > { %3805 = vmatpush3.bf16.msra.mxu0 %v3802_v0 }
 0x2eb   : > { %v3670_v58 = vpop.f32.mrb[0].mxu1 }
 0x2ec   : > { %v1848_v19 = vmul.f32 %v3670_v58, %v5158_v56  ;;  %v1701_v42 = vpop.f32.mrb[1].mxu1 }
 0x2ed   : > { %v1847_v43 = vmul.f32 %v5158_v56, %v1701_v42 }
 0x2ee   : > { %v1883_v44 = vadd.f32 %v5163_v45, %v1848_v19 }
 0x2ef   : > { %v1882_v47 = vadd.f32 %v5163_v45, %v1847_v43 }
 0x2f0   : > { %v1911_v62 = vmax.f32 %v1883_v44, 0.0 }
 0x2f1   : > { %v1910_v31 = vmax.f32 %v1882_v47, 0.0 }
 0x2f3   : > { %v5181_v48 = vmax.f32 %v1910_v31, %v1911_v62  ;;  %v3673_v14 = vpop.f32.mrb[2].mxu1 }
 0x2f4   : > { %v1850_v55 = vmul.f32 %v3673_v14, %v5158_v56  ;;  %v1711_v6 = vpop.f32.mrb[3].mxu1 }
 0x2f5   : > { %v1849_v51 = vmul.f32 %v5158_v56, %v1711_v6 }
 0x2f6   : > { %v1885_v53 = vadd.f32 %v5163_v45, %v1850_v55 }
 0x2f7   : > { %v1884_v17 = vadd.f32 %v5163_v45, %v1849_v51 }
 0x2f8   : > { %v1913_v21 = vmax.f32 %v1885_v53, 0.0 }
 0x2f9   : > { %v1912_v57 = vmax.f32 %v1884_v17, 0.0 }
 0x2fb   : > { %v5199_v35 = vmax.f32 %v1912_v57, %v1913_v21  ;;  %v3676_v1 = vpop.f32.mrb[4].mxu1 }
 0x2fc   : > { %v1852_v9 = vmul.f32 %v3676_v1, %v5158_v56  ;;  %v1721_v22 = vpop.f32.mrb[5].mxu1 }
 0x2fd   : > { %v1851_v2 = vmul.f32 %v5158_v56, %v1721_v22  ;;  %1964 = vrot.lane.b32.xlu0 %v5199_v35, %s4240_s23 }
 0x2fe   : > { %v1887_v20 = vadd.f32 %v5163_v45, %v1852_v9 }
 0x2ff   : > { %v1886_v5 = vadd.f32 %v5163_v45, %v1851_v2 }
 0x300   : > { %v1915_v40 = vmax.f32 %v1887_v20, 0.0 }
 0x301   : > { %v1914_v7 = vmax.f32 %v1886_v5, 0.0 }
 0x303   : > { %v5207_v38 = vmax.f32 %v1914_v7, %v1915_v40  ;;  %v3679_v37 = vpop.f32.mrb[6].mxu1 }
 0x304   : > { %v1854_v23 = vmul.f32 %v3679_v37, %v5158_v56  ;;  %v1731_v8 = vpop.f32.mrb[7].mxu1 }
 0x305   : > { %v1853_v36 = vmul.f32 %v5158_v56, %v1731_v8  ;;  %2001 = vrot.lane.b32.xlu0 %v5207_v38, %s4241_s26  ;;  %1966 = vrot.lane.b32.xlu1 %v5207_v38, %s4240_s23 }
 0x306   : > { %v1889_v46 = vadd.f32 %v5163_v45, %v1854_v23 }
 0x307   : > { %v1888_v32 = vadd.f32 %v5163_v45, %v1853_v36 }
 0x308   : > { %v1917_v33 = vmax.f32 %v1889_v46, 0.0 }
 0x309   : > { %v1916_v25 = vmax.f32 %v1888_v32, 0.0 }
 0x30b   : > { %v5217_v11 = vmax.f32 %v1916_v25, %v1917_v33  ;;  %v3682_v28 = vpop.f32.mrb[8].mxu1 }
 0x30c   : > { %v1856_v12 = vmul.f32 %v3682_v28, %v5158_v56  ;;  %v1741_v24 = vpop.f32.mrb[9].mxu1 }
 0x30d   : > { %v1855_v10 = vmul.f32 %v5158_v56, %v1741_v24  ;;  %1968 = vrot.lane.b32.xlu0 %v5217_v11, %s4240_s23  ;;  %2003 = vrot.lane.b32.xlu1 %v5217_v11, %s4241_s26 }
 0x30e   : > { %v1891_v50 = vadd.f32 %v5163_v45, %v1856_v12 }
 0x30f   : > { %v1890_v41 = vadd.f32 %v5163_v45, %v1855_v10 }
 0x310   : > { %v1919_v39 = vmax.f32 %v1891_v50, 0.0 }
 0x311   : > { %v1918_v54 = vmax.f32 %v1890_v41, 0.0 }
 0x313   : > { %v5227_v27 = vmax.f32 %v1918_v54, %v1919_v39  ;;  %v3685_v61 = vpop.f32.mrb[10].mxu1 }
 0x314   : > { %v1858_v26 = vmul.f32 %v3685_v61, %v5158_v56  ;;  %v1751_v13 = vpop.f32.mrb[11].mxu1 }
 0x315   : > { %v1857_v18 = vmul.f32 %v5158_v56, %v1751_v13  ;;  %2005 = vrot.lane.b32.xlu0 %v5227_v27, %s4241_s26  ;;  %1970 = vrot.lane.b32.xlu1 %v5227_v27, %s4240_s23 }
 0x316   : > { %v1893_v30 = vadd.f32 %v5163_v45, %v1858_v26 }
 0x317   : > { %v1892_v58 = vadd.f32 %v5163_v45, %v1857_v18 }
 0x318   : > { %v1921_v19 = vmax.f32 %v1893_v30, 0.0 }
 0x319   : > { %v1920_v42 = vmax.f32 %v1892_v58, 0.0 }
 0x31b   : > { %v5237_v43 = vmax.f32 %v1920_v42, %v1921_v19  ;;  %v3688_v44 = vpop.f32.mrb[12].mxu1 }
 0x31c   : > { %v1860_v52 = vmul.f32 %v3688_v44, %v5158_v56  ;;  %v1761_v29 = vpop.f32.mrb[13].mxu1 }
 0x31d   : > { %v1859_v47 = vmul.f32 %v5158_v56, %v1761_v29  ;;  %1972 = vrot.lane.b32.xlu0 %v5237_v43, %s4240_s23  ;;  %2007 = vrot.lane.b32.xlu1 %v5237_v43, %s4241_s26 }
 0x31e   : > { %v1895_v49 = vadd.f32 %v5163_v45, %v1860_v52 }
 0x31f   : > { %v1894_v62 = vadd.f32 %v5163_v45, %v1859_v47 }
 0x320   : > { %v1923_v63 = vmax.f32 %v1895_v49, 0.0 }
 0x321   : > { %v1922_v15 = vmax.f32 %v1894_v62, 0.0 }
 0x323   : > { %v5247_v31 = vmax.f32 %v1922_v15, %v1923_v63  ;;  %v3691_v60 = vpop.f32.mrb[14].mxu1 }
 0x324   : > { %v1862_v14 = vmul.f32 %v3691_v60, %v5158_v56  ;;  %v1771_v55 = vpop.f32.mrb[15].mxu1 }
 0x325   : > { %v1861_v6 = vmul.f32 %v5158_v56, %v1771_v55  ;;  %2009 = vrot.lane.b32.xlu0 %v5247_v31, %s4241_s26  ;;  %1974 = vrot.lane.b32.xlu1 %v5247_v31, %s4240_s23 }
 0x326   : > { %v1897_v51 = vadd.f32 %v5163_v45, %v1862_v14 }
 0x327   : > { %v1896_v53 = vadd.f32 %v5163_v45, %v1861_v6 }
 0x328   : > { %v1925_v3 = vmax.f32 %v1897_v51, 0.0 }
 0x329   : > { %v1924_v4 = vmax.f32 %v1896_v53, 0.0 }
 0x32b   : > { %v5257_v17 = vmax.f32 %v1924_v4, %v1925_v3  ;;  %v3694_v16 = vpop.f32.mrb[16].mxu1 }
 0x32c   : > { %v1864_v21 = vmul.f32 %v3694_v16, %v5158_v56  ;;  %v1781_v57 = vpop.f32.mrb[17].mxu1 }
 0x32d   : > { %v1863_v59 = vmul.f32 %v5158_v56, %v1781_v57  ;;  %1976 = vrot.lane.b32.xlu0 %v5257_v17, %s4240_s23  ;;  %2011 = vrot.lane.b32.xlu1 %v5257_v17, %s4241_s26 }
 0x32e   : > { %v1899_v34 = vadd.f32 %v5163_v45, %v1864_v21 }
 0x32f   : > { %v1898_v0 = vadd.f32 %v5163_v45, %v1863_v59 }
 0x330   : > { %v1927_v1 = vmax.f32 %v1899_v34, 0.0 }
 0x331   : > { %v1926_v9 = vmax.f32 %v1898_v0, 0.0 }
 0x333   : > { %v5267_v22 = vmax.f32 %v1926_v9, %v1927_v1  ;;  %v3697_v2 = vpop.f32.mrb[18].mxu1 }
 0x334   : > { %v1866_v20 = vmul.f32 %v3697_v2, %v5158_v56  ;;  %v1791_v5 = vpop.f32.mrb[19].mxu1 }
 0x335   : > { %v1865_v40 = vmul.f32 %v5158_v56, %v1791_v5  ;;  %2013 = vrot.lane.b32.xlu0 %v5267_v22, %s4241_s26  ;;  %1978 = vrot.lane.b32.xlu1 %v5267_v22, %s4240_s23 }
 0x336   : > { %v1901_v7 = vadd.f32 %v5163_v45, %v1866_v20 }
 0x337   : > { %v1900_v37 = vadd.f32 %v5163_v45, %v1865_v40 }
 0x338   : > { %v1929_v23 = vmax.f32 %v1901_v7, 0.0 }
 0x339   : > { %v1928_v8 = vmax.f32 %v1900_v37, 0.0 }
 0x33b   : > { %v5277_v36 = vmax.f32 %v1928_v8, %v1929_v23  ;;  %v3700_v46 = vpop.f32.mrb[20].mxu1 }
 0x33c   : > { %v1868_v32 = vmul.f32 %v3700_v46, %v5158_v56  ;;  %v1801_v33 = vpop.f32.mrb[21].mxu1 }
 0x33d   : > { %v1867_v25 = vmul.f32 %v5158_v56, %v1801_v33  ;;  %1980 = vrot.lane.b32.xlu0 %v5277_v36, %s4240_s23  ;;  %2015 = vrot.lane.b32.xlu1 %v5277_v36, %s4241_s26 }
 0x33e   : > { %v1903_v28 = vadd.f32 %v5163_v45, %v1868_v32 }
 0x33f   : > { %v1902_v12 = vadd.f32 %v5163_v45, %v1867_v25 }
 0x340   : > { %v1931_v24 = vmax.f32 %v1903_v28, 0.0 }
 0x341   : > { %v1930_v10 = vmax.f32 %v1902_v12, 0.0 }
 0x343   : > { %v5287_v50 = vmax.f32 %v1930_v10, %v1931_v24  ;;  %v3703_v41 = vpop.f32.mrb[22].mxu1 }
 0x344   : > { %v1870_v39 = vmul.f32 %v3703_v41, %v5158_v56  ;;  %v1811_v54 = vpop.f32.mrb[23].mxu1 }
 0x345   : > { %v1869_v61 = vmul.f32 %v5158_v56, %v1811_v54  ;;  %2017 = vrot.lane.b32.xlu0 %v5287_v50, %s4241_s26  ;;  %1982 = vrot.lane.b32.xlu1 %v5287_v50, %s4240_s23 }
 0x346   : > { %v1905_v26 = vadd.f32 %v5163_v45, %v1870_v39 }
 0x347   : > { %v1904_v13 = vadd.f32 %v5163_v45, %v1869_v61 }
 0x348   : > { %v1933_v18 = vmax.f32 %v1905_v26, 0.0 }
 0x349   : > { %v1932_v30 = vmax.f32 %v1904_v13, 0.0 }
 0x34b   : > { %v5297_v58 = vmax.f32 %v1932_v30, %v1933_v18 }
 0x34c   : > { %v3706_v19 = vpop.f32.mrb[24].mxu1 }
 0x34d   : > { %v1872_v42 = vmul.f32 %v3706_v19, %v5158_v56  ;;  %v1821_v44 = vpop.f32.mrb[25].mxu1  ;;  %1984 = vrot.lane.b32.xlu0 %v5297_v58, %s4240_s23  ;;  %2019 = vrot.lane.b32.xlu1 %v5297_v58, %s4241_s26 }
 0x34e   : > { %v1871_v52 = vmul.f32 %v5158_v56, %v1821_v44 }
 0x34f   : > { %v1907_v29 = vadd.f32 %v5163_v45, %v1872_v42 }
 0x350   : > { %v1906_v47 = vadd.f32 %v5163_v45, %v1871_v52 }
 0x351   : > { %v1935_v49 = vmax.f32 %v1907_v29, 0.0  ;;  %v2334_v29 = vld [vmem:[%s5795_s10] sm:$0xff] }
 0x352   : > { %v1934_v62 = vmax.f32 %v1906_v47, 0.0  ;;  %v4242_v47 = vmov 0.0|0.0  }
 0x353   : > { %v3709_v63 = vpop.f32.mrb[26].mxu1  ;;  %3806 = vmatprep.subr.bf16.mxu1 %v4242_v47 }
 0x354   : > { %v1950_v15 = vmax.f32 %v1934_v62, %v1935_v49  ;;  %v1874_v60 = vmul.f32 %v3709_v63, %v5158_v56  ;;  %v1831_v14 = vpop.f32.mrb[27].mxu1  ;;  %v2337_v62 = vld [vmem:[%s5795_s10 + $0x18] sm:$0xff] }
 0x355   : > { %v1873_v55 = vmul.f32 %v5158_v56, %v1831_v14 }
 0x356   : > { %v1909_v6 = vadd.f32 %v5163_v45, %v1874_v60  ;;  %2021 = vrot.lane.b32.xlu0 %v1950_v15, %s4241_s26  ;;  %1986 = vrot.lane.b32.xlu1 %v1950_v15, %s4240_s23  ;;  %v2338_v15 = vld [vmem:[%s5795_s10 + $0x20] sm:$0xff]  ;;  %v2339_v60 = vld [vmem:[%s5795_s10 + $0x28] sm:$0xff] }
 0x357   : > { %v1908_v51 = vadd.f32 %v5163_v45, %v1873_v55  ;;  %v3813_v14 = vpack.c.bf16 %v2339_v60, %v2338_v15  ;;  %v2340_v55 = vld [vmem:[%s5795_s10 + $0x30] sm:$0xff] }
 0x358   : > { %v1937_v53 = vmax.f32 %v1909_v6, 0.0  ;;  %v2341_v6 = vld [vmem:[%s5795_s10 + $0x38] sm:$0xff] }
 0x359   : > { %v1936_v3 = vmax.f32 %v1908_v51, 0.0  ;;  %v3816_v51 = vpack.c.bf16 %v2341_v6, %v2340_v55 }
 0x35b   : > { %v1951_v4 = vmax.f32 %v1936_v3, %v1937_v53  ;;  %v2342_v53 = vld [vmem:[%s5795_s10 + $0x40] sm:$0xff]  ;;  %v2343_v3 = vld [vmem:[%s5795_s10 + $0x48] sm:$0xff] }
 0x35d   : > { %2023 = vrot.lane.b32.xlu1 %v1951_v4, %s4241_s26  ;;  %v3819_v4 = vpack.c.bf16 %v2343_v3, %v2342_v53 }
 0x36f   : > { %v1965_v16 = vpop.permute.xlu0 %1964 }
 0x370   : > { %v2037_v21 = vsel %vm1480_vm6, %v5181_v48, %v1965_v16  ;;  %v2344_v16 = vld [vmem:[%s5795_s10 + $0x50] sm:$0xff] }
 0x377   : > { %v2002_v57 = vpop.permute.xlu0 %2001  ;;  %v1967_v59 = vpop.permute.xlu1 %1966 }
 0x378   : > { %v2049_v56 = vsel %vm1509_vm7, %v2037_v21, %v2002_v57  ;;  %v2038_v34 = vsel %vm1480_vm6, %v5199_v35, %v1967_v59  ;;  %v2345_v21 = vld [vmem:[%s5795_s10 + $0x58] sm:$0xff]  ;;  %v2347_v59 = vld [vmem:[%s5795_s10 + $0x68] sm:$0xff] }
 0x379   : > { %3734 = vmatprep.mubr.msk.f32.mxu0 %vm1550_vm8, %v2049_v56  ;;  %v3822_v57 = vpack.c.bf16 %v2345_v21, %v2344_v16  ;;  %v2346_v56 = vld [vmem:[%s5795_s10 + $0x60] sm:$0xff] }
 0x37f   : > { %v2004_v0 = vpop.permute.xlu1 %2003  ;;  %v1969_v1 = vpop.permute.xlu0 %1968 }
 0x380   : > { %v2050_v45 = vsel %vm1509_vm7, %v2038_v34, %v2004_v0  ;;  %v2039_v9 = vsel %vm1480_vm6, %v5207_v38, %v1969_v1  ;;  %v3825_v34 = vpack.c.bf16 %v2347_v59, %v2346_v56  ;;  %v2348_v0 = vld [vmem:[%s5795_s10 + $0x70] sm:$0xff] }
 0x381   : > { %3735 = vmatmul.mubr.msk.f32.vlgmr.msra.gmra.mrb[30].mxu0 %vm1550_vm8, %v2050_v45  ;;  %v2349_v45 = vld [vmem:[%s5795_s10 + $0x78] sm:$0xff] }
 0x382   : > { %v3828_v1 = vpack.c.bf16 %v2349_v45, %v2348_v0 }
 0x387   : > { %v2006_v2 = vpop.permute.xlu0 %2005  ;;  %v1971_v20 = vpop.permute.xlu1 %1970 }
 0x388   : > { %v2051_v48 = vsel %vm1509_vm7, %v2039_v9, %v2006_v2  ;;  %v2040_v5 = vsel %vm1480_vm6, %v5217_v11, %v1971_v20  ;;  %v2350_v9 = vld [vmem:[%s5795_s10 + $0x80] sm:$0xff]  ;;  %v2351_v2 = vld [vmem:[%s5795_s10 + $0x88] sm:$0xff]  ;;  %v2352_v20 = vld [vmem:[%s5795_s10 + $0x90] sm:$0xff] }
 0x389   : > { %3737 = vmatprep.mubr.msk.f32.mxu0 %vm1550_vm8, %v2051_v48  ;;  %v3831_v48 = vpack.c.bf16 %v2351_v2, %v2350_v9 }
 0x38f   : > { %v2008_v40 = vpop.permute.xlu1 %2007  ;;  %v1973_v7 = vpop.permute.xlu0 %1972 }
 0x390   : > { %v2052_v35 = vsel %vm1509_vm7, %v2040_v5, %v2008_v40  ;;  %v2041_v37 = vsel %vm1480_vm6, %v5227_v27, %v1973_v7  ;;  %v2353_v5 = vld [vmem:[%s5795_s10 + $0x98] sm:$0xff]  ;;  %v2355_v7 = vld [vmem:[%s5795_s10 + $0xa8] sm:$0xff] }
 0x391   : > { %3738 = vmatmul.mubr.msk.f32.gmra.mrb[32].mxu0 %vm1550_vm8, %v2052_v35  ;;  %v3834_v40 = vpack.c.bf16 %v2353_v5, %v2352_v20  ;;  %v2354_v35 = vld [vmem:[%s5795_s10 + $0xa0] sm:$0xff] }
 0x397   : > { %v2010_v23 = vpop.permute.xlu0 %2009  ;;  %v1975_v8 = vpop.permute.xlu1 %1974 }
 0x398   : > { %v2053_v38 = vsel %vm1509_vm7, %v2041_v37, %v2010_v23  ;;  %v2042_v46 = vsel %vm1480_vm6, %v5237_v43, %v1975_v8  ;;  %v3837_v37 = vpack.c.bf16 %v2355_v7, %v2354_v35  ;;  %v2356_v23 = vld [vmem:[%s5795_s10 + $0xb0] sm:$0xff] }
 0x399   : > { %3740 = vmatprep.mubr.msk.f32.mxu0 %vm1550_vm8, %v2053_v38  ;;  %v2357_v38 = vld [vmem:[%s5795_s10 + $0xb8] sm:$0xff] }
 0x39a   : > { %v3840_v8 = vpack.c.bf16 %v2357_v38, %v2356_v23 }
 0x39f   : > { %v2012_v32 = vpop.permute.xlu1 %2011  ;;  %v1977_v33 = vpop.permute.xlu0 %1976 }
 0x3a0   : > { %v2054_v11 = vsel %vm1509_vm7, %v2042_v46, %v2012_v32  ;;  %v2043_v25 = vsel %vm1480_vm6, %v5247_v31, %v1977_v33  ;;  %v5437_v46 = vld [vmem:[%s5793_s8] ss:$0 sm:$0xff] }
 0x3a1   : > { %3741 = vmatmul.mubr.msk.f32.gmra.mrb[34].mxu0 %vm1550_vm8, %v2054_v11  ;;  %v5442_v11 = vld [vmem:[%s5794_s9] ss:$0 sm:$0xff] }
 0x3a7   : > { %v2014_v28 = vpop.permute.xlu0 %2013  ;;  %v1979_v12 = vpop.permute.xlu1 %1978 }
 0x3a8   : > { %v2055_v27 = vsel %vm1509_vm7, %v2043_v25, %v2014_v28  ;;  %v2044_v24 = vsel %vm1480_vm6, %v5257_v17, %v1979_v12 }
 0x3a9   : > { %3743 = vmatprep.mubr.msk.f32.mxu0 %vm1550_vm8, %v2055_v27 }
 0x3af   : > { %v2016_v10 = vpop.permute.xlu1 %2015  ;;  %v1981_v41 = vpop.permute.xlu0 %1980 }
 0x3b0   : > { %v2056_v43 = vsel %vm1509_vm7, %v2044_v24, %v2016_v10  ;;  %v2045_v39 = vsel %vm1480_vm6, %v5267_v22, %v1981_v41 }
 0x3b1   : > { %3744 = vmatmul.mubr.msk.f32.gmra.mrb[36].mxu0 %vm1550_vm8, %v2056_v43 }
 0x3b7   : > { %v2018_v54 = vpop.permute.xlu0 %2017  ;;  %v1983_v61 = vpop.permute.xlu1 %1982 }
 0x3b8   : > { %v2057_v31 = vsel %vm1509_vm7, %v2045_v39, %v2018_v54  ;;  %v2046_v26 = vsel %vm1480_vm6, %v5277_v36, %v1983_v61 }
 0x3b9   : > { %3746 = vmatprep.mubr.msk.f32.mxu0 %vm1550_vm8, %v2057_v31 }
 0x3bf   : > { %v2020_v13 = vpop.permute.xlu1 %2019  ;;  %v1985_v18 = vpop.permute.xlu0 %1984 }
 0x3c0   : > { %v2058_v17 = vsel %vm1509_vm7, %v2046_v26, %v2020_v13  ;;  %v2047_v30 = vsel %vm1480_vm6, %v5287_v50, %v1985_v18  ;;  %v2335_v50 = vld [vmem:[%s5795_s10 + $0x8] sm:$0xff] }
 0x3c1   : > { %3747 = vmatmul.mubr.msk.f32.gmra.mrb[38].mxu0 %vm1550_vm8, %v2058_v17  ;;  %v3807_v49 = vpack.c.bf16 %v2335_v50, %v2334_v29 }
 0x3c3   : > { %3808 = vmatpush1.bf16.msra.mxu1 %v3807_v49 }
 0x3c4   : > { %3809 = vmatprep.subr.bf16.mxu1 %v4242_v47 }
 0x3c8   : > { %v2022_v19 = vpop.permute.xlu0 %2021  ;;  %v1987_v42 = vpop.permute.xlu1 %1986 }
 0x3c9   : > { %v2059_v22 = vsel %vm1509_vm7, %v2047_v30, %v2022_v19  ;;  %v2048_v44 = vsel %vm1480_vm6, %v5297_v58, %v1987_v42  ;;  %v2336_v58 = vld [vmem:[%s5795_s10 + $0x10] sm:$0xff] }
 0x3ca   : > { %3749 = vmatprep.mubr.msk.f32.mxu0 %vm1550_vm8, %v2059_v22  ;;  %v3810_v63 = vpack.c.bf16 %v2337_v62, %v2336_v58 }
 0x3cc   : > { %3811 = vmatpush1.bf16.msra.mxu1 %v3810_v63 }
 0x3cd   : > { %3812 = vmatprep.subr.bf16.mxu1 %v4242_v47 }
 0x3cf   : > { %v2024_v52 = vpop.permute.xlu1 %2023 }
 0x3d0   : > { %v2060_v36 = vsel %vm1509_vm7, %v2048_v44, %v2024_v52  ;;  %3814 = vmatpush1.bf16.msra.mxu1 %v3813_v14 }
 0x3d1   : > { %3750 = vmatmul.mubr.msk.f32.gmra.mrb[40].mxu0 %vm1550_vm8, %v2060_v36  ;;  %3815 = vmatprep.subr.bf16.mxu1 %v4242_v47 }
 0x3d4   : > { %3817 = vmatpush1.bf16.msra.mxu1 %v3816_v51 }
 0x3d5   : > { %3818 = vmatprep.subr.bf16.mxu1 %v4242_v47 }
 0x3d8   : > { %3820 = vmatpush1.bf16.msra.mxu1 %v3819_v4 }
 0x3d9   : > { %3821 = vmatprep.subr.bf16.mxu1 %v4242_v47 }
 0x3dc   : > { %3823 = vmatpush1.bf16.msra.mxu1 %v3822_v57 }
 0x3dd   : > { %3824 = vmatprep.subr.bf16.mxu1 %v4242_v47 }
 0x3e0   : > { %3826 = vmatpush1.bf16.msra.mxu1 %v3825_v34 }
 0x3e1   : > { %3827 = vmatprep.subr.bf16.mxu1 %v4242_v47 }
 0x3e4   : > { %3829 = vmatpush1.bf16.msra.mxu1 %v3828_v1 }
 0x3e5   : > { %3830 = vmatprep.subr.bf16.mxu1 %v4242_v47 }
 0x3e8   : > { %3832 = vmatpush1.bf16.msra.mxu1 %v3831_v48 }
 0x3e9   : > { %3833 = vmatprep.subr.bf16.mxu1 %v4242_v47 }
 0x3ec   : > { %3835 = vmatpush1.bf16.msra.mxu1 %v3834_v40 }
 0x3ed   : > { %3836 = vmatprep.subr.bf16.mxu1 %v4242_v47 }
 0x3f0   : > { %3838 = vmatpush1.bf16.msra.mxu1 %v3837_v37 }
 0x3f1   : > { %3839 = vmatprep.subr.bf16.mxu1 %v4242_v47 }
 0x3f4   : > { %3841 = vmatpush1.bf16.msra.mxu1 %v3840_v8 }
 0x454   : > { %v3736_v32 = vpop.f32.mrb[30].mxu0 }
 0x455   : > { %v2242_v33 = vmul.f32 %v3736_v32, %v5437_v46  ;;  %v2175_v25 = vpop.f32.mrb[31].mxu0 }
 0x456   : > { %v2241_v21 = vmul.f32 %v5437_v46, %v2175_v25 }
 0x457   : > { %v2261_v28 = vadd.f32 %v5442_v11, %v2242_v33 }
 0x458   : > { %v2260_v57 = vadd.f32 %v5442_v11, %v2241_v21 }
 0x459   : > { %v2273_v27 = vmax.f32 %v2261_v28, 0.0 }
 0x45a   : > { %v2272_v56 = vmax.f32 %v2260_v57, 0.0 }
 0x45b   : > { %2294 = vrot.lane.b32.xlu0 %v2273_v27, %s4241_s26 }
 0x464   : > { %v3739_v12 = vpop.f32.mrb[32].mxu0 }
 0x465   : > { %v2244_v24 = vmul.f32 %v3739_v12, %v5437_v46  ;;  %v2185_v10 = vpop.f32.mrb[33].mxu0 }
 0x466   : > { %v2243_v43 = vmul.f32 %v5437_v46, %v2185_v10  ;;  %v2556_v10 = vld [vmem:[#allocation2 + $0x18] sm:$0xff] }
 0x467   : > { %v2263_v41 = vadd.f32 %v5442_v11, %v2244_v24  ;;  %v2558_v24 = vld [vmem:[#allocation2 + $0x28] sm:$0xff] }
 0x468   : > { %v2262_v39 = vadd.f32 %v5442_v11, %v2243_v43  ;;  %v2560_v43 = vld [vmem:[#allocation2 + $0x38] sm:$0xff] }
 0x469   : > { %v2275_v54 = vmax.f32 %v2263_v41, 0.0  ;;  %v2553_v41 = vld [vmem:[#allocation2] sm:$0xff] }
 0x46a   : > { %v2274_v31 = vmax.f32 %v2262_v39, 0.0  ;;  %v2557_v39 = vld [vmem:[#allocation2 + $0x20] sm:$0xff] }
 0x46b   : > { %2298 = vrot.lane.b32.xlu0 %v2275_v54, %s4241_s26 }
 0x46c   : > { %2296 = vrot.lane.b32.xlu1 %v2274_v31, %s4241_s26  ;;  %3409 = vmatprep.mubr.msk.f32.mxu1 %vm1509_vm7, %v2274_v31 }
 0x474   : > { %v3742_v61 = vpop.f32.mrb[34].mxu0 }
 0x475   : > { %v2246_v26 = vmul.f32 %v3742_v61, %v5437_v46  ;;  %v2195_v13 = vpop.f32.mrb[35].mxu0  ;;  %v2555_v61 = vld [vmem:[#allocation2 + $0x10] sm:$0xff] }
 0x476   : > { %v2245_v17 = vmul.f32 %v5437_v46, %v2195_v13  ;;  %v2562_v13 = vld [vmem:[#allocation2 + $0x48] sm:$0xff] }
 0x477   : > { %v2265_v18 = vadd.f32 %v5442_v11, %v2246_v26  ;;  %v2559_v26 = vld [vmem:[#allocation2 + $0x30] sm:$0xff] }
 0x478   : > { %v2264_v30 = vadd.f32 %v5442_v11, %v2245_v17  ;;  %v3924_v17 = vpack.c.bf16 %v2559_v26, %v2555_v61  ;;  %v2608_v61 = vld [vmem:[#allocation2 + $0x1b8] sm:$0xff] }
 0x479   : > { %v2277_v19 = vmax.f32 %v2265_v18, 0.0  ;;  %v2566_v18 = vld [vmem:[#allocation2 + $0x68] sm:$0xff] }
 0x47a   : > { %v2276_v22 = vmax.f32 %v2264_v30, 0.0  ;;  %v2564_v30 = vld [vmem:[#allocation2 + $0x58] sm:$0xff] }
 0x47b   : > { %2302 = vrot.lane.b32.xlu0 %v2277_v19, %s4241_s26 }
 0x47c   : > { %2300 = vrot.lane.b32.xlu1 %v2276_v22, %s4241_s26 }
 0x484   : > { %v3745_v42 = vpop.f32.mrb[36].mxu0 }
 0x485   : > { %v2248_v44 = vmul.f32 %v3745_v42, %v5437_v46  ;;  %v2205_v52 = vpop.f32.mrb[37].mxu0 }
 0x486   : > { %v2247_v36 = vmul.f32 %v5437_v46, %v2205_v52  ;;  %v2565_v52 = vld [vmem:[#allocation2 + $0x60] sm:$0xff] }
 0x487   : > { %v2267_v29 = vadd.f32 %v5442_v11, %v2248_v44  ;;  %v2561_v44 = vld [vmem:[#allocation2 + $0x40] sm:$0xff] }
 0x488   : > { %v2266_v50 = vadd.f32 %v5442_v11, %v2247_v36  ;;  %v2563_v36 = vld [vmem:[#allocation2 + $0x50] sm:$0xff] }
 0x489   : > { %v2279_v47 = vmax.f32 %v2267_v29, 0.0  ;;  %v3848_v29 = vpack.c.bf16 %v2565_v52, %v2561_v44  ;;  %v2610_v44 = vld [vmem:[#allocation2 + $0x1c8] sm:$0xff] }
 0x48a   : > { %v2278_v49 = vmax.f32 %v2266_v50, 0.0  ;;  %v2567_v50 = vld [vmem:[#allocation2 + $0x70] sm:$0xff]  ;;  %v2614_v52 = vld [vmem:[#allocation2 + $0x1e8] sm:$0xff] }
 0x48b   : > { %2306 = vrot.lane.b32.xlu0 %v2279_v47, %s4241_s26 }
 0x48c   : > { %2304 = vrot.lane.b32.xlu1 %v2278_v49, %s4241_s26 }
 0x494   : > { %v3748_v58 = vpop.f32.mrb[38].mxu0 }
 0x495   : > { %v2250_v62 = vmul.f32 %v3748_v58, %v5437_v46  ;;  %v2215_v63 = vpop.f32.mrb[39].mxu0  ;;  %v3928_v58 = vpack.c.bf16 %v2567_v50, %v2563_v36  ;;  %v2612_v36 = vld [vmem:[#allocation2 + $0x1d8] sm:$0xff] }
 0x496   : > { %v2249_v15 = vmul.f32 %v5437_v46, %v2215_v63  ;;  %v2572_v63 = vld [vmem:[#allocation2 + $0x98] sm:$0xff] }
 0x497   : > { %v2269_v60 = vadd.f32 %v5442_v11, %v2250_v62 }
 0x498   : > { %v2268_v14 = vadd.f32 %v5442_v11, %v2249_v15  ;;  %v2576_v15 = vld [vmem:[#allocation2 + $0xb8] sm:$0xff] }
 0x499   : > { %v2281_v55 = vmax.f32 %v2269_v60, 0.0  ;;  %v2569_v60 = vld [vmem:[#allocation2 + $0x80] sm:$0xff] }
 0x49a   : > { %v2280_v6 = vmax.f32 %v2268_v14, 0.0  ;;  %v3930_v14 = vpack.c.bf16 %v2576_v15, %v2572_v63  ;;  %v2611_v63 = vld [vmem:[#allocation2 + $0x1d0] sm:$0xff] }
 0x49b   : > { %2310 = vrot.lane.b32.xlu0 %v2281_v55, %s4241_s26 }
 0x49c   : > { %2308 = vrot.lane.b32.xlu1 %v2280_v6, %s4241_s26 }
 0x4a4   : > { %v3751_v51 = vpop.f32.mrb[40].mxu0 }
 0x4a5   : > { %v2225_v53 = vpop.f32.mrb[41].mxu0  ;;  %v2252_v23 = vmul.f32 %v3751_v51, %v5437_v46  ;;  %v2575_v51 = vld [vmem:[#allocation2 + $0xb0] sm:$0xff] }
 0x4a6   : > { %v2251_v3 = vmul.f32 %v5437_v46, %v2225_v53  ;;  %v2554_v46 = vld [vmem:[#allocation2 + $0x8] sm:$0xff] }
 0x4a7   : > { %v2271_v8 = vadd.f32 %v5442_v11, %v2252_v23  ;;  %v2587_v23 = vld [vmem:[#allocation2 + $0x110] sm:$0xff] }
 0x4a8   : > { %v2270_v4 = vadd.f32 %v5442_v11, %v2251_v3  ;;  %v3842_v11 = vpack.c.bf16 %v2558_v24, %v2554_v46  ;;  %v2578_v3 = vld [vmem:[#allocation2 + $0xc8] sm:$0xff]  ;;  %v2593_v24 = vld [vmem:[#allocation2 + $0x140] sm:$0xff] }
 0x4a9   : > { %v2283_v25 = vmax.f32 %v2271_v8, 0.0  ;;  %v2591_v8 = vld [vmem:[#allocation2 + $0x130] sm:$0xff] }
 0x4aa   : > { %v2282_v16 = vmax.f32 %v2270_v4, 0.0  ;;  %3843 = vmatprep.subr.bf16.mxu0 %v3842_v11  ;;  %v2582_v4 = vld [vmem:[#allocation2 + $0xe8] sm:$0xff]  ;;  %v2595_v11 = vld [vmem:[#allocation2 + $0x150] sm:$0xff] }
 0x4ab   : > { %v3854_v57 = vpack.c.bf16 %v2582_v4, %v2578_v3 }
 0x4ac   : > { %2312 = vrot.lane.b32.xlu1 %v2282_v16, %s4241_s26 }
 0x4cd   : > { %v2295_v59 = vpop.permute.xlu0 %2294 }
 0x4ce   : > { %v2324_v34 = vsel %vm1509_vm7, %v2272_v56, %v2295_v59  ;;  %v2584_v56 = vld [vmem:[#allocation2 + $0xf8] sm:$0xff]  ;;  %v2577_v59 = vld [vmem:[#allocation2 + $0xc0] sm:$0xff] }
 0x4cf   : > { %2444 = vmatmul.mubr.f32.vlgmr.msra.gmra.mrb[28].mxu1 %v2324_v34  ;;  %v2581_v34 = vld [vmem:[#allocation2 + $0xe0] sm:$0xff] }
 0x4d0   : > { %3410 = vmatprep.mubr.msk.f32.mxu1 %vm1509_vm7, %v2275_v54 }
 0x4dd   : > { %v2299_v1 = vpop.permute.xlu0 %2298 }
 0x4de   : > { %v2297_v0 = vpop.permute.xlu1 %2296  ;;  %v2326_v9 = vsel %vm1509_vm7, %v2274_v31, %v2299_v1  ;;  %v3844_v31 = vpack.c.bf16 %v2557_v39, %v2553_v41  ;;  %v2583_v1 = vld [vmem:[#allocation2 + $0xf0] sm:$0xff]  ;;  %v2602_v39 = vld [vmem:[#allocation2 + $0x188] sm:$0xff] }
 0x4df   : > { %v2325_v45 = vsel %vm1509_vm7, %v2273_v27, %v2297_v0  ;;  %v2599_v41 = vld [vmem:[#allocation2 + $0x170] sm:$0xff] }
 0x4e0   : > { %2449 = vmatmul.mubr.f32.gmra.mrb[30].mxu1 %v2325_v45  ;;  %3845 = vmatpush1.bf16.msra.mxu0 %v3844_v31  ;;  %v2579_v45 = vld [vmem:[#allocation2 + $0xd0] sm:$0xff]  ;;  %v2604_v31 = vld [vmem:[#allocation2 + $0x198] sm:$0xff] }
 0x4e1   : > { %3411 = vmatprep.mubr.msk.f32.mxu1 %vm1509_vm7, %v2276_v22 }
 0x4e4   : > { %2454 = vmatmul.mubr.f32.gmra.mrb[32].mxu1 %v2326_v9  ;;  %v2586_v9 = vld [vmem:[#allocation2 + $0x108] sm:$0xff] }
 0x4e5   : > { %3412 = vmatprep.mubr.msk.f32.mxu1 %vm1509_vm7, %v2277_v19 }
 0x4ed   : > { %v2303_v20 = vpop.permute.xlu0 %2302 }
 0x4ee   : > { %v2301_v2 = vpop.permute.xlu1 %2300  ;;  %v2328_v5 = vsel %vm1509_vm7, %v2276_v22, %v2303_v20  ;;  %v3846_v22 = vpack.c.bf16 %v2566_v18, %v2562_v13  ;;  %v2592_v20 = vld [vmem:[#allocation2 + $0x138] sm:$0xff]  ;;  %v3944_v13 = vpack.c.bf16 %v2599_v41, %v2595_v11  ;;  %v2601_v18 = vld [vmem:[#allocation2 + $0x180] sm:$0xff]  ;;  %v2646_v11 = vld [vmem:[#allocation2 + $0x2e8] sm:$0xff] }
 0x4ef   : > { %v2327_v48 = vsel %vm1509_vm7, %v2275_v54, %v2301_v2  ;;  %v3922_v54 = vpack.c.bf16 %v2560_v43, %v2556_v10  ;;  %v2590_v2 = vld [vmem:[#allocation2 + $0x128] sm:$0xff]  ;;  %v2597_v10 = vld [vmem:[#allocation2 + $0x160] sm:$0xff]  ;;  %v2648_v41 = vld [vmem:[#allocation2 + $0x2f8] sm:$0xff] }
 0x4f0   : > { %2459 = vmatmul.mubr.f32.gmra.mrb[34].mxu1 %v2327_v48  ;;  %3847 = vmatprep.subr.bf16.mxu0 %v3846_v22  ;;  %v2588_v48 = vld [vmem:[#allocation2 + $0x118] sm:$0xff]  ;;  %v3864_v26 = vpack.c.bf16 %v2597_v10, %v2593_v24  ;;  %v3946_v22 = vpack.c.bf16 %v2608_v61, %v2604_v31  ;;  %v2639_v24 = vld [vmem:[#allocation2 + $0x2b0] sm:$0xff]  ;;  %v2642_v10 = vld [vmem:[#allocation2 + $0x2c8] sm:$0xff] }
 0x4f1   : > { %3413 = vmatprep.mubr.msk.f32.mxu1 %vm1509_vm7, %v2278_v49  ;;  %3923 = vmatprep.subr.bf16.mxu1 %v3922_v54  ;;  %v2606_v54 = vld [vmem:[#allocation2 + $0x1a8] sm:$0xff] }
 0x4f2   : > { %3925 = vmatpush1.bf16.msra.mxu1 %v3924_v17  ;;  %3849 = vmatpush1.bf16.msra.mxu0 %v3848_v29  ;;  %v3866_v17 = vpack.c.bf16 %v2606_v54, %v2602_v39  ;;  %v2616_v29 = vld [vmem:[#allocation2 + $0x1f8] sm:$0xff] }
 0x4f3   : > { %v3950_v15 = vpack.c.bf16 %v2616_v29, %v2612_v36 }
 0x4f4   : > { %2464 = vmatmul.mubr.f32.gmra.mrb[36].mxu1 %v2328_v5  ;;  %v3856_v5 = vpack.c.bf16 %v2581_v34, %v2577_v59  ;;  %v2623_v59 = vld [vmem:[#allocation2 + $0x230] sm:$0xff]  ;;  %v2626_v34 = vld [vmem:[#allocation2 + $0x248] sm:$0xff] }
 0x4f5   : > { %3414 = vmatprep.mubr.msk.f32.mxu1 %vm1509_vm7, %v2279_v47 }
 0x4fd   : > { %v2307_v7 = vpop.permute.xlu0 %2306 }
 0x4fe   : > { %v2305_v40 = vpop.permute.xlu1 %2304  ;;  %v2330_v37 = vsel %vm1509_vm7, %v2278_v49, %v2307_v7  ;;  %v2574_v49 = vld [vmem:[#allocation2 + $0xa8] sm:$0xff]  ;;  %v2585_v7 = vld [vmem:[#allocation2 + $0x100] sm:$0xff] }
 0x4ff   : > { %v2329_v35 = vsel %vm1509_vm7, %v2277_v19, %v2305_v40  ;;  %v2568_v19 = vld [vmem:[#allocation2 + $0x78] sm:$0xff]  ;;  %v3936_v40 = vpack.c.bf16 %v2583_v1, %v2579_v45 }
 0x500   : > { %2469 = vmatmul.mubr.f32.gmra.mrb[38].mxu1 %v2329_v35  ;;  %v3926_v42 = vpack.c.bf16 %v2568_v19, %v2564_v30  ;;  %v3858_v35 = vpack.c.bf16 %v2590_v2, %v2586_v9  ;;  %v2605_v30 = vld [vmem:[#allocation2 + $0x1a0] sm:$0xff]  ;;  %v2603_v19 = vld [vmem:[#allocation2 + $0x190] sm:$0xff]  ;;  %v2628_v45 = vld [vmem:[#allocation2 + $0x258] sm:$0xff] }
 0x501   : > { %3415 = vmatprep.mubr.msk.f32.mxu1 %vm1509_vm7, %v2280_v6  ;;  %v3868_v50 = vpack.c.bf16 %v2605_v30, %v2601_v18  ;;  %v2632_v1 = vld [vmem:[#allocation2 + $0x278] sm:$0xff]  ;;  %v2643_v18 = vld [vmem:[#allocation2 + $0x2d0] sm:$0xff] }
 0x502   : > { %3927 = vmatprep.subr.bf16.mxu1 %v3926_v42  ;;  %v2607_v42 = vld [vmem:[#allocation2 + $0x1b0] sm:$0xff] }
 0x503   : > { %3929 = vmatpush1.bf16.msra.mxu1 %v3928_v58  ;;  %v2609_v58 = vld [vmem:[#allocation2 + $0x1c0] sm:$0xff] }
 0x504   : > { %2474 = vmatmul.mubr.f32.gmra.mrb[40].mxu1 %v2330_v37  ;;  %3931 = vmatprep.subr.bf16.mxu1 %v3930_v14  ;;  %v2589_v37 = vld [vmem:[#allocation2 + $0x120] sm:$0xff]  ;;  %v2618_v14 = vld [vmem:[#allocation2 + $0x208] sm:$0xff] }
 0x505   : > { %3416 = vmatprep.mubr.msk.f32.mxu1 %vm1509_vm7, %v2281_v55 }
 0x50d   : > { %v2311_v33 = vpop.permute.xlu0 %2310 }
 0x50e   : > { %v2309_v38 = vpop.permute.xlu1 %2308  ;;  %v2332_v28 = vsel %vm1509_vm7, %v2280_v6, %v2311_v33  ;;  %v2571_v6 = vld [vmem:[#allocation2 + $0x90] sm:$0xff]  ;;  %v2598_v33 = vld [vmem:[#allocation2 + $0x168] sm:$0xff] }
 0x50f   : > { %v2331_v32 = vsel %vm1509_vm7, %v2279_v47, %v2309_v38  ;;  %v2570_v47 = vld [vmem:[#allocation2 + $0x88] sm:$0xff]  ;;  %v3932_v21 = vpack.c.bf16 %v2575_v51, %v2571_v6  ;;  %v3938_v38 = vpack.c.bf16 %v2592_v20, %v2588_v48  ;;  %v2620_v6 = vld [vmem:[#allocation2 + $0x218] sm:$0xff]  ;;  %v2625_v20 = vld [vmem:[#allocation2 + $0x240] sm:$0xff] }
 0x510   : > { %2479 = vmatmul.mubr.f32.gmra.mrb[42].mxu1 %v2331_v32  ;;  %v3850_v62 = vpack.c.bf16 %v2574_v49, %v2570_v47  ;;  %v2594_v32 = vld [vmem:[#allocation2 + $0x148] sm:$0xff]  ;;  %v3948_v47 = vpack.c.bf16 %v2607_v42, %v2603_v19  ;;  %v3870_v49 = vpack.c.bf16 %v2614_v52, %v2610_v44  ;;  %v2624_v51 = vld [vmem:[#allocation2 + $0x238] sm:$0xff]  ;;  %v2647_v19 = vld [vmem:[#allocation2 + $0x2f0] sm:$0xff] }
 0x511   : > { %3417 = vmatprep.mubr.msk.f32.mxu1 %vm1509_vm7, %v2282_v16  ;;  %v2580_v16 = vld [vmem:[#allocation2 + $0xd8] sm:$0xff]  ;;  %3933 = vmatpush1.bf16.msra.mxu1 %v3932_v21  ;;  %v3862_v46 = vpack.c.bf16 %v2598_v33, %v2594_v32  ;;  %v2621_v21 = vld [vmem:[#allocation2 + $0x220] sm:$0xff]  ;;  %v2654_v42 = vld [vmem:[#allocation2 + $0x328] sm:$0xff]  ;;  %v3968_v29 = vpack.c.bf16 %v2647_v19, %v2643_v18 }
 0x512   : > { %3851 = vmatprep.subr.bf16.mxu0 %v3850_v62  ;;  %v3934_v0 = vpack.c.bf16 %v2584_v56, %v2580_v16  ;;  %v2613_v62 = vld [vmem:[#allocation2 + $0x1e0] sm:$0xff]  ;;  %v3954_v56 = vpack.c.bf16 %v2624_v51, %v2620_v6  ;;  %v2652_v44 = vld [vmem:[#allocation2 + $0x318] sm:$0xff] }
 0x513   : > { %v2617_v16 = vld [vmem:[#allocation2 + $0x200] sm:$0xff]  ;;  %v2656_v52 = vld [vmem:[#allocation2 + $0x338] sm:$0xff] }
 0x514   : > { %2484 = vmatmul.mubr.f32.gmra.mrb[44].mxu1 %v2332_v28  ;;  %3935 = vmatprep.subr.bf16.mxu1 %v3934_v0  ;;  %v2600_v28 = vld [vmem:[#allocation2 + $0x178] sm:$0xff]  ;;  %v2630_v0 = vld [vmem:[#allocation2 + $0x268] sm:$0xff]  ;;  %v3876_v9 = vpack.c.bf16 %v2621_v21, %v2617_v16  ;;  %v2659_v16 = vld [vmem:[#allocation2 + $0x350] sm:$0xff] }
 0x515   : > { %3418 = vmatprep.mubr.msk.f32.mxu1 %vm1509_vm7, %v2283_v25  ;;  %v2596_v25 = vld [vmem:[#allocation2 + $0x158] sm:$0xff]  ;;  %3937 = vmatpush1.bf16.msra.mxu1 %v3936_v40  ;;  %v3878_v48 = vpack.c.bf16 %v2630_v0, %v2626_v34  ;;  %v2627_v40 = vld [vmem:[#allocation2 + $0x250] sm:$0xff]  ;;  %v5501_v34 = vld [vmem:[%s5796_s11] ss:$0 sm:$0xff] }
 0x516   : > { %3939 = vmatprep.subr.bf16.mxu1 %v3938_v38  ;;  %v3942_v43 = vpack.c.bf16 %v2600_v28, %v2596_v25  ;;  %v2636_v38 = vld [vmem:[#allocation2 + $0x298] sm:$0xff]  ;;  %v2633_v28 = vld [vmem:[#allocation2 + $0x280] sm:$0xff] }
 0x517   : > { %v2668_v0 = vld [vmem:[#allocation2 + $0x398] sm:$0xff] }
 0x51e   : > { %v2313_v27 = vpop.permute.xlu1 %2312 }
 0x51f   : > { %v2333_v12 = vsel %vm1509_vm7, %v2281_v55, %v2313_v27  ;;  %v2573_v55 = vld [vmem:[#allocation2 + $0xa0] sm:$0xff]  ;;  %v3860_v27 = vpack.c.bf16 %v2589_v37, %v2585_v7  ;;  %v2631_v7 = vld [vmem:[#allocation2 + $0x270] sm:$0xff]  ;;  %v2634_v37 = vld [vmem:[#allocation2 + $0x288] sm:$0xff] }
 0x520   : > { %2489 = vmatmul.mubr.f32.gmra.mrb[46].mxu1 %v2333_v12  ;;  %v3852_v53 = vpack.c.bf16 %v2573_v55, %v2569_v60  ;;  %v3940_v12 = vpack.c.bf16 %v2591_v8, %v2587_v23  ;;  %v2615_v60 = vld [vmem:[#allocation2 + $0x1f0] sm:$0xff]  ;;  %v2622_v55 = vld [vmem:[#allocation2 + $0x228] sm:$0xff]  ;;  %v2640_v8 = vld [vmem:[#allocation2 + $0x2b8] sm:$0xff]  ;;  %v3960_v33 = vpack.c.bf16 %v2631_v7, %v2627_v40 }
 0x521   : > { %v3952_v3 = vpack.c.bf16 %v2615_v60, %v2611_v63  ;;  %v3874_v4 = vpack.c.bf16 %v2622_v55, %v2618_v14  ;;  %v2638_v23 = vld [vmem:[#allocation2 + $0x2a8] sm:$0xff]  ;;  %v2655_v63 = vld [vmem:[#allocation2 + $0x330] sm:$0xff]  ;;  %v2660_v14 = vld [vmem:[#allocation2 + $0x358] sm:$0xff] }
 0x522   : > { %3853 = vmatpush1.bf16.msra.mxu0 %v3852_v53  ;;  %3941 = vmatpush1.bf16.msra.mxu1 %v3940_v12  ;;  %v3872_v53 = vpack.c.bf16 %v2613_v62, %v2609_v58  ;;  %v3882_v25 = vpack.c.bf16 %v2638_v23, %v2634_v37  ;;  %v2635_v12 = vld [vmem:[#allocation2 + $0x290] sm:$0xff]  ;;  %v3970_v62 = vpack.c.bf16 %v2656_v52, %v2652_v44  ;;  %v2662_v60 = vld [vmem:[#allocation2 + $0x368] sm:$0xff]  ;;  %v2664_v55 = vld [vmem:[#allocation2 + $0x378] sm:$0xff] }
 0x523   : > { %3855 = vmatprep.subr.bf16.mxu0 %v3854_v57  ;;  %3943 = vmatprep.subr.bf16.mxu1 %v3942_v43  ;;  %v2619_v57 = vld [vmem:[#allocation2 + $0x210] sm:$0xff]  ;;  %v2644_v43 = vld [vmem:[#allocation2 + $0x2d8] sm:$0xff]  ;;  %v3964_v61 = vpack.c.bf16 %v2639_v24, %v2635_v12  ;;  %v3974_v21 = vpack.c.bf16 %v2664_v55, %v2660_v14  ;;  %v2674_v37 = vld [vmem:[#allocation2 + $0x3c8] sm:$0xff] }
 0x524   : > { %v3956_v2 = vpack.c.bf16 %v2623_v59, %v2619_v57  ;;  %v3966_v30 = vpack.c.bf16 %v2648_v41, %v2644_v43  ;;  %v2651_v58 = vld [vmem:[#allocation2 + $0x310] sm:$0xff]  ;;  %v2670_v59 = vld [vmem:[#allocation2 + $0x3a8] sm:$0xff]  ;;  %v2673_v55 = vld [vmem:[#allocation2 + $0x3c0] sm:$0xff] }
 0x525   : > { %v3972_v51 = vpack.c.bf16 %v2655_v63, %v2651_v58  ;;  %v2663_v57 = vld [vmem:[#allocation2 + $0x370] sm:$0xff]  ;;  %v2678_v23 = vld [vmem:[#allocation2 + $0x3e8] sm:$0xff] }
 0x526   : > { %3857 = vmatpush1.bf16.msra.mxu0 %v3856_v5  ;;  %3945 = vmatpush1.bf16.msra.mxu1 %v3944_v13  ;;  %v2629_v5 = vld [vmem:[#allocation2 + $0x260] sm:$0xff]  ;;  %v2671_v7 = vld [vmem:[#allocation2 + $0x3b0] sm:$0xff] }
 0x527   : > { %3859 = vmatprep.subr.bf16.mxu0 %v3858_v35  ;;  %3947 = vmatprep.subr.bf16.mxu1 %v3946_v22  ;;  %v3958_v35 = vpack.c.bf16 %v2632_v1, %v2628_v45  ;;  %v3880_v32 = vpack.c.bf16 %v2629_v5, %v2625_v20  ;;  %v2641_v13 = vld [vmem:[#allocation2 + $0x2c0] sm:$0xff]  ;;  %v2650_v22 = vld [vmem:[#allocation2 + $0x308] sm:$0xff]  ;;  %v2672_v45 = vld [vmem:[#allocation2 + $0x3b8] sm:$0xff] }
 0x528   : > { %v2669_v20 = vld [vmem:[#allocation2 + $0x3a0] sm:$0xff]  ;;  %v2667_v5 = vld [vmem:[#allocation2 + $0x390] sm:$0xff] }
 0x52a   : > { %3861 = vmatpush1.bf16.msra.mxu0 %v3860_v27  ;;  %3949 = vmatpush1.bf16.msra.mxu1 %v3948_v47  ;;  %v2637_v27 = vld [vmem:[#allocation2 + $0x2a0] sm:$0xff] }
 0x52b   : > { %3863 = vmatprep.subr.bf16.mxu0 %v3862_v46  ;;  %3951 = vmatprep.subr.bf16.mxu1 %v3950_v15  ;;  %v3962_v46 = vpack.c.bf16 %v2640_v8, %v2636_v38  ;;  %v3884_v54 = vpack.c.bf16 %v2637_v27, %v2633_v28  ;;  %v2649_v47 = vld [vmem:[#allocation2 + $0x300] sm:$0xff]  ;;  %v2658_v15 = vld [vmem:[#allocation2 + $0x348] sm:$0xff]  ;;  %v2676_v8 = vld [vmem:[#allocation2 + $0x3d8] sm:$0xff]  ;;  %v3980_v28 = vpack.c.bf16 %v2671_v7, %v2667_v5 }
 0x52c   : > { %v5507_v38 = vld [vmem:[%s5797_s12] ss:$0 sm:$0xff]  ;;  %v3902_v27 = vpack.c.bf16 %v2678_v23, %v2674_v37 }
 0x52e   : > { %3865 = vmatpush1.bf16.msra.mxu0 %v3864_v26  ;;  %3953 = vmatpush1.bf16.msra.mxu1 %v3952_v3  ;;  %v3886_v26 = vpack.c.bf16 %v2646_v11, %v2642_v10  ;;  %v2657_v3 = vld [vmem:[#allocation2 + $0x340] sm:$0xff] }
 0x52f   : > { %3867 = vmatprep.subr.bf16.mxu0 %v3866_v17  ;;  %3955 = vmatprep.subr.bf16.mxu1 %v3954_v56  ;;  %v2645_v17 = vld [vmem:[#allocation2 + $0x2e0] sm:$0xff]  ;;  %v2666_v56 = vld [vmem:[#allocation2 + $0x388] sm:$0xff] }
 0x530   : > { %v3888_v36 = vpack.c.bf16 %v2645_v17, %v2641_v13 }
 0x532   : > { %3869 = vmatpush1.bf16.msra.mxu0 %v3868_v50  ;;  %3957 = vmatpush1.bf16.msra.mxu1 %v3956_v2  ;;  %v3890_v50 = vpack.c.bf16 %v2654_v42, %v2650_v22  ;;  %v3898_v2 = vpack.c.bf16 %v2670_v59, %v2666_v56  ;;  %v2684_v56 = vld [vmem:[#allocation2 + $0x418] sm:$0xff] }
 0x533   : > { %3871 = vmatprep.subr.bf16.mxu0 %v3870_v49  ;;  %3959 = vmatprep.subr.bf16.mxu1 %v3958_v35  ;;  %v2653_v49 = vld [vmem:[#allocation2 + $0x320] sm:$0xff]  ;;  %v3978_v35 = vpack.c.bf16 %v2672_v45, %v2668_v0  ;;  %v2688_v0 = vld [vmem:[#allocation2 + $0x438] sm:$0xff] }
 0x534   : > { %v3892_v6 = vpack.c.bf16 %v2653_v49, %v2649_v47 }
 0x536   : > { %3873 = vmatpush1.bf16.msra.mxu0 %v3872_v53  ;;  %3961 = vmatpush1.bf16.msra.mxu1 %v3960_v33  ;;  %v3894_v53 = vpack.c.bf16 %v2662_v60, %v2658_v15 }
 0x537   : > { %3875 = vmatprep.subr.bf16.mxu0 %v3874_v4  ;;  %3963 = vmatprep.subr.bf16.mxu1 %v3962_v46  ;;  %v2661_v4 = vld [vmem:[#allocation2 + $0x360] sm:$0xff] }
 0x538   : > { %v3896_v1 = vpack.c.bf16 %v2661_v4, %v2657_v3  ;;  %v2679_v3 = vld [vmem:[#allocation2 + $0x3f0] sm:$0xff] }
 0x53a   : > { %3877 = vmatpush1.bf16.msra.mxu0 %v3876_v9  ;;  %3965 = vmatpush1.bf16.msra.mxu1 %v3964_v61  ;;  %v3976_v9 = vpack.c.bf16 %v2663_v57, %v2659_v16  ;;  %v2686_v57 = vld [vmem:[#allocation2 + $0x428] sm:$0xff] }
 0x53b   : > { %3879 = vmatprep.subr.bf16.mxu0 %v3878_v48  ;;  %3967 = vmatprep.subr.bf16.mxu1 %v3966_v30  ;;  %v2665_v48 = vld [vmem:[#allocation2 + $0x380] sm:$0xff] }
 0x53c   : > { %v3900_v33 = vpack.c.bf16 %v2669_v20, %v2665_v48 }
 0x53e   : > { %3881 = vmatpush1.bf16.msra.mxu0 %v3880_v32  ;;  %3969 = vmatpush1.bf16.msra.mxu1 %v3968_v29  ;;  %v2680_v32 = vld [vmem:[#allocation2 + $0x3f8] sm:$0xff] }
 0x53f   : > { %3883 = vmatprep.subr.bf16.mxu0 %v3882_v25  ;;  %3971 = vmatprep.subr.bf16.mxu1 %v3970_v62  ;;  %v3982_v10 = vpack.c.bf16 %v2680_v32, %v2676_v8 }
 0x542   : > { %3885 = vmatpush1.bf16.msra.mxu0 %v3884_v54  ;;  %3973 = vmatpush1.bf16.msra.mxu1 %v3972_v51  ;;  %v2675_v51 = vld [vmem:[#allocation2 + $0x3d0] sm:$0xff] }
 0x543   : > { %3887 = vmatprep.subr.bf16.mxu0 %v3886_v26  ;;  %3975 = vmatprep.subr.bf16.mxu1 %v3974_v21  ;;  %v3984_v16 = vpack.c.bf16 %v2679_v3, %v2675_v51  ;;  %v2682_v21 = vld [vmem:[#allocation2 + $0x408] sm:$0xff]  ;;  %v2708_v3 = vld [vmem:[#allocation2 + $0x4d8] sm:$0xff] }
 0x544   : > { %v3906_v59 = vpack.c.bf16 %v2686_v57, %v2682_v21  ;;  %v2706_v51 = vld [vmem:[#allocation2 + $0x4c8] sm:$0xff] }
 0x546   : > { %3889 = vmatpush1.bf16.msra.mxu0 %v3888_v36  ;;  %3977 = vmatpush1.bf16.msra.mxu1 %v3976_v9 }
 0x547   : > { %3891 = vmatprep.subr.bf16.mxu0 %v3890_v50  ;;  %3979 = vmatprep.subr.bf16.mxu1 %v3978_v35 }
 0x54a   : > { %3893 = vmatpush1.bf16.msra.mxu0 %v3892_v6  ;;  %3981 = vmatpush1.bf16.msra.mxu1 %v3980_v28  ;;  %v2677_v6 = vld [vmem:[#allocation2 + $0x3e0] sm:$0xff] }
 0x54b   : > { %3895 = vmatprep.subr.bf16.mxu0 %v3894_v53  ;;  %3983 = vmatprep.subr.bf16.mxu1 %v3982_v10  ;;  %v3904_v53 = vpack.c.bf16 %v2677_v6, %v2673_v55  ;;  %v2681_v10 = vld [vmem:[#allocation2 + $0x400] sm:$0xff]  ;;  %v2699_v55 = vld [vmem:[#allocation2 + $0x490] sm:$0xff] }
 0x54c   : > { %v2703_v6 = vld [vmem:[#allocation2 + $0x4b0] sm:$0xff] }
 0x54d   : > { %v3996_v57 = vpack.c.bf16 %v2703_v6, %v2699_v55  ;;  %v3051_v55 = vld [vmem:[%s5800_s15 + $0xc8] sm:$0xff]  ;;  %v3082_v6 = vld [vmem:[%s5800_s15 + $0x1c0] sm:$0xff] }
 0x54e   : > { %3897 = vmatpush1.bf16.msra.mxu0 %v3896_v1  ;;  %3985 = vmatpush1.bf16.msra.mxu1 %v3984_v16  ;;  %v3986_v1 = vpack.c.bf16 %v2688_v0, %v2684_v56  ;;  %v4243_v16 = vmov 0.0   ;;  %v2705_v56 = vld [vmem:[#allocation2 + $0x4c0] sm:$0xff] }
 0x54f   : > { %3899 = vmatprep.subr.bf16.mxu0 %v3898_v2 }
 0x550   : > { %3987 = vmatprep.subr.bf16.mxu1 %v3986_v1  ;;  %v2707_v1 = vld [vmem:[#allocation2 + $0x4d0] sm:$0xff] }
 0x552   : > { %3901 = vmatpush1.bf16.msra.mxu0 %v3900_v33 }
 0x553   : > { %3903 = vmatprep.subr.bf16.mxu0 %v3902_v27 }
 0x556   : > { %3905 = vmatpush1.bf16.msra.mxu0 %v3904_v53  ;;  %v2710_v53 = vld [vmem:[#allocation2 + $0x4e8] sm:$0xff] }
 0x557   : > { %3907 = vmatprep.subr.bf16.mxu0 %v3906_v59  ;;  %v2709_v59 = vld [vmem:[#allocation2 + $0x4e0] sm:$0xff]  ;;  %v3918_v0 = vpack.c.bf16 %v2710_v53, %v2706_v51  ;;  %v3083_v51 = vld [vmem:[%s5800_s15 + $0x1c8] sm:$0xff] }
 0x5a2   : > { %v2445_v39 = vpop.f32.mrb[28].mxu1 }
 0x5a3   : > { %v2447_v31 = vpop.f32.mrb[29].mxu1  ;;  %v2501_v40 = vmul.f32 %v5501_v34, %v2445_v39 }
 0x5a5   : > { %v2518_v12 = vadd.f32 %v5507_v38, %v2501_v40 }
 0x5a7   : > { %v2528_v41 = vmax.f32 %v2518_v12, 0.0 }
 0x5b3   : > { %v2450_v25 = vpop.f32.mrb[30].mxu1 }
 0x5b4   : > { %v2502_v46 = vmul.f32 %v5501_v34, %v2450_v25  ;;  %v2452_v24 = vpop.f32.mrb[31].mxu1 }
 0x5b6   : > { %v2519_v11 = vadd.f32 %v5507_v38, %v2502_v46 }
 0x5b7   : > { %v2455_v43 = vpop.f32.mrb[32].mxu1 }
 0x5b8   : > { %v2529_v39 = vmax.f32 %v2519_v11, 0.0  ;;  %v2457_v54 = vpop.f32.mrb[33].mxu1  ;;  %v2503_v61 = vmul.f32 %v5501_v34, %v2455_v43  ;;  %v2685_v11 = vld [vmem:[#allocation2 + $0x420] sm:$0xff]  ;;  %v2683_v43 = vld [vmem:[#allocation2 + $0x410] sm:$0xff] }
 0x5ba   : > { %v5512_v31 = vmax.f32 %v2528_v41, %v2529_v39  ;;  %v2520_v13 = vadd.f32 %v5507_v38, %v2503_v61  ;;  %v2687_v41 = vld [vmem:[#allocation2 + $0x430] sm:$0xff]  ;;  %v2690_v39 = vld [vmem:[#allocation2 + $0x448] sm:$0xff] }
 0x5bb   : > { %v2694_v61 = vld [vmem:[#allocation2 + $0x468] sm:$0xff] }
 0x5bc   : > { %v2530_v22 = vmax.f32 %v2520_v13, 0.0  ;;  %v2696_v13 = vld [vmem:[#allocation2 + $0x478] sm:$0xff] }
 0x5c3   : > { %v2460_v26 = vpop.f32.mrb[34].mxu1 }
 0x5c4   : > { %v2504_v17 = vmul.f32 %v5501_v34, %v2460_v26  ;;  %v2462_v18 = vpop.f32.mrb[35].mxu1  ;;  %v2692_v26 = vld [vmem:[#allocation2 + $0x458] sm:$0xff] }
 0x5c6   : > { %v2521_v30 = vadd.f32 %v5507_v38, %v2504_v17 }
 0x5c7   : > { %v2465_v19 = vpop.f32.mrb[36].mxu1 }
 0x5c8   : > { %v2531_v42 = vmax.f32 %v2521_v30, 0.0  ;;  %v2467_v44 = vpop.f32.mrb[37].mxu1  ;;  %v2505_v36 = vmul.f32 %v5501_v34, %v2465_v19  ;;  %v3908_v30 = vpack.c.bf16 %v2685_v11, %v2681_v10  ;;  %v2689_v19 = vld [vmem:[#allocation2 + $0x440] sm:$0xff]  ;;  %v3028_v11 = vld [vmem:[%s5800_s15 + $0x10] sm:$0xff] }
 0x5c9   : > { %v3910_v44 = vpack.c.bf16 %v2694_v61, %v2690_v39  ;;  %v3061_v61 = vld [vmem:[%s5800_s15 + $0x118] sm:$0xff] }
 0x5ca   : > { %v2539_v52 = vmax.f32 %v2530_v22, %v2531_v42  ;;  %v2522_v50 = vadd.f32 %v5507_v38, %v2505_v36  ;;  %v2693_v22 = vld [vmem:[#allocation2 + $0x460] sm:$0xff]  ;;  %v2691_v36 = vld [vmem:[#allocation2 + $0x450] sm:$0xff] }
 0x5cc   : > { %v2532_v63 = vmax.f32 %v2522_v50, 0.0  ;;  %v2698_v50 = vld [vmem:[#allocation2 + $0x488] sm:$0xff] }
 0x5d3   : > { %v2470_v29 = vpop.f32.mrb[38].mxu1 }
 0x5d4   : > { %v2506_v47 = vmul.f32 %v5501_v34, %v2470_v29  ;;  %v2472_v49 = vpop.f32.mrb[39].mxu1  ;;  %v2695_v29 = vld [vmem:[#allocation2 + $0x470] sm:$0xff] }
 0x5d5   : > { %v2700_v49 = vld [vmem:[#allocation2 + $0x498] sm:$0xff] }
 0x5d6   : > { %v2523_v58 = vadd.f32 %v5507_v38, %v2506_v47  ;;  %v2702_v47 = vld [vmem:[#allocation2 + $0x4a8] sm:$0xff] }
 0x5d7   : > { %v2475_v62 = vpop.f32.mrb[40].mxu1 }
 0x5d8   : > { %v2533_v15 = vmax.f32 %v2523_v58, 0.0  ;;  %v2477_v60 = vpop.f32.mrb[41].mxu1  ;;  %v2507_v4 = vmul.f32 %v5501_v34, %v2475_v62  ;;  %v2704_v58 = vld [vmem:[#allocation2 + $0x4b8] sm:$0xff]  ;;  %v3912_v62 = vpack.c.bf16 %v2693_v22, %v2689_v19  ;;  %v3030_v19 = vld [vmem:[%s5800_s15 + $0x20] sm:$0xff]  ;;  %v3031_v22 = vld [vmem:[%s5800_s15 + $0x28] sm:$0xff] }
 0x5d9   : > { %v3914_v60 = vpack.c.bf16 %v2702_v47, %v2698_v50  ;;  %v3081_v50 = vld [vmem:[%s5800_s15 + $0x1b8] sm:$0xff]  ;;  %v4012_v47 = vpack.c.bf16 %v3031_v22, %v3030_v19  ;;  %v3072_v22 = vld [vmem:[%s5800_s15 + $0x170] sm:$0xff] }
 0x5da   : > { %v2540_v14 = vmax.f32 %v2532_v63, %v2533_v15  ;;  %v2524_v9 = vadd.f32 %v5507_v38, %v2507_v4  ;;  %v3992_v63 = vpack.c.bf16 %v2695_v29, %v2691_v36  ;;  %v2697_v15 = vld [vmem:[#allocation2 + $0x480] sm:$0xff]  ;;  %v2712_v4 = vld [vmem:[#allocation2 + $0x4f8] sm:$0xff]  ;;  %v3080_v29 = vld [vmem:[%s5800_s15 + $0x1b0] sm:$0xff] }
 0x5db   : > { %v3049_v36 = vld [vmem:[%s5800_s15 + $0xb8] sm:$0xff] }
 0x5dc   : > { %v2534_v40 = vmax.f32 %v2524_v9, 0.0  ;;  %v2711_v9 = vld [vmem:[#allocation2 + $0x4f0] sm:$0xff] }
 0x5e3   : > { %v2480_v45 = vpop.f32.mrb[42].mxu1 }
 0x5e4   : > { %v2508_v2 = vmul.f32 %v5501_v34, %v2480_v45  ;;  %v2482_v48 = vpop.f32.mrb[43].mxu1  ;;  %v3998_v45 = vpack.c.bf16 %v2712_v4, %v2708_v3  ;;  %v3034_v4 = vld [vmem:[%s5800_s15 + $0x40] sm:$0xff] }
 0x5e5   : > { %v3043_v48 = vld [vmem:[%s5800_s15 + $0x88] sm:$0xff] }
 0x5e6   : > { %v2525_v20 = vadd.f32 %v5507_v38, %v2508_v2  ;;  %v3042_v2 = vld [vmem:[%s5800_s15 + $0x80] sm:$0xff] }
 0x5e7   : > { %v2485_v5 = vpop.f32.mrb[44].mxu1 }
 0x5e8   : > { %v2535_v35 = vmax.f32 %v2525_v20, 0.0  ;;  %v2487_v7 = vpop.f32.mrb[45].mxu1  ;;  %v2509_v8 = vmul.f32 %v5501_v34, %v2485_v5  ;;  %v3074_v20 = vld [vmem:[%s5800_s15 + $0x180] sm:$0xff]  ;;  %v3075_v5 = vld [vmem:[%s5800_s15 + $0x188] sm:$0xff] }
 0x5e9   : > { %v3026_v7 = vld [vmem:[%s5800_s15] sm:$0xff] }
 0x5ea   : > { %v2541_v37 = vmax.f32 %v2534_v40, %v2535_v35  ;;  %v2526_v33 = vadd.f32 %v5507_v38, %v2509_v8  ;;  %v3920_v40 = vpack.c.bf16 %v2709_v59, %v2705_v56  ;;  %v4000_v35 = vpack.c.bf16 %v2711_v9, %v2707_v1  ;;  %v3066_v56 = vld [vmem:[%s5800_s15 + $0x140] sm:$0xff]  ;;  %v3067_v59 = vld [vmem:[%s5800_s15 + $0x148] sm:$0xff]  ;;  %v3084_v1 = vld [vmem:[%s5800_s15 + $0x1d0] sm:$0xff] }
 0x5eb   : > { %v4034_v8 = vpack.c.bf16 %v3075_v5, %v3074_v20  ;;  %v3085_v9 = vld [vmem:[%s5800_s15 + $0x1d8] sm:$0xff]  ;;  %v3036_v20 = vld [vmem:[%s5800_s15 + $0x50] sm:$0xff] }
 0x5ec   : > { %v4133_v23 = vpack.i.bf16 %v2539_v52, %v2541_v37  ;;  %v2536_v12 = vmax.f32 %v2526_v33, 0.0  ;;  %v3990_v52 = vpack.c.bf16 %v2696_v13, %v2692_v26  ;;  %v3027_v37 = vld [vmem:[%s5800_s15 + $0x8] sm:$0xff]  ;;  %v3046_v26 = vld [vmem:[%s5800_s15 + $0xa0] sm:$0xff]  ;;  %v3037_v5 = vld [vmem:[%s5800_s15 + $0x58] sm:$0xff] }
 0x5ed   : > { %v3059_v33 = vld [vmem:[%s5800_s15 + $0x108] sm:$0xff] }
 0x5ee   : > { %4134 = vrot.lane.b32.xlu0 %v4133_v23, %s4241_s26  ;;  %v4002_v23 = vpack.c.bf16 %v3043_v48, %v3042_v2  ;;  %v3047_v13 = vld [vmem:[%s5800_s15 + $0xa8] sm:$0xff]  ;;  %v4052_v48 = vpack.c.bf16 %v3067_v59, %v3066_v56  ;;  %s3329_s26 = sshll.u32 %s554_s20, 3  ;;  %v3423_v59 = vld [vmem:[%s5801_s16] ss:$0 sm:$0xff] }
 0x5ef   : > { %s556_s0 = scalar_lea.vmem [#allocation5], %s3329_s26  ;;  %s4170_s26 = sshll.u32 %s4244_s28, 4  ;;  %s4171_s26 = int_to_ptr.vmem [resolvable:$false] %s4170_s26 }
 0x5f0   : > { %s3252_s23 = sshll.u32 %s556_s0, 4  ;;  %s4172_s29 = scalar_lea.vmem %s4171_s26, 256  ;;  %s5745_s23 = int_to_ptr.vmem [resolvable:$true] %s3252_s23 }
 0x5f1   : > { %s4166_s19 = scalar_lea.vmem %s5745_s23, 128  ;;  %p4173_p2 = scmp.lt.s32.totalorder %s5745_s23, %s4171_s26 }
 0x5f2   : > { %p4167_p6 = scmp.ne.s32.totalorder %s5745_s23, %s4166_s19  ;;  %p4174_p3 = scmp.lt.s32.totalorder %s4172_s29, %s4166_s19 }
 0x5f3   : > { %v2490_v32 = vpop.f32.mrb[46].mxu1 }
 0x5f4   : > { %v2510_v25 = vmul.f32 %v5501_v34, %v2490_v32  ;;  %v2492_v28 = vpop.f32.mrb[47].mxu1  ;;  %v3988_v34 = vpack.c.bf16 %v2687_v41, %v2683_v43  ;;  %v3058_v32 = vld [vmem:[%s5800_s15 + $0x100] sm:$0xff]  ;;  %v3029_v43 = vld [vmem:[%s5800_s15 + $0x18] sm:$0xff]  ;;  %p4168_p10 = pnand %p4167_p6, %p5832_p9  ;;  %p4175_p4 = por %p4174_p3, %p4173_p2 }
 0x5f5   : > { %v3045_v28 = vld [vmem:[%s5800_s15 + $0x98] sm:$0xff]  ;;  %v4036_v10 = vpack.c.bf16 %v3059_v33, %v3058_v32  ;;  %v3086_v32 = vld [vmem:[%s5800_s15 + $0x1e0] sm:$0xff]  ;;  %v3087_v33 = vld [vmem:[%s5800_s15 + $0x1e8] sm:$0xff] }
 0x5f6   : > { %v2527_v27 = vadd.f32 %v5507_v38, %v2510_v25  ;;  %v3044_v25 = vld [vmem:[%s5800_s15 + $0x90] sm:$0xff]  ;;  %p4169_p12 = pneg %p4168_p10 }
 0x5f7   : > { %v4006_v41 = vpack.c.bf16 %v3045_v28, %v3044_v25  ;;  %v4024_v25 = vpack.c.bf16 %v3037_v5, %v3036_v20 }
 0x5f8   : > { %v2537_v46 = vmax.f32 %v2527_v27, 0.0  ;;  %v3076_v27 = vld [vmem:[%s5800_s15 + $0x190] sm:$0xff]  ;;  %p4176_p7 = pnand %p4175_p4, %p4169_p12 }
 0x5fa   : > { %v5531_v24 = vmax.f32 %v2536_v12, %v2537_v46  ;;  %v3077_v12 = vld [vmem:[%s5800_s15 + $0x198] sm:$0xff]  ;;  %v4004_v46 = vpack.c.bf16 %v3027_v37, %v3026_v7  ;;  %v3068_v7 = vld [vmem:[%s5800_s15 + $0x150] sm:$0xff] }
 0x5fb   : > { %v4038_v39 = vpack.c.bf16 %v3077_v12, %v3076_v27  ;;  %v3069_v37 = vld [vmem:[%s5800_s15 + $0x158] sm:$0xff]  ;;  %v4058_v12 = vpack.c.bf16 %v3087_v33, %v3086_v32 }
 0x5fc   : > { %v4056_v28 = vpack.c.bf16 %v3069_v37, %v3068_v7 }
 0x660   : > { %v4135_v54 = vpop.permute.xlu0 %4134 }
 0x661   : > { %v4137_v17 = vunpack.i.h.bf16 %v4135_v54  ;;  %v4136_v18 = vunpack.i.l.bf16 %v4135_v54  ;;  %v3060_v54 = vld [vmem:[%s5800_s15 + $0x110] sm:$0xff] }
 0x663   : > { %v2551_v38 = vsel %vm1509_vm7, %v5512_v31, %v4137_v17  ;;  %v2552_v42 = vsel %vm1509_vm7, %v2540_v14, %v4136_v18  ;;  %v2701_v31 = vld [vmem:[#allocation2 + $0x4a0] sm:$0xff]  ;;  %v3994_v14 = vpack.c.bf16 %v2704_v58, %v2700_v49  ;;  %v3079_v18 = vld [vmem:[%s5800_s15 + $0x1a8] sm:$0xff]  ;;  %v3032_v58 = vld [vmem:[%s5800_s15 + $0x30] sm:$0xff] }
 0x664   : > { %2802 = vmatprep.mubr.f32.mxu0 %v2552_v42  ;;  %2944 = vmatprep.mubr.f32.mxu1 %v2552_v42  ;;  %v3916_v21 = vpack.c.bf16 %v2701_v31, %v2697_v15  ;;  %v3078_v17 = vld [vmem:[%s5800_s15 + $0x1a0] sm:$0xff]  ;;  %v4046_v15 = vpack.c.bf16 %v3081_v50, %v3080_v29  ;;  %v3064_v31 = vld [vmem:[%s5800_s15 + $0x130] sm:$0xff] }
 0x665   : > { %2803 = vmatmul.mubr.f32.vlgmr.msra.gmra.mrb[42].mxu0 %v2551_v38  ;;  %2945 = vmatmul.mubr.f32.vlgmr.msra.gmra.mrb[48].mxu1 %v2551_v38  ;;  %v4010_v38 = vpack.c.bf16 %v3047_v13, %v3046_v26  ;;  %v4042_v42 = vpack.c.bf16 %v3079_v18, %v3078_v17  ;;  %v3088_v26 = vld [vmem:[%s5800_s15 + $0x1f0] sm:$0xff]  ;;  %v3089_v17 = vld [vmem:[%s5800_s15 + $0x1f8] sm:$0xff]  ;;  %v2713_v29 = vld [vmem:[%s5799_s14] sm:$0xf] }
 0x666   : > { %3909 = vmatpush1.bf16.msra.mxu0 %v3908_v30  ;;  %3989 = vmatpush1.bf16.msra.mxu1 %v3988_v34  ;;  %v4008_v30 = vpack.c.bf16 %v3029_v43, %v3028_v11  ;;  %v4040_v34 = vpack.c.bf16 %v3061_v61, %v3060_v54  ;;  %v3070_v11 = vld [vmem:[%s5800_s15 + $0x160] sm:$0xff]  ;;  %v3056_v54 = vld [vmem:[%s5800_s15 + $0xf0] sm:$0xff]  ;;  %v3057_v61 = vld [vmem:[%s5800_s15 + $0xf8] sm:$0xff] }
 0x667   : > { %3911 = vmatprep.subr.bf16.mxu0 %v3910_v44  ;;  %3991 = vmatprep.subr.bf16.mxu1 %v3990_v52  ;;  %v3063_v44 = vld [vmem:[%s5800_s15 + $0x128] sm:$0xff]  ;;  %v3048_v52 = vld [vmem:[%s5800_s15 + $0xb0] sm:$0xff]  ;;  %v4030_v13 = vpack.c.bf16 %v3057_v61, %v3056_v54 }
 0x668   : > { %2873 = vmatprep.mubr.f32.mxu0 %v4243_v16  ;;  %3015 = vmatprep.mubr.f32.mxu1 %v4243_v16  ;;  %v3035_v16 = vld [vmem:[%s5800_s15 + $0x48] sm:$0xff]  ;;  %v3040_v18 = vld [vmem:[%s5800_s15 + $0x70] sm:$0xff] }
 0x669   : > { %v4020_v2 = vpack.c.bf16 %v3035_v16, %v3034_v4 }
 0x66a   : > { %3913 = vmatpush1.bf16.msra.mxu0 %v3912_v62  ;;  %3993 = vmatpush1.bf16.msra.mxu1 %v3992_v63  ;;  %v3033_v62 = vld [vmem:[%s5800_s15 + $0x38] sm:$0xff]  ;;  %v4014_v63 = vpack.c.bf16 %v3049_v36, %v3048_v52 }
 0x66b   : > { %3915 = vmatprep.subr.bf16.mxu0 %v3914_v60  ;;  %3995 = vmatprep.subr.bf16.mxu1 %v3994_v14  ;;  %v3065_v60 = vld [vmem:[%s5800_s15 + $0x138] sm:$0xff]  ;;  %v3050_v14 = vld [vmem:[%s5800_s15 + $0xc0] sm:$0xff]  ;;  %v4016_v53 = vpack.c.bf16 %v3033_v62, %v3032_v58 }
 0x66c   : > { %v4048_v3 = vpack.c.bf16 %v3065_v60, %v3064_v31 }
 0x66e   : > { %3917 = vmatpush1.bf16.msra.mxu0 %v3916_v21  ;;  %3997 = vmatpush1.bf16.msra.mxu1 %v3996_v57  ;;  %v4018_v21 = vpack.c.bf16 %v3051_v55, %v3050_v14  ;;  %v4050_v57 = vpack.c.bf16 %v3083_v51, %v3082_v6 }
 0x66f   : > { %3919 = vmatprep.subr.bf16.mxu0 %v3918_v0  ;;  %3999 = vmatprep.subr.bf16.mxu1 %v3998_v45  ;;  %v3052_v0 = vld [vmem:[%s5800_s15 + $0xd0] sm:$0xff]  ;;  %v3053_v45 = vld [vmem:[%s5800_s15 + $0xd8] sm:$0xff] }
 0x672   : > { %3921 = vmatpush1.bf16.msra.mxu0 %v3920_v40  ;;  %4001 = vmatpush1.bf16.msra.mxu1 %v4000_v35  ;;  %v4022_v40 = vpack.c.bf16 %v3053_v45, %v3052_v0  ;;  %v4054_v35 = vpack.c.bf16 %v3085_v9, %v3084_v1 }
 0x673   : > { %4003 = vmatprep.subr.bf16.mxu0 %v4002_v23  ;;  %4035 = vmatprep.subr.bf16.mxu1 %v4034_v8  ;;  %v3054_v23 = vld [vmem:[%s5800_s15 + $0xe0] sm:$0xff]  ;;  %v3055_v8 = vld [vmem:[%s5800_s15 + $0xe8] sm:$0xff] }
 0x674   : > { %v4026_v27 = vpack.c.bf16 %v3055_v8, %v3054_v23 }
 0x675   : > { %3421 = vmatmul.mubr.msk.f32.vlgmr.msra.gmra.mrb[42].mxu0 %vm1509_vm7, %v5531_v24  ;;  %3422 = vmatmul.mubr.msk.f32.vlgmr.msra.gmra.mrb[48].mxu1 %vm1509_vm7, %v5531_v24  ;;  %v3062_v24 = vld [vmem:[%s5800_s15 + $0x120] sm:$0xff] }
 0x676   : > { %4005 = vmatpush3.bf16.msra.mxu0 %v4004_v46  ;;  %4037 = vmatpush3.bf16.msra.mxu1 %v4036_v10  ;;  %v4044_v49 = vpack.c.bf16 %v3063_v44, %v3062_v24  ;;  %v3038_v46 = vld [vmem:[%s5800_s15 + $0x60] sm:$0xff]  ;;  %v3039_v10 = vld [vmem:[%s5800_s15 + $0x68] sm:$0xff]  ;;  %v2715_v24 = vlaneseq }
 0x677   : > { %4007 = vmatprep.subr.bf16.mxu0 %v4006_v41  ;;  %4039 = vmatprep.subr.bf16.mxu1 %v4038_v39  ;;  %v4028_v43 = vpack.c.bf16 %v3039_v10, %v3038_v46  ;;  %v3071_v41 = vld [vmem:[%s5800_s15 + $0x168] sm:$0xff] }
 0x678   : > { %v4060_v39 = vpack.c.bf16 %v3071_v41, %v3070_v11  ;;  %v2716_v44 = vshrl.u32 %v2715_v24, 7 }
 0x67a   : > { %4009 = vmatpush3.bf16.msra.mxu0 %v4008_v30  ;;  %4041 = vmatpush3.bf16.msra.mxu1 %v4040_v34  ;;  %v3041_v30 = vld [vmem:[%s5800_s15 + $0x78] sm:$0xff]  ;;  %v4062_v34 = vpack.c.bf16 %v3089_v17, %v3088_v26  ;;  %v2717_v52 = vsub.s32 0, %v2716_v44  ;;  %v2725_v36 = vsub.s32 2, %v2716_v44  ;;  %v2721_v50 = vsub.s32 1, %v2716_v44 }
 0x67b   : > { %4011 = vmatprep.subr.bf16.mxu0 %v4010_v38  ;;  %4043 = vmatprep.subr.bf16.mxu1 %v4042_v42  ;;  %v4032_v19 = vpack.c.bf16 %v3041_v30, %v3040_v18  ;;  %v3073_v38 = vld [vmem:[%s5800_s15 + $0x178] sm:$0xff] }
 0x67c   : > { %v4064_v42 = vpack.c.bf16 %v3073_v38, %v3072_v22  ;;  %v2726_v58 = vrot.slane %v2713_v29, %v2725_v36  ;;  %v2722_v62 = vrot.slane %v2713_v29, %v2721_v50 }
 0x67e   : > { %4013 = vmatpush3.bf16.msra.mxu0 %v4012_v47  ;;  %4045 = vmatpush3.bf16.msra.mxu1 %v4044_v49  ;;  %v2729_v47 = vsub.s32 3, %v2716_v44  ;;  %v2718_v49 = vrot.slane %v2713_v29, %v2717_v52 }
 0x67f   : > { %4015 = vmatprep.subr.bf16.mxu0 %v4014_v63  ;;  %4047 = vmatprep.subr.bf16.mxu1 %v4046_v15 }
 0x680   : > { %v2730_v63 = vrot.slane %v2713_v29, %v2729_v47 }
 0x682   : > { %4017 = vmatpush3.bf16.msra.mxu0 %v4016_v53  ;;  %4049 = vmatpush3.bf16.msra.mxu1 %v4048_v3 }
 0x683   : > { %4019 = vmatprep.subr.bf16.mxu0 %v4018_v21  ;;  %4051 = vmatprep.subr.bf16.mxu1 %v4050_v57 }
 0x686   : > { %4021 = vmatpush3.bf16.msra.mxu0 %v4020_v2  ;;  %4053 = vmatpush3.bf16.msra.mxu1 %v4052_v48 }
 0x687   : > { %4023 = vmatprep.subr.bf16.mxu0 %v4022_v40  ;;  %4055 = vmatprep.subr.bf16.mxu1 %v4054_v35 }
 0x68a   : > { %4025 = vmatpush3.bf16.msra.mxu0 %v4024_v25  ;;  %4057 = vmatpush3.bf16.msra.mxu1 %v4056_v28 }
 0x68b   : > { %4027 = vmatprep.subr.bf16.mxu0 %v4026_v27  ;;  %4059 = vmatprep.subr.bf16.mxu1 %v4058_v12 }
 0x68e   : > { %4029 = vmatpush3.bf16.msra.mxu0 %v4028_v43  ;;  %4061 = vmatpush3.bf16.msra.mxu1 %v4060_v39 }
 0x68f   : > { %4031 = vmatprep.subr.bf16.mxu0 %v4030_v13  ;;  %4063 = vmatprep.subr.bf16.mxu1 %v4062_v34 }
 0x692   : > { %4033 = vmatpush3.bf16.msra.mxu0 %v4032_v19  ;;  %4065 = vmatpush3.bf16.msra.mxu1 %v4064_v42 }
 0x748   : > { %v2875_v15 = vpop.f32.mrb[42].mxu0  ;;  %v3017_v31 = vpop.f32.mrb[48].mxu1 }
 0x749   : > { %v4066_v60 = vadd.f32 %v2875_v15, %v2718_v49  ;;  %v4068_v14 = vadd.f32 %v3017_v31, %v2726_v58  ;;  %v2877_v55 = vpop.f32.mrb[43].mxu0  ;;  %v3019_v6 = vpop.f32.mrb[49].mxu1 }
 0x74a   : > { %v4067_v51 = vadd.f32 %v2877_v55, %v2722_v62  ;;  %v4069_v53 = vadd.f32 %v3019_v6, %v2730_v63 }
 0x74b   : > { %v3022_v16 = vmax.f32 %v4066_v60, 0.0  ;;  %v3024_v21 = vmax.f32 %v4068_v14, 0.0 }
 0x74c   : > { %v3023_v3 = vmax.f32 %v4067_v51, 0.0  ;;  %v3025_v4 = vmax.f32 %v4069_v53, 0.0 }
 0x74e   : > { %3161 = vmatprep.mubr.f32.mxu0 %v3023_v3  ;;  %3231 = vmatprep.mubr.f32.mxu1 %v3025_v4 }
 0x74f   : > { %3162 = vmatmul.mubr.f32.vlgmr.msra.gmra.mrb[44].mxu0 %v3022_v16  ;;  %3232 = vmatmul.mubr.f32.vlgmr.msra.gmra.mrb[50].mxu1 %v3024_v21 }
 0x822   : > { %v3557_v57 = vpop.f32.mrb[44].mxu0  ;;  %v3592_v56 = vpop.f32.mrb[50].mxu1 }
 0x823   : > { %v3558_v0 = vpop.f32.mrb[45].mxu0  ;;  %v3593_v45 = vpop.f32.mrb[51].mxu1 }
 0x824   : > { %v3559_v1 = vadd.f32 %v3558_v0, %v3557_v57  ;;  %v3594_v9 = vadd.f32 %v3593_v45, %v3592_v56 }
 0x826   : > { %v3164_v2 = vadd.f32 %v3559_v1, %v3423_v59 }
 0x828   : > { %v3234_v48 = vadd.f32 %v3594_v9, %v3164_v2 }
 0x82a   : > { %3237 = vst [vmem:[%s556_s0] sm:$0xff] %v3234_v48 }
 0x82b   : > { %4179 = shalt.err (!%p4176_p7)
}
 0x82c   : > { %s4180_s20 = scalar_lea.hbm %s5743_s24, 128  ;;  %s4184_s0 = scalar_lea.hbm %s5802_s17, 256 }
 0x82d   : > { %p4181_p8 = scmp.ne.s32.totalorder %s5743_s24, %s4180_s20  ;;  %p4185_p1 = scmp.lt.u32.totalorder %s5743_s24, %s5802_s17 }
 0x82e   : > { %p4186_p0 = scmp.lt.u32.totalorder %s4184_s0, %s4180_s20  ;;  %p4188_p6 = scmp.lt.u32.totalorder %s4180_s20, %s5743_s24 }
 0x82f   : > { %p4182_p11 = pnand %p4181_p8, %p5832_p9 }
 0x830   : > { %p4187_p5 = por %p4186_p0, %p4185_p1 }
 0x831   : > { %p4183_p13 = pneg %p4182_p11 }
 0x832   : > { %p4189_p10 = por %p4188_p6, %p4187_p5 }
 0x834   : > { %p4190_p12 = pnand %p4189_p10, %p4183_p13 }
 0x836   : > { %4193 = shalt.err (!%p4190_p12)
}
 0x837   : > { %4078 = dma.vmem_to_hbm [thread:$0]  (%p5832_p9), %s5745_s23, 128, %s5743_s24, %s3239_s27  }
 0x838 PF: > { %s5833_s19 = sld [smem:[#allocation10_spill]]  ;;  %s5834_s28 = sld [smem:[#allocation8_spill]] }
 0x839   : > { %s5835_s26 = sld [smem:[#allocation13_spill]] }
 0x83e   : > { %p4090_p2 = scmp.ge.s32.totalorder %s5833_s19, 2  ;;  %s3264_s29 = sand.u32 1, %s5834_s28  }
 0x83f   : > { %p5836_p3 = scmp.ne.s32.totalorder %s5835_s26, 0  ;;  %s3265_s22 = scalar_lea.sflag [#allocation4], %s3264_s29 }
 0x841   : > { %p4085_p4 = pnand %p4090_p2, %p5836_p3 }
 0x843   : > { %4215 = dma.done.wait (!%p4085_p4), %s3265_s22, 128  }
 0x844   : > { %4217 = vsyncadd (!%p4085_p4), %s3265_s22, 4294967168  ;;  %s5837_s27 = sld [smem:[#allocation11_spill]]  ;;  %s5838_s20 = sld [smem:[#allocation9_spill]] }
 0x845   : > { %s5839_s26 = sld [smem:[#allocation12_spill]]  ;;  %s5840_s24 = smov %s4224_s25 }
 0x84a   : > { %p28_p7 = scmp.ge.s32.totalorder %s5837_s27, 4   ;;  %s5841_s25 = smov %s5838_s20 }
 0x84c   :  { %30 = sbr.rel (!%p28_p7) target bundleno = 8 (0x8), region = 128 }
 0x853   :  { %3270 = vsyncpa [#allocation3], 1 }
 0x854   :  { %3272 = vsyncpa [#allocation3 + $0x1], 1 }
 0x855   :  { %3273 = vsyncpa [#allocation4], 1 }
 0x856   :  { %3275 = vsyncpa [#allocation4 + $0x1], 1 }

</bundles_post_ra>
